<compile_context>
chip_gen: v6e
topology: v6e:2x2x1
jax: 0.10.0
libtpu: 0.0.40
codegen_flags: <defaults>
</compile_context>

<pallas_src>
import functools
import math

import jax
import jax.numpy as jnp
from jax.experimental import pallas as pl
from jax.experimental.pallas import tpu as pltpu

# Keep kernel-path and pure-JAX reference matmuls at matching (full f32)
# precision so the correctness check stays tight.
jax.config.update("jax_default_matmul_precision", "highest")


# ----------------------------------------------------------------------------
# Tiling helpers
# ----------------------------------------------------------------------------
def _round_up(x, m):
    return ((x + m - 1) // m) * m


def _sublane(dtype):
    # 8 rows per vreg for 4-byte dtypes, 16 for 2-byte, 32 for 1-byte.
    return max(8, 32 // jnp.dtype(dtype).itemsize)


def _row_tile(rows, target, sub):
    """Row tile: the full extent when it fits the target (single block, no
    alignment issue), else the largest sub-aligned tile <= target (the partial
    last block is masked by Pallas -- no jnp.pad / output slicing)."""
    if rows <= target:
        return rows
    return max(sub, (target // sub) * sub)


def _divisor_tile(dim, target, align):
    """Largest multiple of `align` that divides `dim` and is <= target, else dim."""
    if dim <= target:
        return dim
    t = (min(target, dim) // align) * align
    while t >= align:
        if dim % t == 0:
            return t
        t -= align
    return dim


# ----------------------------------------------------------------------------
# Kernel 1: fused RMSNorm + Q/K/V projection.
# The x tile is read from HBM once and drives all three MXU dots; the norm is
# VPU work hidden under the matmuls.  K (= hidden) is kept untiled so the
# per-row variance is computable in-kernel.
# ----------------------------------------------------------------------------
def _rmsnorm_qkv_kernel(x_ref, lnw_ref, wq_ref, wk_ref, wv_ref,
                        q_ref, k_ref, v_ref, *, eps):
    x = x_ref[...].astype(jnp.float32)
    var = jnp.mean(x * x, axis=-1, keepdims=True)
    xn = lnw_ref[...].astype(jnp.float32) * (x * jax.lax.rsqrt(var + eps))
    q_ref[...] = jnp.dot(xn, wq_ref[...],
                         preferred_element_type=jnp.float32).astype(q_ref.dtype)
    k_ref[...] = jnp.dot(xn, wk_ref[...],
                         preferred_element_type=jnp.float32).astype(k_ref.dtype)
    v_ref[...] = jnp.dot(xn, wv_ref[...],
                         preferred_element_type=jnp.float32).astype(v_ref.dtype)


def rmsnorm_qkv(x2, ln_w, wq, wk, wv, *, eps):
    rows, hidden = x2.shape
    sub = _sublane(x2.dtype)
    tm = _row_tile(rows, 256, sub)
    tn = _divisor_tile(hidden, 512, 128)
    grid = (pl.cdiv(rows, tm), hidden // tn)
    itemsize = jnp.dtype(x2.dtype).itemsize
    out_sds = jax.ShapeDtypeStruct((rows, hidden), x2.dtype)

    return pl.pallas_call(
        functools.partial(_rmsnorm_qkv_kernel, eps=eps),
        out_shape=(out_sds, out_sds, out_sds),
        grid_spec=pltpu.PrefetchScalarGridSpec(
            num_scalar_prefetch=0,
            grid=grid,
            in_specs=[
                pl.BlockSpec((tm, hidden), lambda i, j: (i, 0)),
                pl.BlockSpec((1, hidden), lambda i, j: (0, 0)),
                pl.BlockSpec((hidden, tn), lambda i, j: (0, j)),
                pl.BlockSpec((hidden, tn), lambda i, j: (0, j)),
                pl.BlockSpec((hidden, tn), lambda i, j: (0, j)),
            ],
            out_specs=[
                pl.BlockSpec((tm, tn), lambda i, j: (i, j)),
                pl.BlockSpec((tm, tn), lambda i, j: (i, j)),
                pl.BlockSpec((tm, tn), lambda i, j: (i, j)),
            ],
        ),
        compiler_params=pltpu.CompilerParams(
            dimension_semantics=("parallel", "parallel"),
            vmem_limit_bytes=48 * 2 ** 20,
        ),
        cost_estimate=pl.CostEstimate(
            flops=int(6 * rows * hidden * hidden + 3 * rows * hidden),
            transcendentals=int(rows),
            bytes_accessed=int((4 * rows * hidden + 3 * hidden * hidden + hidden)
                               * itemsize),
        ),
    )(x2, ln_w.reshape(1, hidden), wq, wk, wv)


# ----------------------------------------------------------------------------
# Kernel 2: multi-head linear attention, flash-style over the KV axis.
# q/k/v stay in (B, S, hidden) layout (no head transposes); heads are a static
# unroll inside the kernel; per-head m/l/acc live in VMEM scratch so nothing
# O(S^2) is materialized.
# ----------------------------------------------------------------------------
def _linear_flash_attn_kernel(q_ref, k_ref, v_ref, o_ref, m_scr, l_scr, acc_scr,
                              *, num_heads, head_dim):
    kv_i = pl.program_id(2)

    @pl.when(kv_i == 0)
    def _():
        m_scr[...] = jnp.full_like(m_scr, -jnp.inf)
        l_scr[...] = jnp.zeros_like(l_scr)
        acc_scr[...] = jnp.zeros_like(acc_scr)

    # elu(x)+1  ==  x+1 (x>0) | exp(x) (x<=0); applied on whole lane-dense tile.
    q_all = q_ref[0].astype(jnp.float32)
    k_all = k_ref[0].astype(jnp.float32)
    v_all = v_ref[0].astype(jnp.float32)
    q_all = jnp.where(q_all > 0, q_all + 1.0, jnp.exp(q_all))
    k_all = jnp.where(k_all > 0, k_all + 1.0, jnp.exp(k_all))

    for h in range(num_heads):                 # static unroll over heads
        lo = h * head_dim
        q = q_all[:, lo:lo + head_dim]
        k = k_all[:, lo:lo + head_dim]
        v = v_all[:, lo:lo + head_dim]
        s = jax.lax.dot_general(q, k, (((1,), (1,)), ((), ())),
                                preferred_element_type=jnp.float32)   # (tq, tkv)
        m_prev = m_scr[h]
        m_new = jnp.maximum(m_prev, jnp.max(s, axis=-1, keepdims=True))
        alpha = jnp.exp(m_prev - m_new)
        p = jnp.exp(s - m_new)
        l_scr[h] = alpha * l_scr[h] + jnp.sum(p, axis=-1, keepdims=True)
        acc_scr[h] = alpha * acc_scr[h] + jnp.dot(p, v,
                                                  preferred_element_type=jnp.float32)
        m_scr[h] = m_new

    @pl.when(kv_i == pl.num_programs(2) - 1)
    def _():
        # TODO(synk): attention_mask != None branch and training-mode
        # dropout(p=0.1) on the attention weights are not implemented
        # (inference path, mask=None).
        for h in range(num_heads):
            lo = h * head_dim
            inv_l = pl.reciprocal(l_scr[h], approx=True)
            o_ref[0, :, lo:lo + head_dim] = (acc_scr[h] * inv_l).astype(o_ref.dtype)


def linear_attention(q, k, v, *, num_heads):
    """q, k, v, out: (B, S, hidden)."""
    B, S, hidden = q.shape
    head_dim = hidden // num_heads
    tq = _divisor_tile(S, 256, 8)
    tkv = _divisor_tile(S, 512, 8)
    grid = (B, S // tq, S // tkv)

    q_spec = pl.BlockSpec((1, tq, hidden), lambda b, qi, ki: (b, qi, 0))
    kv_spec = pl.BlockSpec((1, tkv, hidden), lambda b, qi, ki: (b, ki, 0))

    return pl.pallas_call(
        functools.partial(_linear_flash_attn_kernel,
                          num_heads=num_heads, head_dim=head_dim),
        out_shape=jax.ShapeDtypeStruct((B, S, hidden), q.dtype),
        grid_spec=pltpu.PrefetchScalarGridSpec(
            num_scalar_prefetch=0,
            grid=grid,
            in_specs=[q_spec, kv_spec, kv_spec],
            out_specs=q_spec,
            scratch_shapes=[
                pltpu.VMEM((num_heads, tq, 1), jnp.float32),       # m
                pltpu.VMEM((num_heads, tq, 1), jnp.float32),       # l
                pltpu.VMEM((num_heads, tq, head_dim), jnp.float32)  # acc
            ],
        ),
        compiler_params=pltpu.CompilerParams(
            dimension_semantics=("parallel", "parallel", "arbitrary"),
            vmem_limit_bytes=48 * 2 ** 20,
        ),
        cost_estimate=pl.CostEstimate(
            flops=int(4 * B * S * S * hidden),
            transcendentals=int(B * num_heads * S * S),
            bytes_accessed=int(4 * B * S * hidden * jnp.dtype(q.dtype).itemsize),
        ),
    )(q, k, v)


# ----------------------------------------------------------------------------
# Kernel 3: o-projection with the residual add fused on the output tile.
# ----------------------------------------------------------------------------
def _linear_residual_kernel(x_ref, w_ref, res_ref, o_ref):
    y = jnp.dot(x_ref[...], w_ref[...], preferred_element_type=jnp.float32)
    o_ref[...] = (y + res_ref[...].astype(jnp.float32)).astype(o_ref.dtype)


def linear_residual(x2, w, res2):
    rows, K = x2.shape
    N = w.shape[1]
    sub = _sublane(x2.dtype)
    tm = _row_tile(rows, 256, sub)
    tn = _divisor_tile(N, 512, 128)
    grid = (pl.cdiv(rows, tm), N // tn)

    return pl.pallas_call(
        _linear_residual_kernel,
        out_shape=jax.ShapeDtypeStruct((rows, N), x2.dtype),
        grid_spec=pltpu.PrefetchScalarGridSpec(
            num_scalar_prefetch=0,
            grid=grid,
            in_specs=[
                pl.BlockSpec((tm, K), lambda i, j: (i, 0)),
                pl.BlockSpec((K, tn), lambda i, j: (0, j)),
                pl.BlockSpec((tm, tn), lambda i, j: (i, j)),
            ],
            out_specs=pl.BlockSpec((tm, tn), lambda i, j: (i, j)),
        ),
        compiler_params=pltpu.CompilerParams(
            dimension_semantics=("parallel", "parallel"),
            vmem_limit_bytes=48 * 2 ** 20,
        ),
    )(x2, w, res2)


# ----------------------------------------------------------------------------
# Kernel 4: fused RMSNorm + router projection (+ bias).  Tiny N (= num_experts)
# output; the norm is recomputed in-kernel so the normalized activation is
# never written to HBM.
# ----------------------------------------------------------------------------
def _rmsnorm_router_kernel(x_ref, lnw_ref, w_ref, b_ref, o_ref, *, eps):
    x = x_ref[...].astype(jnp.float32)
    var = jnp.mean(x * x, axis=-1, keepdims=True)
    xn = lnw_ref[...].astype(jnp.float32) * (x * jax.lax.rsqrt(var + eps))
    o_ref[...] = (jnp.dot(xn, w_ref[...].astype(jnp.float32),
                          preferred_element_type=jnp.float32)
                  + b_ref[...].astype(jnp.float32)).astype(o_ref.dtype)


def rmsnorm_router(h2, ln_w, w, b, *, eps):
    rows, hidden = h2.shape
    E = w.shape[1]
    sub = _sublane(h2.dtype)
    tm = _row_tile(rows, 512, sub)
    grid = (pl.cdiv(rows, tm),)

    return pl.pallas_call(
        functools.partial(_rmsnorm_router_kernel, eps=eps),
        out_shape=jax.ShapeDtypeStruct((rows, E), jnp.float32),
        grid_spec=pltpu.PrefetchScalarGridSpec(
            num_scalar_prefetch=0,
            grid=grid,
            in_specs=[
                pl.BlockSpec((tm, hidden), lambda i: (i, 0)),
                pl.BlockSpec((1, hidden), lambda i: (0, 0)),
                pl.BlockSpec((hidden, E), lambda i: (0, 0)),
                pl.BlockSpec((1, E), lambda i: (0, 0)),
            ],
            out_specs=pl.BlockSpec((tm, E), lambda i: (i, 0)),
        ),
        compiler_params=pltpu.CompilerParams(dimension_semantics=("parallel",)),
    )(h2, ln_w.reshape(1, hidden), w, b.reshape(1, E))


# ----------------------------------------------------------------------------
# Kernel 5: fused RMSNorm + MoE experts + weighted accumulate + residual.
# Grid (row, expert, inter); f32 accumulator starts at the residual, expert
# weight blocks are streamed per (e, it) step, the per-token routing weight *
# gate scaling is folded into the accumulation.
# ----------------------------------------------------------------------------
def _moe_expert_kernel(h_ref, lnw_ref, scale_ref, wg_ref, wu_ref, wd_ref,
                       o_ref, acc_ref, xn_ref, *, eps):
    e = pl.program_id(1)
    it = pl.program_id(2)

    @pl.when(jnp.logical_and(e == 0, it == 0))
    def _():
        x = h_ref[...].astype(jnp.float32)
        var = jnp.mean(x * x, axis=-1, keepdims=True)
        xn_ref[...] = lnw_ref[...].astype(jnp.float32) * (x * jax.lax.rsqrt(var + eps))
        acc_ref[...] = x            # fused residual add: accumulate on top of it

    xn = xn_ref[...]
    g = jnp.dot(xn, wg_ref[0], preferred_element_type=jnp.float32)
    u = jnp.dot(xn, wu_ref[0], preferred_element_type=jnp.float32)
    act = g * jax.nn.sigmoid(g) * u                         # SiLU(gate) * up
    scale = scale_ref[0].astype(jnp.float32)                # (tm, 1)
    acc_ref[...] += scale * jnp.dot(act, wd_ref[0],
                                    preferred_element_type=jnp.float32)

    @pl.when(jnp.logical_and(e == pl.num_programs(1) - 1,
                             it == pl.num_programs(2) - 1))
    def _():
        o_ref[...] = acc_ref[...].astype(o_ref.dtype)


def moe_experts(h2, ln_w, scale, wg, wu, wd, *, eps):
    rows, hidden = h2.shape
    E, _, inter = wg.shape
    sub = _sublane(h2.dtype)
    tm = _row_tile(rows, 256, sub)
    t_in = _divisor_tile(inter, 512, 128)
    grid = (pl.cdiv(rows, tm), E, inter // t_in)
    itemsize = jnp.dtype(h2.dtype).itemsize

    return pl.pallas_call(
        functools.partial(_moe_expert_kernel, eps=eps),
        out_shape=jax.ShapeDtypeStruct((rows, hidden), h2.dtype),
        grid_spec=pltpu.PrefetchScalarGridSpec(
            num_scalar_prefetch=0,
            grid=grid,
            in_specs=[
                pl.BlockSpec((tm, hidden), lambda i, e, it: (i, 0)),
                pl.BlockSpec((1, hidden), lambda i, e, it: (0, 0)),
                pl.BlockSpec((1, tm, 1), lambda i, e, it: (e, i, 0)),
                pl.BlockSpec((1, hidden, t_in), lambda i, e, it: (e, 0, it)),
                pl.BlockSpec((1, hidden, t_in), lambda i, e, it: (e, 0, it)),
                pl.BlockSpec((1, t_in, hidden), lambda i, e, it: (e, it, 0)),
            ],
            out_specs=pl.BlockSpec((tm, hidden), lambda i, e, it: (i, 0)),
            scratch_shapes=[
                pltpu.VMEM((tm, hidden), jnp.float32),   # accumulator (starts at residual)
                pltpu.VMEM((tm, hidden), jnp.float32),   # cached normalized activation
            ],
        ),
        compiler_params=pltpu.CompilerParams(
            dimension_semantics=("parallel", "arbitrary", "arbitrary"),
            vmem_limit_bytes=48 * 2 ** 20,
        ),
        cost_estimate=pl.CostEstimate(
            flops=int(6 * E * rows * hidden * inter),
            transcendentals=int(E * rows * inter),
            bytes_accessed=int((2 * rows * hidden + 3 * E * hidden * inter) * itemsize),
        ),
    )(h2, ln_w.reshape(1, hidden), scale, wg, wu, wd)


# ----------------------------------------------------------------------------
# Module-level forward (composition + thin JAX glue for routing)
# ----------------------------------------------------------------------------
def llama_decoder_layer(x, params, *, num_heads, num_experts, eps=1e-6,
                        attention_mask=None):
    # TODO(synk): attention_mask path not implemented (inference, mask=None).
    assert attention_mask is None
    B, S, hidden = x.shape
    rows = B * S
    x2 = x.reshape(rows, hidden)

    # Attention block: fused norm+QKV -> flash linear attention -> o_proj+residual.
    q, k, v = rmsnorm_qkv(x2, params["ln1_w"], params["wq"], params["wk"],
                          params["wv"], eps=eps)
    attn = linear_attention(q.reshape(B, S, hidden), k.reshape(B, S, hidden),
                            v.reshape(B, S, hidden), num_heads=num_heads)
    h1 = linear_residual(attn.reshape(rows, hidden), params["wo"], x2)

    # MoE block: fused norm+router -> (JAX) softmax/top-k/gates -> fused experts.
    logits = rmsnorm_router(h1, params["ln2_w"], params["router_w"],
                            params["router_b"], eps=eps)
    rw = jax.nn.softmax(logits, axis=-1)                                   # (rows, E)
    mean_routing = jnp.mean(rw.reshape(B, S, num_experts), axis=0)
    balance_loss = jnp.mean((mean_routing - 1.0 / num_experts) ** 2) * 0.01
    _, top_k_idx = jax.lax.top_k(rw, 2)
    # PyTorch runs expert e only if ANY token routed to it (top-2), but weights
    # every token by the FULL softmax weight -> global 0/1 gate per expert.
    gate = (jnp.sum(jax.nn.one_hot(top_k_idx, num_experts, dtype=jnp.float32),
                    axis=(0, 1)) > 0).astype(jnp.float32)
    scale = (rw * gate[None, :]).T[:, :, None]                             # (E, rows, 1)

    wg = jnp.stack([params["experts"][i][0] for i in range(num_experts)])
    wu = jnp.stack([params["experts"][i][1] for i in range(num_experts)])
    wd = jnp.stack([params["experts"][i][2] for i in range(num_experts)])
    out2 = moe_experts(h1, params["ln2_w"], scale, wg, wu, wd, eps=eps)

    return out2.reshape(B, S, hidden), balance_loss.astype(jnp.float32)


# ----------------------------------------------------------------------------
# Pure-JAX reference (mirrors the PyTorch forward) for correctness checking
# ----------------------------------------------------------------------------
def _reference_decoder_layer(x, params, *, num_heads, num_experts, eps=1e-6):
    def rms(h, w):
        var = jnp.mean(h * h, axis=-1, keepdims=True)
        return w * (h * jax.lax.rsqrt(var + eps))

    B, S, hidden = x.shape
    D = hidden // num_heads

    residual = x
    h = rms(x, params["ln1_w"])
    q = h @ params["wq"]
    k = h @ params["wk"]
    v = h @ params["wv"]

    def split(t):
        return t.reshape(B, S, num_heads, D).transpose(0, 2, 1, 3)

    q, k, v = split(q), split(k), split(v)
    q = jax.nn.elu(q) + 1.0
    k = jax.nn.elu(k) + 1.0
    attn_w = jax.nn.softmax(q @ jnp.swapaxes(k, -1, -2), axis=-1)
    attn = (attn_w @ v).transpose(0, 2, 1, 3).reshape(B, S, hidden)
    attn = attn @ params["wo"]
    h = residual + attn

    residual = h
    h = rms(h, params["ln2_w"])
    logits = h @ params["router_w"] + params["router_b"]
    rw = jax.nn.softmax(logits, axis=-1)
    mean_routing = jnp.mean(rw, axis=0)
    bal = jnp.mean((mean_routing - 1.0 / num_experts) ** 2) * 0.01
    _, top_k_idx = jax.lax.top_k(rw, 2)
    out = jnp.zeros_like(h)
    for i in range(num_experts):
        gate = jnp.any(top_k_idx == i).astype(h.dtype)
        wg, wu, wd = params["experts"][i]
        e = (jax.nn.silu(h @ wg) * (h @ wu)) @ wd
        out = out + e * rw[..., i:i + 1] * gate
    return residual + out, bal


if __name__ == "__main__":
    B, S = 2, 8
    HIDDEN, INTER = 256, 512
    NUM_HEADS, NUM_EXPERTS = 4, 4
    EPS = 1e-6

    key = jax.random.PRNGKey(0)
    keys = jax.random.split(key, 8 + 3 * NUM_EXPERTS)

    def init_w(k, shape, scale=0.05):
        return jax.random.normal(k, shape, dtype=jnp.float32) * scale

    params = {
        "ln1_w": jnp.ones((HIDDEN,), jnp.float32),
        "ln2_w": jnp.ones((HIDDEN,), jnp.float32),
        "wq": init_w(keys[0], (HIDDEN, HIDDEN)),
        "wk": init_w(keys[1], (HIDDEN, HIDDEN)),
        "wv": init_w(keys[2], (HIDDEN, HIDDEN)),
        "wo": init_w(keys[3], (HIDDEN, HIDDEN)),
        "router_w": init_w(keys[4], (HIDDEN, NUM_EXPERTS)),
        "router_b": init_w(keys[5], (NUM_EXPERTS,), 0.01),
        "experts": [
            (init_w(keys[6 + 3 * i], (HIDDEN, INTER)),
             init_w(keys[7 + 3 * i], (HIDDEN, INTER)),
             init_w(keys[8 + 3 * i], (INTER, HIDDEN)))
            for i in range(NUM_EXPERTS)
        ],
    }
    x = jax.random.normal(keys[6 + 3 * NUM_EXPERTS], (B, S, HIDDEN), dtype=jnp.float32)

    out, bal = llama_decoder_layer(x, params, num_heads=NUM_HEADS,
                                   num_experts=NUM_EXPERTS, eps=EPS,
                                   attention_mask=None)
    out = jax.block_until_ready(out)
    bal = jax.block_until_ready(bal)

    ref_out, ref_bal = _reference_decoder_layer(x, params, num_heads=NUM_HEADS,
                                                num_experts=NUM_EXPERTS, eps=EPS)

    assert out.shape == x.shape and out.dtype == x.dtype
    max_abs = float(jnp.max(jnp.abs(out - ref_out)))
    rel_fro = float(jnp.linalg.norm((out - ref_out).ravel())
                    / (jnp.linalg.norm(ref_out.ravel()) + 1e-12))
    assert rel_fro < 1e-2 and max_abs < 1e-1, (rel_fro, max_abs)
    assert abs(float(bal) - float(ref_bal)) < 1e-6 + 0.05 * abs(float(ref_bal))

    print("KERNEL_OK")
</pallas_src>

<mosaic_0001>
module attributes {stable_mosaic.version = 11 : i64} {
  func.func @_rmsnorm_qkv_kernel(%arg0: i32, %arg1: i32, %arg2: memref<16x256xf32, #tpu.memory_space<vmem>>, %arg3: memref<1x256xf32, #tpu.memory_space<vmem>>, %arg4: memref<256x256xf32, #tpu.memory_space<vmem>>, %arg5: memref<256x256xf32, #tpu.memory_space<vmem>>, %arg6: memref<256x256xf32, #tpu.memory_space<vmem>>, %arg7: memref<16x256xf32, #tpu.memory_space<vmem>>, %arg8: memref<16x256xf32, #tpu.memory_space<vmem>>, %arg9: memref<16x256xf32, #tpu.memory_space<vmem>>) attributes {dimension_semantics = [#tpu.dimension_semantics<parallel>, #tpu.dimension_semantics<parallel>], iteration_bounds = array<i64: 1, 1>, scalar_prefetch = 0 : i64, scratch_operands = 0 : i64, tpu.core_type = #tpu.core_type<tc>, window_params = [{transform_indices = @transform_0, window_bounds = array<i64: 16, 256>}, {pipeline_mode = #tpu.pipeline_mode<synchronous>, transform_indices = @transform_1, window_bounds = array<i64: 1, 256>}, {transform_indices = @transform_2, window_bounds = array<i64: 256, 256>}, {transform_indices = @transform_3, window_bounds = array<i64: 256, 256>}, {transform_indices = @transform_4, window_bounds = array<i64: 256, 256>}, {transform_indices = @transform_5, window_bounds = array<i64: 16, 256>}, {transform_indices = @transform_6, window_bounds = array<i64: 16, 256>}, {transform_indices = @transform_7, window_bounds = array<i64: 16, 256>}]} {
    %c0 = arith.constant 0 : index
    %c0_0 = arith.constant 0 : index
    %0 = vector.load %arg2[%c0, %c0_0] : memref<16x256xf32, #tpu.memory_space<vmem>>, vector<16x256xf32>
    %1 = arith.mulf %0, %0 : vector<16x256xf32>
    %cst = arith.constant dense<0.000000e+00> : vector<16xf32>
    %2 = vector.multi_reduction <add>, %1, %cst [1] : vector<16x256xf32> to vector<16xf32>
    %3 = vector.shape_cast %2 : vector<16xf32> to vector<16x1xf32>
    %cst_1 = arith.constant 2.560000e+02 : f32
    %4 = vector.broadcast %cst_1 : f32 to vector<16x1xf32>
    %5 = arith.divf %3, %4 : vector<16x1xf32>
    %c0_2 = arith.constant 0 : index
    %c0_3 = arith.constant 0 : index
    %6 = vector.load %arg3[%c0_2, %c0_3] : memref<1x256xf32, #tpu.memory_space<vmem>>, vector<1x256xf32>
    %cst_4 = arith.constant 9.99999997E-7 : f32
    %7 = vector.broadcast %cst_4 : f32 to vector<16x1xf32>
    %8 = arith.addf %5, %7 : vector<16x1xf32>
    %9 = math.rsqrt %8 : vector<16x1xf32>
    %10 = vector.broadcast %9 : vector<16x1xf32> to vector<16x256xf32>
    %11 = arith.mulf %0, %10 : vector<16x256xf32>
    %12 = vector.broadcast %6 : vector<1x256xf32> to vector<16x256xf32>
    %13 = arith.mulf %12, %11 : vector<16x256xf32>
    %c0_5 = arith.constant 0 : index
    %c0_6 = arith.constant 0 : index
    %14 = vector.load %arg4[%c0_5, %c0_6] : memref<256x256xf32, #tpu.memory_space<vmem>>, vector<256x256xf32>
    %cst_7 = arith.constant dense<0.000000e+00> : vector<16x256xf32>
    %15 = tpu.matmul %13, %14, %cst_7 {dimension_numbers = #tpu.dot_dimension_numbers<[1], [0], [0], [1], [0, 0, 1, 1], [], []>, precision = #tpu.contract_precision<fp32>} : vector<16x256xf32>, vector<256x256xf32>, vector<16x256xf32> -> vector<16x256xf32>
    %c0_8 = arith.constant 0 : index
    %c0_9 = arith.constant 0 : index
    %16 = vector.load %arg7[%c0_8, %c0_9] : memref<16x256xf32, #tpu.memory_space<vmem>>, vector<16x256xf32>
    tpu.vector_store %arg7[%c0_8, %c0_9], %15 {strides = array<i32>} : memref<16x256xf32, #tpu.memory_space<vmem>>, vector<16x256xf32>,
    %c0_10 = arith.constant 0 : index
    %c0_11 = arith.constant 0 : index
    %17 = vector.load %arg5[%c0_10, %c0_11] : memref<256x256xf32, #tpu.memory_space<vmem>>, vector<256x256xf32>
    %cst_12 = arith.constant dense<0.000000e+00> : vector<16x256xf32>
    %18 = tpu.matmul %13, %17, %cst_12 {dimension_numbers = #tpu.dot_dimension_numbers<[1], [0], [0], [1], [0, 0, 1, 1], [], []>, precision = #tpu.contract_precision<fp32>} : vector<16x256xf32>, vector<256x256xf32>, vector<16x256xf32> -> vector<16x256xf32>
    %c0_13 = arith.constant 0 : index
    %c0_14 = arith.constant 0 : index
    %19 = vector.load %arg8[%c0_13, %c0_14] : memref<16x256xf32, #tpu.memory_space<vmem>>, vector<16x256xf32>
    tpu.vector_store %arg8[%c0_13, %c0_14], %18 {strides = array<i32>} : memref<16x256xf32, #tpu.memory_space<vmem>>, vector<16x256xf32>,
    %c0_15 = arith.constant 0 : index
    %c0_16 = arith.constant 0 : index
    %20 = vector.load %arg6[%c0_15, %c0_16] : memref<256x256xf32, #tpu.memory_space<vmem>>, vector<256x256xf32>
    %cst_17 = arith.constant dense<0.000000e+00> : vector<16x256xf32>
    %21 = tpu.matmul %13, %20, %cst_17 {dimension_numbers = #tpu.dot_dimension_numbers<[1], [0], [0], [1], [0, 0, 1, 1], [], []>, precision = #tpu.contract_precision<fp32>} : vector<16x256xf32>, vector<256x256xf32>, vector<16x256xf32> -> vector<16x256xf32>
    %c0_18 = arith.constant 0 : index
    %c0_19 = arith.constant 0 : index
    %22 = vector.load %arg9[%c0_18, %c0_19] : memref<16x256xf32, #tpu.memory_space<vmem>>, vector<16x256xf32>
    tpu.vector_store %arg9[%c0_18, %c0_19], %21 {strides = array<i32>} : memref<16x256xf32, #tpu.memory_space<vmem>>, vector<16x256xf32>,
    return
  }
  func.func @transform_0(%arg0: i32, %arg1: i32) -> (i32, i32) {
    %c0_i32 = arith.constant 0 : i32
    %c0_i32_0 = arith.constant 0 : i32
    return %arg0, %c0_i32 : i32, i32
  }
  func.func @transform_1(%arg0: i32, %arg1: i32) -> (i32, i32) {
    %c0_i32 = arith.constant 0 : i32
    %c0_i32_0 = arith.constant 0 : i32
    %c0_i32_1 = arith.constant 0 : i32
    return %c0_i32, %c0_i32_0 : i32, i32
  }
  func.func @transform_2(%arg0: i32, %arg1: i32) -> (i32, i32) {
    %c0_i32 = arith.constant 0 : i32
    %c0_i32_0 = arith.constant 0 : i32
    return %c0_i32, %arg1 : i32, i32
  }
  func.func @transform_3(%arg0: i32, %arg1: i32) -> (i32, i32) {
    %c0_i32 = arith.constant 0 : i32
    %c0_i32_0 = arith.constant 0 : i32
    return %c0_i32, %arg1 : i32, i32
  }
  func.func @transform_4(%arg0: i32, %arg1: i32) -> (i32, i32) {
    %c0_i32 = arith.constant 0 : i32
    %c0_i32_0 = arith.constant 0 : i32
    return %c0_i32, %arg1 : i32, i32
  }
  func.func @transform_5(%arg0: i32, %arg1: i32) -> (i32, i32) {
    %c0_i32 = arith.constant 0 : i32
    return %arg0, %arg1 : i32, i32
  }
  func.func @transform_6(%arg0: i32, %arg1: i32) -> (i32, i32) {
    %c0_i32 = arith.constant 0 : i32
    return %arg0, %arg1 : i32, i32
  }
  func.func @transform_7(%arg0: i32, %arg1: i32) -> (i32, i32) {
    %c0_i32 = arith.constant 0 : i32
    return %arg0, %arg1 : i32, i32
  }
}

</mosaic_0001>

<bundles_post_ra>
// kernel: tpu_custom_call.1
= control target key start
LH: loop header
LB: loop body
LE: loop exit
PB: predicated region body
PF: predicated region fallthrough
CT: control target
= control target key end

     0   :  { %13 = vsyncpa [#allocation3], 0  ;;  %s8149_s0 = inlined_call_operand.hbm [shape: f32[16,256], index: 0, kind: input, shape index: {}]   ;;  %s8150_s1 = inlined_call_operand.hbm [shape: f32[1,256], index: 1, kind: input, shape index: {}]   ;;  %s8151_s2 = inlined_call_operand.hbm [shape: f32[256,256], index: 2, kind: input, shape index: {}]   ;;  %s8152_s3 = inlined_call_operand.hbm [shape: f32[256,256], index: 3, kind: input, shape index: {}]   ;;  %s8153_s4 = inlined_call_operand.hbm [shape: f32[256,256], index: 4, kind: input, shape index: {}]   ;;  %s8154_s5 = inlined_call_operand.hbm [shape: f32[16,256], index: 5, kind: output, shape index: {0}]   ;;  %s8155_s6 = inlined_call_operand.hbm [shape: f32[16,256], index: 6, kind: output, shape index: {1}]   ;;  %s8156_s7 = inlined_call_operand.hbm [shape: f32[16,256], index: 7, kind: output, shape index: {2}]  }
   0x1   :  { %14 = vsyncpa [#allocation6], 0 }
   0x2   :  { %15 = vsyncpa [#allocation9], 0 }
   0x3   :  { %16 = vsyncpa [#allocation4], 0 }
   0x4   :  { %17 = vsyncpa [#allocation13], 0  ;;  %s4612_s24 = smov [#allocation5]  }
   0x5   :  { %s36_s25 = sshll.u32 %s4612_s24, 4  ;;  %s37_s25 = int_to_ptr.vmem [resolvable:$true] %s36_s25 }
   0x6   :  { %s4450_s26 = scalar_lea.vmem %s37_s25, 32  ;;  %p4455_p1 = scmp.lt.s32.totalorder %s37_s25, %s37_s25 }
   0x7   :  { %p4451_p0 = scmp.ne.s32.totalorder %s37_s25, %s4450_s26  ;;  %p4456_p2 = scmp.lt.s32.totalorder %s4450_s26, %s4450_s26 }
   0x9   :  { %p4457_p3 = por %p4456_p2, %p4455_p1 }
   0xb   :  { %p4458_p4 = pnand %p4457_p3, %p4451_p0 }
   0xd   :  { %4461 = shalt.err (!%p4458_p4)
}
   0xe   :  { %39 = dma.hbm_to_vmem [thread:$0]  %s8150_s1, 32, %s37_s25, [#allocation6]  }
   0xf   :  { %s4613_s29 = smov [#allocation8]   ;;  %s4614_s8 = smov [#allocation2]  }
  0x10   :  { %s57_s30 = sshll.u32 %s4613_s29, 4  ;;  %s23_s9 = sshll.u32 %s4614_s8, 4  ;;  %s58_s30 = int_to_ptr.vmem [resolvable:$true] %s57_s30  ;;  %s24_s9 = int_to_ptr.vmem [resolvable:$true] %s23_s9 }
  0x11   :  { %s4470_s10 = scalar_lea.vmem %s58_s30, 8192  ;;  %p4475_p6 = scmp.lt.s32.totalorder %s58_s30, %s58_s30 }
  0x12   :  { %p4471_p5 = scmp.ne.s32.totalorder %s58_s30, %s4470_s10  ;;  %p4476_p7 = scmp.lt.s32.totalorder %s4470_s10, %s4470_s10 }
  0x14   :  { %p4477_p8 = por %p4476_p7, %p4475_p6 }
  0x16   :  { %p4478_p9 = pnand %p4477_p8, %p4471_p5 }
  0x18   :  { %4481 = shalt.err (!%p4478_p9)
}
  0x19   :  { %s4615_s11 = smov 256   ;;  %s4616_s12 = smov 16  }
  0x1a   :  { %63 = dma.hbm_to_vmem [thread:$0]  %s8152_s3, 8192, %s58_s30, [#allocation9], %s4615_s11, %s4615_s11, %s4616_s12  }
  0x1b   :  { %s4490_s1 = scalar_lea.vmem %s24_s9, 512  ;;  %p4495_p11 = scmp.lt.s32.totalorder %s24_s9, %s24_s9 }
  0x1c   :  { %p4491_p10 = scmp.ne.s32.totalorder %s24_s9, %s4490_s1  ;;  %p4496_p12 = scmp.lt.s32.totalorder %s4490_s1, %s4490_s1 }
  0x1e   :  { %p4497_p13 = por %p4496_p12, %p4495_p11 }
  0x20   :  { %p4498_p0 = pnand %p4497_p13, %p4491_p10 }
  0x22   :  { %4501 = shalt.err (!%p4498_p0)
}
  0x23   :  { %29 = dma.hbm_to_vmem [thread:$0]  %s8149_s0, 512, %s24_s9, [#allocation3], %s4615_s11, %s4615_s11, %s4616_s12  }
  0x24   :  { %s4617_s17 = smov [#allocation7]   ;;  %s4618_s19 = smov [#allocation10]  }
  0x25   :  { %s45_s18 = sshll.u32 %s4617_s17, 4  ;;  %s69_s3 = sshll.u32 %s4618_s19, 4  ;;  %s46_s18 = int_to_ptr.vmem [resolvable:$true] %s45_s18  ;;  %s70_s3 = int_to_ptr.vmem [resolvable:$true] %s69_s3 }
  0x26   :  { %s4510_s20 = scalar_lea.vmem %s46_s18, 8192  ;;  %p4515_p2 = scmp.lt.s32.totalorder %s46_s18, %s46_s18 }
  0x27   :  { %p4511_p1 = scmp.ne.s32.totalorder %s46_s18, %s4510_s20  ;;  %p4516_p3 = scmp.lt.s32.totalorder %s4510_s20, %s4510_s20 }
  0x29   :  { %p4517_p4 = por %p4516_p3, %p4515_p2 }
  0x2b   :  { %p4518_p5 = pnand %p4517_p4, %p4511_p1 }
  0x2d   :  { %4521 = shalt.err (!%p4518_p5)
}
  0x2e   :  { %51 = dma.hbm_to_vmem [thread:$0]  %s8151_s2, 8192, %s46_s18, [#allocation6], %s4615_s11, %s4615_s11, %s4616_s12  }
  0x2f   :  { %s4530_s0 = scalar_lea.vmem %s70_s3, 8192  ;;  %p4535_p7 = scmp.lt.s32.totalorder %s70_s3, %s70_s3 }
  0x30   :  { %p4531_p6 = scmp.ne.s32.totalorder %s70_s3, %s4530_s0  ;;  %p4536_p8 = scmp.lt.s32.totalorder %s4530_s0, %s4530_s0 }
  0x32   :  { %p4537_p9 = por %p4536_p8, %p4535_p7 }
  0x34   :  { %p4538_p10 = pnand %p4537_p9, %p4531_p6 }
  0x36   :  { %4541 = shalt.err (!%p4538_p10)
}
  0x37   :  { %75 = dma.hbm_to_vmem [thread:$0]  %s8153_s4, 8192, %s70_s3, [#allocation9], %s4615_s11, %s4615_s11, %s4616_s12  }
  0x38   :  { %4602 = dma.done.wait [#allocation3], 512  }
  0x39   :  { %4603 = vsyncadd [#allocation3], 4294966784 }
  0x3a   :  { %4604 = dma.done.wait [#allocation6], 8224  }
  0x3b   :  { %4605 = vsyncadd [#allocation6], 4294959072 }
  0x3c   :  { %4606 = dma.done.wait [#allocation9], 16384  }
  0x3d   :  { %4607 = vsyncadd [#allocation9], 4294950912  ;;  %v91_v0 = vld [vmem:[#allocation2] sm:$0xff]  ;;  %v92_v1 = vld [vmem:[#allocation2 + $0x8] sm:$0xff]  ;;  %s4619_s2 = smov [#allocation12]   ;;  %s4620_s25 = smov [#allocation11]  }
  0x3e   :  { %v93_v2 = vld [vmem:[#allocation2 + $0x10] sm:$0xff]  ;;  %v95_v3 = vmul.f32 %v91_v0, %v91_v0  ;;  %v96_v4 = vmul.f32 %v92_v1, %v92_v1  ;;  %v94_v5 = vld [vmem:[#allocation2 + $0x18] sm:$0xff]  ;;  %v160_v13 = vld [vmem:[#allocation7 + $0xe0] sm:$0xff]  ;;  %s4391_s4 = sshll.u32 %s4619_s2, 4  ;;  %s4379_s26 = sshll.u32 %s4620_s25, 4  ;;  %s4392_s4 = int_to_ptr.vmem [resolvable:$true] %s4391_s4  ;;  %s4380_s26 = int_to_ptr.vmem [resolvable:$true] %s4379_s26 }
  0x3f   :  { %v97_v6 = vmul.f32 %v93_v2, %v93_v2  ;;  %v163_v7 = vld [vmem:[#allocation7 + $0xf8] sm:$0xff]  ;;  %v162_v8 = vld [vmem:[#allocation7 + $0xf0] sm:$0xff]  ;;  %v98_v9 = vmul.f32 %v94_v5, %v94_v5  ;;  %v161_v12 = vld [vmem:[#allocation7 + $0xe8] sm:$0xff]  ;;  %v4695_v17 = vand.u32 4294901760, %v160_v13  ;;  %s4542_s27 = scalar_lea.vmem %s4392_s4, 512  ;;  %p4547_p12 = scmp.lt.s32.totalorder %s4392_s4, %s4392_s4 }
  0x40   :  { %v4689_v10 = vand.u32 4294901760, %v163_v7  ;;  %v4691_v11 = vand.u32 4294901760, %v162_v8  ;;  %v159_v14 = vld [vmem:[#allocation7 + $0xd8] sm:$0xff]  ;;  %v99_v15 = vadd.f32 %v96_v4, %v95_v3  ;;  %v4693_v16 = vand.u32 4294901760, %v161_v12  ;;  %v158_v19 = vld [vmem:[#allocation7 + $0xd0] sm:$0xff]  ;;  %v157_v20 = vld [vmem:[#allocation7 + $0xc8] sm:$0xff]  ;;  %p4543_p11 = scmp.ne.s32.totalorder %s4392_s4, %s4542_s27  ;;  %p4548_p13 = scmp.lt.s32.totalorder %s4542_s27, %s4542_s27 }
  0x41   :  { %v4697_v18 = vand.u32 4294901760, %v159_v14  ;;  %v156_v21 = vld [vmem:[#allocation7 + $0xc0] sm:$0xff]  ;;  %v102_v22 = vadd.f32 %v98_v9, %v97_v6  ;;  %v4705_v25 = vand.u32 4294901760, %v158_v19  ;;  %v4712_v27 = vsub.f32 %v160_v13, %v4695_v17  ;;  %v155_v46 = vld [vmem:[#allocation7 + $0xb8] sm:$0xff]  ;;  %v154_v47 = vld [vmem:[#allocation7 + $0xb0] sm:$0xff] }
  0x42   :  { %v4700_v23 = vsub.f32 %v163_v7, %v4689_v10  ;;  %v4703_v24 = vsub.f32 %v162_v8, %v4691_v11  ;;  %197 = vmatprep.subr.mxu0 %v4689_v10  ;;  %100 = vadd.xlane.f32.xlu0 %v99_v15  ;;  %v4709_v26 = vsub.f32 %v161_v12, %v4693_v16  ;;  %v4717_v29 = vand.u32 4294901760, %v157_v20  ;;  %v153_v52 = vld [vmem:[#allocation7 + $0xa8] sm:$0xff]  ;;  %v152_v53 = vld [vmem:[#allocation7 + $0xa0] sm:$0xff]  ;;  %v151_v54 = vld [vmem:[#allocation7 + $0x98] sm:$0xff]  ;;  %p4549_p0 = por %p4548_p13, %p4547_p12 }
  0x43   :  { %v4715_v28 = vsub.f32 %v159_v14, %v4697_v18  ;;  %199 = vmatpush1.msra.mxu0 %v4691_v11  ;;  %v4723_v32 = vsub.f32 %v158_v19, %v4705_v25  ;;  %v4725_v33 = vand.u32 4294901760, %v156_v21  ;;  %v8171_v35 = vand.u32 4294901760, %v4712_v27  ;;  %v150_v59 = vld [vmem:[#allocation7 + $0x90] sm:$0xff]  ;;  %v149_v0 = vld [vmem:[#allocation7 + $0x88] sm:$0xff]  ;;  %v148_v5 = vld [vmem:[#allocation7 + $0x80] sm:$0xff] }
  0x44   :  { %8803 = vst [vmem:[#allocation20_spill] sm:$0xff] %v4700_v23  ;;  %v8175_v30 = vand.u32 4294901760, %v4700_v23  ;;  %v8174_v31 = vand.u32 4294901760, %v4703_v24  ;;  %201 = vmatprep.subr.mxu0 %v4693_v16  ;;  %v8172_v34 = vand.u32 4294901760, %v4709_v26  ;;  %v4732_v37 = vsub.f32 %v157_v20, %v4717_v29  ;;  %p4550_p1 = pnand %p4549_p0, %p4543_p11 }
  0x45   :  { %v8168_v36 = vand.u32 4294901760, %v4715_v28  ;;  %203 = vmatpush1.msra.mxu0 %v4695_v17  ;;  %v8167_v40 = vand.u32 4294901760, %v4723_v32  ;;  %v4743_v41 = vsub.f32 %v156_v21, %v4725_v33  ;;  %v378_v43 = vsub.f32 %v4712_v27, %v8171_v35  ;;  %v139_v35 = vld [vmem:[#allocation7 + $0x38] sm:$0xff] }
  0x46   :  { %v360_v38 = vsub.f32 %v4700_v23, %v8175_v30  ;;  %v366_v39 = vsub.f32 %v4703_v24, %v8174_v31  ;;  %205 = vmatprep.subr.mxu0 %v4697_v18  ;;  %103 = vadd.xlane.f32.xlu0 %v102_v22  ;;  %v372_v42 = vsub.f32 %v4709_v26, %v8172_v34  ;;  %v8166_v45 = vand.u32 4294901760, %v4732_v37  ;;  %v137_v30 = vld [vmem:[#allocation7 + $0x28] sm:$0xff] }
  0x47   :  { %v384_v44 = vsub.f32 %v4715_v28, %v8168_v36  ;;  %207 = vmatpush1.msra.mxu0 %v4705_v25  ;;  %v390_v50 = vsub.f32 %v4723_v32, %v8167_v40  ;;  %v8165_v51 = vand.u32 4294901760, %v4743_v41  ;;  %v379_v56 = vand.u32 4294901760, %v378_v43 }
  0x48   :  { %v361_v48 = vand.u32 4294901760, %v360_v38  ;;  %v367_v49 = vand.u32 4294901760, %v366_v39  ;;  %209 = vmatprep.subr.mxu0 %v4717_v29  ;;  %v373_v55 = vand.u32 4294901760, %v372_v42  ;;  %v396_v58 = vsub.f32 %v4732_v37, %v8166_v45 }
  0x49   :  { %v385_v57 = vand.u32 4294901760, %v384_v44  ;;  %211 = vmatpush1.msra.mxu0 %v4725_v33  ;;  %v391_v60 = vand.u32 4294901760, %v390_v50  ;;  %v402_v61 = vsub.f32 %v4743_v41, %v8165_v51  ;;  %v4769_v62 = vand.u32 4294901760, %v155_v46 }
  0x4a   :  { %362 = vmatprep.subr.mxu1 %v361_v48  ;;  %v4771_v63 = vand.u32 4294901760, %v154_v47  ;;  %v397_v1 = vand.u32 4294901760, %v396_v58  ;;  %v4773_v2 = vand.u32 4294901760, %v153_v52  ;;  %v4775_v3 = vand.u32 4294901760, %v152_v53 }
  0x4b   :  { %368 = vmatpush1.msra.mxu1 %v367_v49  ;;  %v4777_v4 = vand.u32 4294901760, %v151_v54  ;;  %v403_v6 = vand.u32 4294901760, %v402_v61  ;;  %v4780_v7 = vsub.f32 %v155_v46, %v4769_v62  ;;  %v4785_v9 = vand.u32 4294901760, %v150_v59  ;;  %213 = vmatprep.subr.mxu0 %v4769_v62  ;;  %v144_v61 = vld [vmem:[#allocation7 + $0x60] sm:$0xff] }
  0x4c   :  { %374 = vmatprep.subr.mxu1 %v373_v55  ;;  %v4783_v8 = vsub.f32 %v154_v47, %v4771_v63  ;;  %v4789_v12 = vsub.f32 %v153_v52, %v4773_v2  ;;  %v4792_v13 = vsub.f32 %v152_v53, %v4775_v3  ;;  %v4797_v15 = vand.u32 4294901760, %v149_v0  ;;  %215 = vmatpush1.msra.mxu0 %v4771_v63  ;;  %v146_v55 = vld [vmem:[#allocation7 + $0x70] sm:$0xff] }
  0x4d   :  { %380 = vmatpush1.msra.mxu1 %v379_v56  ;;  %v4795_v14 = vsub.f32 %v151_v54, %v4777_v4  ;;  %v8163_v19 = vand.u32 4294901760, %v4780_v7  ;;  %v4803_v21 = vsub.f32 %v150_v59, %v4785_v9  ;;  %v4805_v22 = vand.u32 4294901760, %v148_v5  ;;  %217 = vmatprep.subr.mxu0 %v4773_v2  ;;  %v147_v54 = vld [vmem:[#allocation7 + $0x78] sm:$0xff] }
  0x4e   :  { %386 = vmatprep.subr.mxu1 %v385_v57  ;;  %v8161_v20 = vand.u32 4294901760, %v4783_v8  ;;  %v8160_v38 = vand.u32 4294901760, %v4789_v12  ;;  %v8159_v39 = vand.u32 4294901760, %v4792_v13  ;;  %v4812_v43 = vsub.f32 %v149_v0, %v4797_v15  ;;  %219 = vmatpush1.msra.mxu0 %v4775_v3  ;;  %v143_v0 = vld [vmem:[#allocation7 + $0x58] sm:$0xff] }
  0x4f   :  { %392 = vmatpush1.msra.mxu1 %v391_v60  ;;  %v8157_v42 = vand.u32 4294901760, %v4795_v14  ;;  %v408_v44 = vsub.f32 %v4780_v7, %v8163_v19  ;;  %v8158_v47 = vand.u32 4294901760, %v4803_v21  ;;  %v4823_v48 = vsub.f32 %v148_v5, %v4805_v22  ;;  %221 = vmatprep.subr.mxu0 %v4777_v4  ;;  %v145_v60 = vld [vmem:[#allocation7 + $0x68] sm:$0xff]  ;;  %v140_v19 = vld [vmem:[#allocation7 + $0x40] sm:$0xff] }
  0x50   :  { %398 = vmatprep.subr.mxu1 %v397_v1  ;;  %v414_v46 = vsub.f32 %v4783_v8, %v8161_v20  ;;  %v420_v49 = vsub.f32 %v4789_v12, %v8160_v38  ;;  %v426_v50 = vsub.f32 %v4792_v13, %v8159_v39  ;;  %v8162_v53 = vand.u32 4294901760, %v4812_v43  ;;  %223 = vmatpush1.msra.mxu0 %v4785_v9 }
  0x51   :  { %8804 = vst [vmem:[#allocation21_spill] sm:$0xff] %v4823_v48  ;;  %404 = vmatpush1.msra.mxu1 %v403_v6  ;;  %v432_v52 = vsub.f32 %v4795_v14, %v8157_v42  ;;  %v409_v56 = vand.u32 4294901760, %v408_v44  ;;  %v438_v58 = vsub.f32 %v4803_v21, %v8158_v47  ;;  %v8164_v59 = vand.u32 4294901760, %v4823_v48  ;;  %225 = vmatprep.subr.mxu0 %v4797_v15  ;;  %v142_v44 = vld [vmem:[#allocation7 + $0x50] sm:$0xff] }
  0x52   :  { %v415_v57 = vand.u32 4294901760, %v414_v46  ;;  %v421_v1 = vand.u32 4294901760, %v420_v49  ;;  %v427_v5 = vand.u32 4294901760, %v426_v50  ;;  %v444_v42 = vsub.f32 %v4812_v43, %v8162_v53  ;;  %227 = vmatpush1.msra.mxu0 %v4805_v22  ;;  %v141_v49 = vld [vmem:[#allocation7 + $0x48] sm:$0xff] }
  0x53   :  { %v433_v6 = vand.u32 4294901760, %v432_v52  ;;  %410 = vmatprep.subr.mxu1 %v409_v56  ;;  %v439_v46 = vand.u32 4294901760, %v438_v58  ;;  %v450_v47 = vsub.f32 %v4823_v48, %v8164_v59  ;;  %v4849_v39 = vand.u32 4294901760, %v147_v54 }
  0x54   :  { %v4851_v38 = vand.u32 4294901760, %v146_v55  ;;  %416 = vmatpush1.msra.mxu1 %v415_v57  ;;  %v445_v50 = vand.u32 4294901760, %v444_v42  ;;  %v4853_v52 = vand.u32 4294901760, %v145_v60  ;;  %v4855_v20 = vand.u32 4294901760, %v144_v61 }
  0x55   :  { %v4857_v53 = vand.u32 4294901760, %v143_v0  ;;  %422 = vmatprep.subr.mxu1 %v421_v1  ;;  %v451_v56 = vand.u32 4294901760, %v450_v47  ;;  %v4860_v58 = vsub.f32 %v147_v54, %v4849_v39  ;;  %v4865_v51 = vand.u32 4294901760, %v142_v44  ;;  %229 = vmatprep.subr.mxu0 %v4849_v39 }
  0x56   :  { %v4863_v59 = vsub.f32 %v146_v55, %v4851_v38  ;;  %428 = vmatpush1.msra.mxu1 %v427_v5  ;;  %v4869_v42 = vsub.f32 %v145_v60, %v4853_v52  ;;  %v4872_v57 = vsub.f32 %v144_v61, %v4855_v20  ;;  %v4877_v47 = vand.u32 4294901760, %v141_v49  ;;  %231 = vmatpush1.msra.mxu0 %v4851_v38 }
  0x57   :  { %8805 = vst [vmem:[#allocation22_spill] sm:$0xff] %v4860_v58  ;;  %v4875_v1 = vsub.f32 %v143_v0, %v4857_v53  ;;  %434 = vmatprep.subr.mxu1 %v433_v6  ;;  %v8170_v54 = vand.u32 4294901760, %v4860_v58  ;;  %v4883_v5 = vsub.f32 %v142_v44, %v4865_v51  ;;  %v4885_v60 = vand.u32 4294901760, %v140_v19  ;;  %233 = vmatprep.subr.mxu0 %v4853_v52 }
  0x58   :  { %8806 = vst [vmem:[#allocation23_spill] sm:$0xff] %v4863_v59  ;;  %8807 = vst [vmem:[#allocation24_spill] sm:$0xff] %v4869_v42  ;;  %v8169_v55 = vand.u32 4294901760, %v4863_v59  ;;  %440 = vmatpush1.msra.mxu1 %v439_v46  ;;  %v8173_v61 = vand.u32 4294901760, %v4869_v42  ;;  %v8176_v0 = vand.u32 4294901760, %v4872_v57  ;;  %v4892_v6 = vsub.f32 %v141_v49, %v4877_v47  ;;  %235 = vmatpush1.msra.mxu0 %v4855_v20 }
  0x59   :  { %8808 = vst [vmem:[#allocation25_spill] sm:$0xff] %v4872_v57  ;;  %8809 = vst [vmem:[#allocation26_spill] sm:$0xff] %v4875_v1  ;;  %v8179_v45 = vand.u32 4294901760, %v4875_v1  ;;  %446 = vmatprep.subr.mxu1 %v445_v50  ;;  %v456_v44 = vsub.f32 %v4860_v58, %v8170_v54  ;;  %v8186_v40 = vand.u32 4294901760, %v4883_v5  ;;  %v4903_v36 = vsub.f32 %v140_v19, %v4885_v60  ;;  %v138_v19 = vld [vmem:[#allocation7 + $0x30] sm:$0xff] }
  0x5a   :  { %8810 = vst [vmem:[#allocation27_spill] sm:$0xff] %v4877_v47  ;;  %8811 = vst [vmem:[#allocation28_spill] sm:$0xff] %v4883_v5  ;;  %v462_v46 = vsub.f32 %v4863_v59, %v8169_v55  ;;  %237 = vmatprep.subr.mxu0 %v4857_v53  ;;  %452 = vmatpush1.msra.mxu1 %v451_v56  ;;  %v468_v49 = vsub.f32 %v4869_v42, %v8173_v61  ;;  %v8815_v42 = vand.u32 4294901760, %v4892_v6 }
  0x5b   :  { %8812 = vst [vmem:[#allocation29_spill] sm:$0xff] %v4885_v60  ;;  %8813 = vst [vmem:[#allocation30_spill] sm:$0xff] %v4892_v6  ;;  %v474_v50 = vsub.f32 %v4872_v57, %v8176_v0  ;;  %v480_v55 = vsub.f32 %v4875_v1, %v8179_v45  ;;  %239 = vmatpush1.msra.mxu0 %v4865_v51  ;;  %v457_v34 = vand.u32 4294901760, %v456_v44  ;;  %v8195_v31 = vand.u32 4294901760, %v4903_v36  ;;  %v136_v0 = vld [vmem:[#allocation7 + $0x20] sm:$0xff]  ;;  %v135_v57 = vld [vmem:[#allocation7 + $0x18] sm:$0xff] }
  0x5c   :  { %8814 = vst [vmem:[#allocation31_spill] sm:$0xff] %v4903_v36  ;;  %v463_v56 = vand.u32 4294901760, %v462_v46  ;;  %v486_v61 = vsub.f32 %v4883_v5, %v8186_v40  ;;  %241 = vmatprep.subr.mxu0 %v4877_v47  ;;  %v469_v45 = vand.u32 4294901760, %v468_v49  ;;  %v492_v59 = vsub.f32 %v4892_v6, %v8815_v42  ;;  %v134_v44 = vld [vmem:[#allocation7 + $0x10] sm:$0xff]  ;;  %v133_v49 = vld [vmem:[#allocation7 + $0x8] sm:$0xff]  ;;  %v132_v6 = vld [vmem:[#allocation7] sm:$0xff] }
  0x5d   :  { %v475_v1 = vand.u32 4294901760, %v474_v50  ;;  %v481_v54 = vand.u32 4294901760, %v480_v55  ;;  %243 = vmatpush1.msra.mxu0 %v4885_v60  ;;  %458 = vmatprep.subr.mxu1 %v457_v34  ;;  %v498_v40 = vsub.f32 %v4903_v36, %v8195_v31  ;;  %v4929_v5 = vand.u32 4294901760, %v139_v35 }
  0x5e   :  { %v487_v46 = vand.u32 4294901760, %v486_v61  ;;  %v4931_v58 = vand.u32 4294901760, %v138_v19  ;;  %464 = vmatpush1.msra.mxu1 %v463_v56  ;;  %v493_v55 = vand.u32 4294901760, %v492_v59  ;;  %v4933_v50 = vand.u32 4294901760, %v137_v30 }
  0x5f   :  { %8816 = vst [vmem:[#allocation32_spill] sm:$0xff] %v4929_v5  ;;  %v4935_v48 = vand.u32 4294901760, %v136_v0  ;;  %v4937_v42 = vand.u32 4294901760, %v135_v57  ;;  %470 = vmatprep.subr.mxu1 %v469_v45  ;;  %v499_v34 = vand.u32 4294901760, %v498_v40  ;;  %v4940_v61 = vsub.f32 %v139_v35, %v4929_v5  ;;  %245 = vmatprep.subr.mxu0 %v4929_v5 }
  0x60   :  { %8817 = vst [vmem:[#allocation33_spill] sm:$0xff] %v4931_v58  ;;  %8818 = vst [vmem:[#allocation34_spill] sm:$0xff] %v4933_v50  ;;  %v4943_v31 = vsub.f32 %v138_v19, %v4931_v58  ;;  %v4945_v36 = vand.u32 4294901760, %v134_v44  ;;  %476 = vmatpush1.msra.mxu1 %v475_v1  ;;  %v4949_v59 = vsub.f32 %v137_v30, %v4933_v50  ;;  %v4957_v40 = vand.u32 4294901760, %v133_v49 }
  0x61   :  { %8819 = vst [vmem:[#allocation35_spill] sm:$0xff] %v4935_v48  ;;  %8820 = vst [vmem:[#allocation36_spill] sm:$0xff] %v4937_v42  ;;  %v4952_v56 = vsub.f32 %v136_v0, %v4935_v48  ;;  %v4955_v45 = vsub.f32 %v135_v57, %v4937_v42  ;;  %247 = vmatpush1.msra.mxu0 %v4931_v58  ;;  %482 = vmatprep.subr.mxu1 %v481_v54  ;;  %v8200_v35 = vand.u32 4294901760, %v4940_v61 }
  0x62   :  { %8821 = vst [vmem:[#allocation37_spill] sm:$0xff] %v4940_v61  ;;  %8822 = vst [vmem:[#allocation38_spill] sm:$0xff] %v4943_v31  ;;  %v8203_v19 = vand.u32 4294901760, %v4943_v31  ;;  %v4963_v1 = vsub.f32 %v134_v44, %v4945_v36  ;;  %v4965_v30 = vand.u32 4294901760, %v132_v6  ;;  %249 = vmatprep.subr.mxu0 %v4933_v50  ;;  %488 = vmatpush1.msra.mxu1 %v487_v46  ;;  %v193_v50 = vld [vmem:[#allocation7 + $0x1e8] sm:$0xff] }
  0x63   :  { %8823 = vst [vmem:[#allocation39_spill] sm:$0xff] %v4945_v36  ;;  %8824 = vst [vmem:[#allocation40_spill] sm:$0xff] %v4949_v59  ;;  %v4972_v54 = vsub.f32 %v133_v49, %v4957_v40  ;;  %251 = vmatpush1.msra.mxu0 %v4935_v48  ;;  %494 = vmatprep.subr.mxu1 %v493_v55  ;;  %v504_v44 = vsub.f32 %v4940_v61, %v8200_v35  ;;  %v8832_v49 = vand.u32 4294901760, %v4949_v59 }
  0x64   :  { %8825 = vst [vmem:[#allocation41_spill] sm:$0xff] %v4952_v56  ;;  %8826 = vst [vmem:[#allocation42_spill] sm:$0xff] %v4955_v45  ;;  %v510_v46 = vsub.f32 %v4943_v31, %v8203_v19  ;;  %v4983_v0 = vsub.f32 %v132_v6, %v4965_v30  ;;  %253 = vmatprep.subr.mxu0 %v4937_v42  ;;  %500 = vmatpush1.msra.mxu1 %v499_v34  ;;  %v8833_v5 = vand.u32 4294901760, %v4952_v56  ;;  %v195_v31 = vld [vmem:[#allocation7 + $0x1f8] sm:$0xff]  ;;  %v194_v6 = vld [vmem:[#allocation7 + $0x1f0] sm:$0xff] }
  0x65   :  { %8827 = vst [vmem:[#allocation43_spill] sm:$0xff] %v4957_v40  ;;  %8828 = vst [vmem:[#allocation44_spill] sm:$0xff] %v4963_v1  ;;  %v516_v55 = vsub.f32 %v4949_v59, %v8832_v49  ;;  %v8834_v61 = vand.u32 4294901760, %v4955_v45  ;;  %255 = vmatpush1.msra.mxu0 %v4945_v36  ;;  %v505_v42 = vand.u32 4294901760, %v504_v44  ;;  %v8835_v48 = vand.u32 4294901760, %v4963_v1  ;;  %v190_v44 = vld [vmem:[#allocation7 + $0x1d0] sm:$0xff] }
  0x66   :  { %8829 = vst [vmem:[#allocation45_spill] sm:$0xff] %v4965_v30  ;;  %8830 = vst [vmem:[#allocation46_spill] sm:$0xff] %v4972_v54  ;;  %v522_v35 = vsub.f32 %v4952_v56, %v8833_v5  ;;  %v511_v34 = vand.u32 4294901760, %v510_v46  ;;  %v8230_v59 = vand.u32 4294901760, %v4983_v0  ;;  %v192_v5 = vld [vmem:[#allocation7 + $0x1e0] sm:$0xff]  ;;  %v191_v56 = vld [vmem:[#allocation7 + $0x1d8] sm:$0xff]  ;;  %257 = vmatprep.subr.mxu0 %v4957_v40 }
  0x67   :  { %8831 = vst [vmem:[#allocation47_spill] sm:$0xff] %v4983_v0  ;;  %v528_v19 = vsub.f32 %v4955_v45, %v8834_v61  ;;  %v534_v49 = vsub.f32 %v4963_v1, %v8835_v48  ;;  %v517_v61 = vand.u32 4294901760, %v516_v55  ;;  %v8836_v58 = vand.u32 4294901760, %v4972_v54  ;;  %259 = vmatpush1.msra.mxu0 %v4965_v30  ;;  %506 = vmatprep.subr.mxu1 %v505_v42  ;;  %v189_v55 = vld [vmem:[#allocation7 + $0x1c8] sm:$0xff] }
  0x68   :  { %v523_v45 = vand.u32 4294901760, %v522_v35  ;;  %v546_v48 = vsub.f32 %v4983_v0, %v8230_v59  ;;  %v5009_v1 = vand.u32 4294901760, %v195_v31  ;;  %v5011_v60 = vand.u32 4294901760, %v194_v6  ;;  %512 = vmatpush1.msra.mxu1 %v511_v34 }
  0x69   :  { %v529_v57 = vand.u32 4294901760, %v528_v19  ;;  %v540_v36 = vsub.f32 %v4972_v54, %v8836_v58  ;;  %v535_v46 = vand.u32 4294901760, %v534_v49  ;;  %v5013_v19 = vand.u32 4294901760, %v193_v50  ;;  %v188_v54 = vld [vmem:[#allocation7 + $0x1c0] sm:$0xff]  ;;  %518 = vmatprep.subr.mxu1 %v517_v61 }
  0x6a   :  { %8837 = vst [vmem:[#allocation48_spill] sm:$0xff] %v5009_v1  ;;  %8838 = vst [vmem:[#allocation49_spill] sm:$0xff] %v5011_v60  ;;  %v5015_v40 = vand.u32 4294901760, %v192_v5  ;;  %v5017_v58 = vand.u32 4294901760, %v191_v56  ;;  %v547_v42 = vand.u32 4294901760, %v546_v48  ;;  %v5020_v49 = vsub.f32 %v195_v31, %v5009_v1  ;;  %261 = vmatprep.subr.mxu0 %v5009_v1  ;;  %524 = vmatpush1.msra.mxu1 %v523_v45 }
  0x6b   :  { %v541_v35 = vand.u32 4294901760, %v540_v36  ;;  %8839 = vst [vmem:[#allocation50_spill] sm:$0xff] %v5013_v19  ;;  %v5023_v59 = vsub.f32 %v194_v6, %v5011_v60  ;;  %v5025_v0 = vand.u32 4294901760, %v190_v44  ;;  %v5029_v36 = vsub.f32 %v193_v50, %v5013_v19  ;;  %263 = vmatpush2.msra.mxu0 %v5011_v60  ;;  %530 = vmatprep.subr.mxu1 %v529_v57  ;;  %v181_v60 = vld [vmem:[#allocation7 + $0x188] sm:$0xff] }
  0x6c   :  { %8840 = vst [vmem:[#allocation51_spill] sm:$0xff] %v5015_v40  ;;  %8841 = vst [vmem:[#allocation52_spill] sm:$0xff] %v5017_v58  ;;  %v5032_v34 = vsub.f32 %v192_v5, %v5015_v40  ;;  %v5035_v61 = vsub.f32 %v191_v56, %v5017_v58  ;;  %v5037_v48 = vand.u32 4294901760, %v189_v55  ;;  %v8235_v31 = vand.u32 4294901760, %v5020_v49  ;;  %265 = vmatprep.subr.mxu0 %v5013_v19  ;;  %v185_v19 = vld [vmem:[#allocation7 + $0x1a8] sm:$0xff] }
  0x6d   :  { %8842 = vst [vmem:[#allocation53_spill] sm:$0xff] %v5020_v49  ;;  %8843 = vst [vmem:[#allocation54_spill] sm:$0xff] %v5023_v59  ;;  %v8238_v6 = vand.u32 4294901760, %v5023_v59  ;;  %v5043_v45 = vsub.f32 %v190_v44, %v5025_v0  ;;  %v5045_v50 = vand.u32 4294901760, %v188_v54  ;;  %536 = vmatpush1.msra.mxu1 %v535_v46  ;;  %267 = vmatpush2.msra.mxu0 %v5015_v40  ;;  %v186_v40 = vld [vmem:[#allocation7 + $0x1b0] sm:$0xff] }
  0x6e   :  { %8844 = vst [vmem:[#allocation55_spill] sm:$0xff] %v5025_v0  ;;  %8845 = vst [vmem:[#allocation56_spill] sm:$0xff] %v5029_v36  ;;  %v5052_v57 = vsub.f32 %v189_v55, %v5037_v48  ;;  %542 = vmatprep.subr.mxu1 %v541_v35  ;;  %v552_v44 = vsub.f32 %v5020_v49, %v8235_v31  ;;  %269 = vmatprep.subr.mxu0 %v5017_v58  ;;  %v8853_v55 = vand.u32 4294901760, %v5029_v36 }
  0x6f   :  { %8846 = vst [vmem:[#allocation57_spill] sm:$0xff] %v5032_v34  ;;  %8847 = vst [vmem:[#allocation58_spill] sm:$0xff] %v5035_v61  ;;  %v558_v46 = vsub.f32 %v5023_v59, %v8238_v6  ;;  %v5063_v5 = vsub.f32 %v188_v54, %v5045_v50  ;;  %548 = vmatpush1.msra.mxu1 %v547_v42  ;;  %v8854_v1 = vand.u32 4294901760, %v5032_v34  ;;  %v8855_v49 = vand.u32 4294901760, %v5035_v61 }
  0x70   :  { %8848 = vst [vmem:[#allocation59_spill] sm:$0xff] %v5037_v48  ;;  %8849 = vst [vmem:[#allocation60_spill] sm:$0xff] %v5043_v45  ;;  %v564_v35 = vsub.f32 %v5029_v36, %v8853_v55  ;;  %v8261_v56 = vand.u32 4294901760, %v5052_v57  ;;  %271 = vmatpush2.msra.mxu0 %v5025_v0  ;;  %v553_v54 = vand.u32 4294901760, %v552_v44  ;;  %v8856_v42 = vand.u32 4294901760, %v5043_v45  ;;  %v187_v36 = vld [vmem:[#allocation7 + $0x1b8] sm:$0xff] }
  0x71   :  { %8850 = vst [vmem:[#allocation61_spill] sm:$0xff] %v5045_v50  ;;  %8851 = vst [vmem:[#allocation62_spill] sm:$0xff] %v5052_v57  ;;  %v570_v31 = vsub.f32 %v5032_v34, %v8854_v1  ;;  %v576_v6 = vsub.f32 %v5035_v61, %v8855_v49  ;;  %v559_v59 = vand.u32 4294901760, %v558_v46  ;;  %v8268_v55 = vand.u32 4294901760, %v5063_v5  ;;  %273 = vmatprep.subr.mxu0 %v5037_v48  ;;  %v184_v61 = vld [vmem:[#allocation7 + $0x1a0] sm:$0xff]  ;;  %v183_v44 = vld [vmem:[#allocation7 + $0x198] sm:$0xff] }
  0x72   :  { %8852 = vst [vmem:[#allocation63_spill] sm:$0xff] %v5063_v5  ;;  %v582_v58 = vsub.f32 %v5043_v45, %v8856_v42  ;;  %v565_v1 = vand.u32 4294901760, %v564_v35  ;;  %v588_v49 = vsub.f32 %v5052_v57, %v8261_v56  ;;  %v182_v46 = vld [vmem:[#allocation7 + $0x190] sm:$0xff]  ;;  %275 = vmatpush2.msra.mxu0 %v5045_v50  ;;  %554 = vmatprep.subr.mxu1 %v553_v54  ;;  %v5091_v48 = vand.u32 4294901760, %v186_v40  ;;  %v180_v57 = vld [vmem:[#allocation7 + $0x180] sm:$0xff] }
  0x73   :  { %v571_v34 = vand.u32 4294901760, %v570_v31  ;;  %v577_v42 = vand.u32 4294901760, %v576_v6  ;;  %v594_v0 = vsub.f32 %v5063_v5, %v8268_v55  ;;  %560 = vmatpush2.msra.mxu1 %v559_v59  ;;  %v5089_v31 = vand.u32 4294901760, %v187_v36 }
  0x74   :  { %v583_v45 = vand.u32 4294901760, %v582_v58  ;;  %v589_v35 = vand.u32 4294901760, %v588_v49  ;;  %8858 = vst [vmem:[#allocation65_spill] sm:$0xff] %v5091_v48  ;;  %v5093_v56 = vand.u32 4294901760, %v185_v19  ;;  %566 = vmatprep.subr.mxu1 %v565_v1  ;;  %v5095_v50 = vand.u32 4294901760, %v184_v61 }
  0x75   :  { %8857 = vst [vmem:[#allocation64_spill] sm:$0xff] %v5089_v31  ;;  %v595_v30 = vand.u32 4294901760, %v594_v0  ;;  %v5097_v6 = vand.u32 4294901760, %v183_v44  ;;  %v5099_v58 = vand.u32 4294901760, %v182_v46  ;;  %572 = vmatpush2.msra.mxu1 %v571_v34  ;;  %v5102_v54 = vsub.f32 %v187_v36, %v5089_v31  ;;  %277 = vmatprep.subr.mxu0 %v5089_v31 }
  0x76   :  { %8859 = vst [vmem:[#allocation66_spill] sm:$0xff] %v5093_v56  ;;  %8860 = vst [vmem:[#allocation67_spill] sm:$0xff] %v5095_v50  ;;  %v5105_v59 = vsub.f32 %v186_v40, %v5091_v48  ;;  %v5108_v49 = vsub.f32 %v185_v19, %v5093_v56  ;;  %v5110_v55 = vand.u32 4294901760, %v181_v60  ;;  %578 = vmatprep.subr.mxu1 %v577_v42  ;;  %v5122_v34 = vand.u32 4294901760, %v180_v57 }
  0x77   :  { %8861 = vst [vmem:[#allocation68_spill] sm:$0xff] %v5097_v6  ;;  %8862 = vst [vmem:[#allocation69_spill] sm:$0xff] %v5099_v58  ;;  %v5114_v0 = vsub.f32 %v184_v61, %v5095_v50  ;;  %v5117_v1 = vsub.f32 %v183_v44, %v5097_v6  ;;  %v5120_v36 = vsub.f32 %v182_v46, %v5099_v58  ;;  %279 = vmatpush2.msra.mxu0 %v5091_v48  ;;  %v176_v48 = vld [vmem:[#allocation7 + $0x160] sm:$0xff] }
  0x78   :  { %8863 = vst [vmem:[#allocation70_spill] sm:$0xff] %v5102_v54  ;;  %8864 = vst [vmem:[#allocation71_spill] sm:$0xff] %v5105_v59  ;;  %584 = vmatpush2.msra.mxu1 %v583_v45  ;;  %v8271_v40 = vand.u32 4294901760, %v5102_v54  ;;  %v8274_v19 = vand.u32 4294901760, %v5105_v59  ;;  %v8279_v42 = vand.u32 4294901760, %v5108_v49  ;;  %v5129_v61 = vsub.f32 %v181_v60, %v5110_v55  ;;  %281 = vmatprep.subr.mxu0 %v5093_v56 }
  0x79   :  { %8865 = vst [vmem:[#allocation72_spill] sm:$0xff] %v5108_v49  ;;  %8866 = vst [vmem:[#allocation73_spill] sm:$0xff] %v5110_v55  ;;  %590 = vmatprep.subr.mxu1 %v589_v35  ;;  %v8286_v44 = vand.u32 4294901760, %v5114_v0  ;;  %v5136_v45 = vsub.f32 %v180_v57, %v5122_v34  ;;  %283 = vmatpush2.msra.mxu0 %v5095_v50  ;;  %v8873_v57 = vand.u32 4294901760, %v5117_v1  ;;  %v179_v50 = vld [vmem:[#allocation7 + $0x178] sm:$0xff] }
  0x7a   :  { %8867 = vst [vmem:[#allocation74_spill] sm:$0xff] %v5114_v0  ;;  %8868 = vst [vmem:[#allocation75_spill] sm:$0xff] %v5117_v1  ;;  %596 = vmatpush2.msra.mxu1 %v595_v30  ;;  %v600_v60 = vsub.f32 %v5102_v54, %v8271_v40  ;;  %v606_v35 = vsub.f32 %v5105_v59, %v8274_v19  ;;  %v612_v46 = vsub.f32 %v5108_v49, %v8279_v42  ;;  %v178_v42 = vld [vmem:[#allocation7 + $0x170] sm:$0xff]  ;;  %v177_v49 = vld [vmem:[#allocation7 + $0x168] sm:$0xff] }
  0x7b   :  { %8869 = vst [vmem:[#allocation76_spill] sm:$0xff] %v5120_v36  ;;  %8870 = vst [vmem:[#allocation77_spill] sm:$0xff] %v5122_v34  ;;  %285 = vmatprep.subr.mxu0 %v5097_v6  ;;  %v618_v30 = vsub.f32 %v5114_v0, %v8286_v44  ;;  %v624_v40 = vsub.f32 %v5117_v1, %v8873_v57  ;;  %v8874_v54 = vand.u32 4294901760, %v5120_v36  ;;  %v8875_v44 = vand.u32 4294901760, %v5129_v61  ;;  %v175_v57 = vld [vmem:[#allocation7 + $0x158] sm:$0xff]  ;;  %v174_v1 = vld [vmem:[#allocation7 + $0x150] sm:$0xff] }
  0x7c   :  { %8871 = vst [vmem:[#allocation78_spill] sm:$0xff] %v5129_v61  ;;  %8872 = vst [vmem:[#allocation79_spill] sm:$0xff] %v5136_v45  ;;  %287 = vmatpush2.msra.mxu0 %v5099_v58  ;;  %v601_v5 = vand.u32 4294901760, %v600_v60  ;;  %v607_v6 = vand.u32 4294901760, %v606_v35  ;;  %v613_v56 = vand.u32 4294901760, %v612_v46  ;;  %v8876_v31 = vand.u32 4294901760, %v5136_v45 }
  0x7d   :  { %v630_v19 = vsub.f32 %v5120_v36, %v8874_v54  ;;  %v636_v0 = vsub.f32 %v5129_v61, %v8875_v44  ;;  %289 = vmatprep.subr.mxu0 %v5110_v55  ;;  %v619_v54 = vand.u32 4294901760, %v618_v30  ;;  %v625_v36 = vand.u32 4294901760, %v624_v40  ;;  %v173_v58 = vld [vmem:[#allocation7 + $0x148] sm:$0xff]  ;;  %v172_v61 = vld [vmem:[#allocation7 + $0x140] sm:$0xff] }
  0x7e   :  { %v642_v47 = vsub.f32 %v5136_v45, %v8876_v31  ;;  %291 = vmatpush2.msra.mxu0 %v5122_v34  ;;  %602 = vmatprep.subr.mxu1 %v601_v5  ;;  %v5169_v60 = vand.u32 4294901760, %v179_v50  ;;  %v5171_v44 = vand.u32 4294901760, %v178_v42  ;;  %v5173_v35 = vand.u32 4294901760, %v177_v49 }
  0x7f   :  { %v631_v59 = vand.u32 4294901760, %v630_v19  ;;  %v637_v46 = vand.u32 4294901760, %v636_v0  ;;  %608 = vmatpush2.msra.mxu1 %v607_v6  ;;  %v5175_v40 = vand.u32 4294901760, %v176_v48  ;;  %v5177_v19 = vand.u32 4294901760, %v175_v57 }
  0x80   :  { %8877 = vst [vmem:[#allocation80_spill] sm:$0xff] %v5169_v60  ;;  %8878 = vst [vmem:[#allocation81_spill] sm:$0xff] %v5171_v44  ;;  %v643_v30 = vand.u32 4294901760, %v642_v47  ;;  %v5179_v55 = vand.u32 4294901760, %v174_v1  ;;  %614 = vmatprep.subr.mxu1 %v613_v56  ;;  %v5182_v31 = vsub.f32 %v179_v50, %v5169_v60  ;;  %v5185_v5 = vsub.f32 %v178_v42, %v5171_v44 }
  0x81   :  { %8879 = vst [vmem:[#allocation82_spill] sm:$0xff] %v5173_v35  ;;  %8880 = vst [vmem:[#allocation83_spill] sm:$0xff] %v5175_v40  ;;  %v5188_v0 = vsub.f32 %v177_v49, %v5173_v35  ;;  %v5190_v45 = vand.u32 4294901760, %v173_v58  ;;  %293 = vmatprep.subr.mxu0 %v5169_v60  ;;  %620 = vmatpush2.msra.mxu1 %v619_v54  ;;  %v5194_v47 = vsub.f32 %v176_v48, %v5175_v40  ;;  %v169_v60 = vld [vmem:[#allocation7 + $0x128] sm:$0xff] }
  0x82   :  { %8881 = vst [vmem:[#allocation84_spill] sm:$0xff] %v5177_v19  ;;  %8882 = vst [vmem:[#allocation85_spill] sm:$0xff] %v5179_v55  ;;  %v5197_v6 = vsub.f32 %v175_v57, %v5177_v19  ;;  %v5200_v50 = vsub.f32 %v174_v1, %v5179_v55  ;;  %v5202_v56 = vand.u32 4294901760, %v172_v61  ;;  %295 = vmatpush2.msra.mxu0 %v5171_v44  ;;  %626 = vmatprep.subr.mxu1 %v625_v36 }
  0x83   :  { %8883 = vst [vmem:[#allocation86_spill] sm:$0xff] %v5182_v31  ;;  %8884 = vst [vmem:[#allocation87_spill] sm:$0xff] %v5185_v5  ;;  %v8309_v49 = vand.u32 4294901760, %v5182_v31  ;;  %v8312_v42 = vand.u32 4294901760, %v5185_v5  ;;  %v8315_v54 = vand.u32 4294901760, %v5188_v0  ;;  %v5209_v48 = vsub.f32 %v173_v58, %v5190_v45  ;;  %297 = vmatprep.subr.mxu0 %v5173_v35  ;;  %632 = vmatpush2.msra.mxu1 %v631_v59  ;;  %v168_v35 = vld [vmem:[#allocation7 + $0x120] sm:$0xff] }
  0x84   :  { %8885 = vst [vmem:[#allocation88_spill] sm:$0xff] %v5188_v0  ;;  %8886 = vst [vmem:[#allocation89_spill] sm:$0xff] %v5190_v45  ;;  %v8322_v1 = vand.u32 4294901760, %v5194_v47  ;;  %v5216_v36 = vsub.f32 %v172_v61, %v5202_v56  ;;  %299 = vmatpush2.msra.mxu0 %v5175_v40  ;;  %638 = vmatprep.subr.mxu1 %v637_v46  ;;  %v8893_v46 = vand.u32 4294901760, %v5197_v6 }
  0x85   :  { %8887 = vst [vmem:[#allocation90_spill] sm:$0xff] %v5194_v47  ;;  %8888 = vst [vmem:[#allocation91_spill] sm:$0xff] %v5197_v6  ;;  %v648_v58 = vsub.f32 %v5182_v31, %v8309_v49  ;;  %v654_v59 = vsub.f32 %v5185_v5, %v8312_v42  ;;  %v660_v57 = vsub.f32 %v5188_v0, %v8315_v54  ;;  %301 = vmatprep.subr.mxu0 %v5177_v19  ;;  %v171_v54 = vld [vmem:[#allocation7 + $0x138] sm:$0xff]  ;;  %v170_v0 = vld [vmem:[#allocation7 + $0x130] sm:$0xff] }
  0x86   :  { %8889 = vst [vmem:[#allocation92_spill] sm:$0xff] %v5200_v50  ;;  %8890 = vst [vmem:[#allocation93_spill] sm:$0xff] %v5202_v56  ;;  %644 = vmatpush2.msra.mxu1 %v643_v30  ;;  %v666_v61 = vsub.f32 %v5194_v47, %v8322_v1  ;;  %v672_v49 = vsub.f32 %v5197_v6, %v8893_v46  ;;  %v8894_v31 = vand.u32 4294901760, %v5200_v50  ;;  %303 = vmatpush2.msra.mxu0 %v5179_v55  ;;  %v167_v46 = vld [vmem:[#allocation7 + $0x118] sm:$0xff]  ;;  %v166_v6 = vld [vmem:[#allocation7 + $0x110] sm:$0xff] }
  0x87   :  { %8891 = vst [vmem:[#allocation94_spill] sm:$0xff] %v5209_v48  ;;  %8892 = vst [vmem:[#allocation95_spill] sm:$0xff] %v5216_v36  ;;  %v649_v30 = vand.u32 4294901760, %v648_v58  ;;  %v655_v19 = vand.u32 4294901760, %v654_v59  ;;  %v661_v40 = vand.u32 4294901760, %v660_v57  ;;  %v8895_v1 = vand.u32 4294901760, %v5209_v48  ;;  %305 = vmatprep.subr.mxu0 %v5190_v45 }
  0x88   :  { %v678_v42 = vsub.f32 %v5200_v50, %v8894_v31  ;;  %v667_v31 = vand.u32 4294901760, %v666_v61  ;;  %v673_v50 = vand.u32 4294901760, %v672_v49  ;;  %v8896_v44 = vand.u32 4294901760, %v5216_v36  ;;  %v165_v55 = vld [vmem:[#allocation7 + $0x108] sm:$0xff]  ;;  %307 = vmatpush2.msra.mxu0 %v5202_v56 }
  0x89   :  { %v684_v47 = vsub.f32 %v5209_v48, %v8895_v1  ;;  %650 = vmatprep.subr.mxu1 %v649_v30  ;;  %v5249_v58 = vand.u32 4294901760, %v171_v54  ;;  %v5251_v1 = vand.u32 4294901760, %v170_v0  ;;  %v5253_v59 = vand.u32 4294901760, %v169_v60  ;;  %v164_v48 = vld [vmem:[#allocation7 + $0x100] sm:$0xff] }
  0x8a   :  { %v679_v5 = vand.u32 4294901760, %v678_v42  ;;  %v690_v34 = vsub.f32 %v5216_v36, %v8896_v44  ;;  %656 = vmatpush2.msra.mxu1 %v655_v19  ;;  %v5255_v49 = vand.u32 4294901760, %v168_v35  ;;  %v5257_v42 = vand.u32 4294901760, %v167_v46 }
  0x8b   :  { %v685_v57 = vand.u32 4294901760, %v684_v47  ;;  %8897 = vst [vmem:[#allocation96_spill] sm:$0xff] %v5249_v58  ;;  %8898 = vst [vmem:[#allocation97_spill] sm:$0xff] %v5251_v1  ;;  %v5259_v45 = vand.u32 4294901760, %v166_v6  ;;  %662 = vmatprep.subr.mxu1 %v661_v40  ;;  %v5262_v44 = vsub.f32 %v171_v54, %v5249_v58  ;;  %v5265_v47 = vsub.f32 %v170_v0, %v5251_v1 }
  0x8c   :  { %8899 = vst [vmem:[#allocation98_spill] sm:$0xff] %v5253_v59  ;;  %v691_v61 = vand.u32 4294901760, %v690_v34  ;;  %8900 = vst [vmem:[#allocation99_spill] sm:$0xff] %v5257_v42  ;;  %v5268_v30 = vsub.f32 %v169_v60, %v5253_v59  ;;  %v5270_v36 = vand.u32 4294901760, %v165_v55  ;;  %309 = vmatprep.subr.mxu0 %v5249_v58  ;;  %668 = vmatpush2.msra.mxu1 %v667_v31  ;;  %v5282_v54 = vand.u32 4294901760, %v164_v48 }
  0x8d   :  { %8901 = vst [vmem:[#allocation100_spill] sm:$0xff] %v5259_v45  ;;  %8902 = vst [vmem:[#allocation101_spill] sm:$0xff] %v5262_v44  ;;  %v5274_v34 = vsub.f32 %v168_v35, %v5255_v49  ;;  %v5277_v19 = vsub.f32 %v167_v46, %v5257_v42  ;;  %v5280_v40 = vsub.f32 %v166_v6, %v5259_v45  ;;  %311 = vmatpush2.msra.mxu0 %v5251_v1 }
  0x8e   :  { %8903 = vst [vmem:[#allocation102_spill] sm:$0xff] %v5265_v47  ;;  %8904 = vst [vmem:[#allocation103_spill] sm:$0xff] %v5268_v30  ;;  %674 = vmatprep.subr.mxu1 %v673_v50  ;;  %v8345_v60 = vand.u32 4294901760, %v5262_v44  ;;  %v8348_v0 = vand.u32 4294901760, %v5265_v47  ;;  %v8351_v31 = vand.u32 4294901760, %v5268_v30  ;;  %v5289_v35 = vsub.f32 %v165_v55, %v5270_v36  ;;  %313 = vmatprep.subr.mxu0 %v5253_v59 }
  0x8f   :  { %8905 = vst [vmem:[#allocation104_spill] sm:$0xff] %v5277_v19  ;;  %8906 = vst [vmem:[#allocation105_spill] sm:$0xff] %v5280_v40  ;;  %680 = vmatpush2.msra.mxu1 %v679_v5  ;;  %v8356_v6 = vand.u32 4294901760, %v5274_v34  ;;  %v5296_v50 = vsub.f32 %v164_v48, %v5282_v54  ;;  %315 = vmatpush2.msra.mxu0 %v5255_v49 }
  0x90   :  { %8907 = vst [vmem:[#allocation106_spill] sm:$0xff] %v5282_v54  ;;  %8908 = vst [vmem:[#allocation107_spill] sm:$0xff] %v5289_v35  ;;  %686 = vmatprep.subr.mxu1 %v685_v57  ;;  %v696_v55 = vsub.f32 %v5262_v44, %v8345_v60  ;;  %v702_v5 = vsub.f32 %v5265_v47, %v8348_v0  ;;  %v708_v46 = vsub.f32 %v5268_v30, %v8351_v31 }
  0x91   :  { %8909 = vst [vmem:[#allocation108_spill] sm:$0xff] %v5296_v50  ;;  %317 = vmatprep.subr.mxu0 %v5257_v42  ;;  %692 = vmatpush2.msra.mxu1 %v691_v61  ;;  %v714_v48 = vsub.f32 %v5274_v34, %v8356_v6  ;;  %v8910_v57 = vand.u32 4294901760, %v5277_v19  ;;  %v8911_v44 = vand.u32 4294901760, %v5280_v40  ;;  %v8357_v47 = vand.u32 4294901760, %v5296_v50 }
  0x92   :  { %319 = vmatpush2.msra.mxu0 %v5259_v45  ;;  %v697_v31 = vand.u32 4294901760, %v696_v55  ;;  %v703_v58 = vand.u32 4294901760, %v702_v5  ;;  %v709_v30 = vand.u32 4294901760, %v708_v46  ;;  %v8912_v61 = vand.u32 4294901760, %v5289_v35 }
  0x93   :  { %v720_v60 = vsub.f32 %v5277_v19, %v8910_v57  ;;  %v726_v0 = vsub.f32 %v5280_v40, %v8911_v44  ;;  %321 = vmatprep.subr.mxu0 %v5270_v36  ;;  %v715_v6 = vand.u32 4294901760, %v714_v48  ;;  %v738_v57 = vsub.f32 %v5296_v50, %v8357_v47 }
  0x94   :  { %v732_v42 = vsub.f32 %v5289_v35, %v8912_v61  ;;  %323 = vmatpush2.msra.mxu0 %v5282_v54  ;;  %698 = vmatprep.subr.mxu1 %v697_v31  ;;  %v118_v31 = vlaneseq }
  0x95   :  { %v721_v44 = vand.u32 4294901760, %v720_v60  ;;  %760 = vmatprep.subr.mxu0 %v4700_v23  ;;  %704 = vmatpush2.msra.mxu1 %v703_v58  ;;  %v727_v55 = vand.u32 4294901760, %v726_v0  ;;  %v739_v5 = vand.u32 4294901760, %v738_v57  ;;  %v108_v0 = vld [vmem:[#allocation5] sm:$0x3] }
  0x96   :  { %710 = vmatprep.subr.mxu1 %v709_v30  ;;  %v733_v46 = vand.u32 4294901760, %v732_v42  ;;  %v119_v58 = vshrl.u32 %v118_v31, 7 }
  0x97   :  { %716 = vmatpush2.msra.mxu1 %v715_v6 }
  0x98   :  { %722 = vmatprep.subr.mxu1 %v721_v44  ;;  %v120_v30 = vsub.s32 0, %v119_v58  ;;  %v124_v42 = vsub.s32 1, %v119_v58 }
  0x99   :  { %728 = vmatpush2.msra.mxu1 %v727_v55  ;;  %v4438_v55 = vld [vmem:[#allocation2] sm:$0xff] }
  0x9a   :  { %734 = vmatprep.subr.mxu1 %v733_v46  ;;  %v121_v6 = vrot.slane %v108_v0, %v120_v30  ;;  %v125_v57 = vrot.slane %v108_v0, %v124_v42 }
  0x9b   :  { %740 = vmatpush2.msra.mxu1 %v739_v5  ;;  %v4439_v5 = vld [vmem:[#allocation2 + $0x8] sm:$0xff] }
  0x9c   :  { %972 = vmatprep.subr.mxu1 %v4689_v10 }
  0xcb   :  { %v101_v48 = vpop.xlane.xlu0 %100 }
  0xcc   :  { %v106_v61 = vmul.f32 0.00390625, %v101_v48 }
  0xce   :  { %v109_v47 = vadd.f32 1e-06, %v106_v61 }
  0xcf   :  { %v104_v50 = vpop.xlane.xlu0 %103 }
  0xd0   :  { %4434 = vrsqrt.f32 %v109_v47  ;;  %v107_v60 = vmul.f32 0.00390625, %v104_v50  ;;  %v4440_v50 = vld [vmem:[#allocation2 + $0x10] sm:$0xff] }
  0xd2   :  { %v110_v23 = vadd.f32 1e-06, %v107_v60 }
  0xd4   :  { %4436 = vrsqrt.f32 %v110_v23  ;;  %v4441_v23 = vld [vmem:[#allocation2 + $0x18] sm:$0xff] }
  0xdd   :  { %v4435_v44 = vpop.eup %4434 }
  0xde   :  { %v113_v46 = vmul.f32 %v4438_v55, %v4435_v44  ;;  %v114_v35 = vmul.f32 %v4439_v5, %v4435_v44 }
  0xe0   :  { %v128_v40 = vmul.f32 %v121_v6, %v113_v46  ;;  %v129_v48 = vmul.f32 %v125_v57, %v114_v35 }
  0xe1   :  { %v4437_v61 = vpop.eup %4436 }
  0xe2   :  { %v5331_v19 = vand.u32 4294901760, %v129_v48  ;;  %v5333_v47 = vand.u32 4294901760, %v128_v40  ;;  %v115_v31 = vmul.f32 %v4440_v50, %v4437_v61  ;;  %v116_v60 = vmul.f32 %v4441_v23, %v4437_v61 }
  0xe4   :  { %8913 = vst [vmem:[#allocation109_spill] sm:$0xff] %v5331_v19  ;;  %8914 = vst [vmem:[#allocation110_spill] sm:$0xff] %v5333_v47  ;;  %v5336_v58 = vsub.f32 %v129_v48, %v5331_v19  ;;  %v130_v30 = vmul.f32 %v121_v6, %v115_v31  ;;  %v131_v42 = vmul.f32 %v125_v57, %v116_v60  ;;  %742 = vmatprep.mubr.f32.mxu1 %v5331_v19 }
  0xe5   :  { %v5340_v0 = vsub.f32 %v128_v40, %v5333_v47  ;;  %744 = vmatmul.mubr.f32.vlgmr.msra.gmra.mxu1 %v5333_v47  ;;  %v8941_v47 = vld [vmem:[#allocation36_spill] sm:$0xff] }
  0xe6   :  { %8915 = vst [vmem:[#allocation111_spill] sm:$0xff] %v5336_v58  ;;  %v5343_v35 = vand.u32 4294901760, %v131_v42  ;;  %v5345_v44 = vand.u32 4294901760, %v130_v30  ;;  %974 = vmatpush1.msra.mxu1 %v4691_v11  ;;  %v5349_v55 = vand.u32 4294901760, %v5336_v58 }
  0xe7   :  { %8916 = vst [vmem:[#allocation112_spill] sm:$0xff] %v5340_v0  ;;  %v5352_v46 = vand.u32 4294901760, %v5340_v0  ;;  %976 = vmatprep.subr.mxu1 %v4693_v16 }
  0xe8   :  { %8917 = vst [vmem:[#allocation113_spill] sm:$0xff] %v5343_v35  ;;  %8918 = vst [vmem:[#allocation114_spill] sm:$0xff] %v5345_v44  ;;  %978 = vmatpush1.msra.mxu1 %v4695_v17  ;;  %750 = vmatprep.mubr.f32.mxu1 %v5343_v35  ;;  %v327_v40 = vsub.f32 %v5336_v58, %v5349_v55  ;;  %v5362_v57 = vsub.f32 %v131_v42, %v5343_v35  ;;  %v8940_v35 = vld [vmem:[#allocation26_spill] sm:$0xff] }
  0xe9   :  { %8919 = vst [vmem:[#allocation115_spill] sm:$0xff] %v5349_v55  ;;  %8920 = vst [vmem:[#allocation116_spill] sm:$0xff] %v5352_v46  ;;  %v333_v6 = vsub.f32 %v5340_v0, %v5352_v46  ;;  %980 = vmatprep.subr.mxu1 %v4697_v18  ;;  %752 = vmatmul.mubr.f32.gmra.mxu1 %v5345_v44  ;;  %v5367_v5 = vsub.f32 %v130_v30, %v5345_v44  ;;  %v8939_v44 = vld [vmem:[#allocation35_spill] sm:$0xff] }
  0xea   :  { %8921 = vst [vmem:[#allocation117_spill] sm:$0xff] %v5362_v57  ;;  %982 = vmatpush1.msra.mxu1 %v4705_v25  ;;  %1102 = vmatprep.mubr.f32.mxu1 %v5349_v55  ;;  %v5371_v48 = vand.u32 4294901760, %v327_v40  ;;  %v5376_v50 = vand.u32 4294901760, %v5362_v57  ;;  %v8929_v40 = vld [vmem:[#allocation27_spill] sm:$0xff]  ;;  %v8937_v55 = vld [vmem:[#allocation34_spill] sm:$0xff] }
  0xeb   :  { %8922 = vst [vmem:[#allocation118_spill] sm:$0xff] %v5367_v5  ;;  %v5373_v61 = vand.u32 4294901760, %v333_v6  ;;  %984 = vmatprep.subr.mxu1 %v4717_v29  ;;  %v5380_v31 = vand.u32 4294901760, %v5367_v5  ;;  %v8930_v6 = vld [vmem:[#allocation21_spill] sm:$0xff] }
  0xec   :  { %8923 = vst [vmem:[#allocation119_spill] sm:$0xff] %v5371_v48  ;;  %8925 = vst [vmem:[#allocation121_spill] sm:$0xff] %v5376_v50  ;;  %986 = vmatpush1.msra.mxu1 %v4725_v33  ;;  %329 = vmatprep.mubr.f32.mxu0 %v5371_v48  ;;  %v343_v23 = vsub.f32 %v5362_v57, %v5376_v50  ;;  %v8938_v48 = vld [vmem:[#allocation25_spill] sm:$0xff] }
  0xed   :  { %8924 = vst [vmem:[#allocation120_spill] sm:$0xff] %v5373_v61  ;;  %8926 = vst [vmem:[#allocation122_spill] sm:$0xff] %v5380_v31  ;;  %988 = vmatprep.subr.mxu1 %v4769_v62  ;;  %335 = vmatmul.mubr.f32.vlgmr.msra.gmra.mxu0 %v5373_v61  ;;  %v349_v60 = vsub.f32 %v5367_v5, %v5380_v31  ;;  %v8936_v61 = vld [vmem:[#allocation24_spill] sm:$0xff] }
  0xee   :  { %763 = vmatpush1.msra.mxu0 %v4703_v24  ;;  %990 = vmatpush1.msra.mxu1 %v4771_v63  ;;  %v5392_v30 = vand.u32 4294901760, %v343_v23  ;;  %v8931_v23 = vld [vmem:[#allocation29_spill] sm:$0xff] }
  0xef   :  { %766 = vmatprep.subr.mxu0 %v4709_v26  ;;  %992 = vmatprep.subr.mxu1 %v4773_v2  ;;  %v5396_v42 = vand.u32 4294901760, %v349_v60  ;;  %v8932_v60 = vld [vmem:[#allocation22_spill] sm:$0xff] }
  0xf0   :  { %8927 = vst [vmem:[#allocation123_spill] sm:$0xff] %v5392_v30  ;;  %769 = vmatpush1.msra.mxu0 %v4712_v27  ;;  %994 = vmatpush1.msra.mxu1 %v4775_v3 }
  0xf1   :  { %8928 = vst [vmem:[#allocation124_spill] sm:$0xff] %v5396_v42  ;;  %345 = vmatprep.mubr.f32.mxu0 %v5392_v30  ;;  %772 = vmatprep.subr.mxu0 %v4715_v28  ;;  %v8935_v30 = vld [vmem:[#allocation33_spill] sm:$0xff] }
  0xf2   :  { %996 = vmatprep.subr.mxu1 %v4777_v4  ;;  %351 = vmatmul.mubr.f32.gmra.mxu0 %v5396_v42  ;;  %v8934_v42 = vld [vmem:[#allocation23_spill] sm:$0xff] }
  0xf3   :  { %775 = vmatpush1.msra.mxu0 %v4723_v32  ;;  %998 = vmatpush1.msra.mxu1 %v4785_v9 }
  0xf4   :  { %778 = vmatprep.subr.mxu0 %v4732_v37  ;;  %952 = vmatprep.mubr.f32.mxu0 %v5336_v58  ;;  %v8933_v58 = vld [vmem:[#allocation32_spill] sm:$0xff] }
  0xf5   :  { %1000 = vmatprep.subr.mxu1 %v4797_v15  ;;  %781 = vmatpush1.msra.mxu0 %v4743_v41 }
  0xf6   :  { %1002 = vmatpush1.msra.mxu1 %v4805_v22  ;;  %784 = vmatprep.subr.mxu0 %v4780_v7 }
  0xf7   :  { %1004 = vmatprep.subr.mxu1 %v4849_v39  ;;  %787 = vmatpush1.msra.mxu0 %v4783_v8 }
  0xf8   :  { %1006 = vmatpush1.msra.mxu1 %v4851_v38  ;;  %790 = vmatprep.subr.mxu0 %v4789_v12 }
  0xf9   :  { %1008 = vmatprep.subr.mxu1 %v4853_v52  ;;  %793 = vmatpush1.msra.mxu0 %v4792_v13 }
  0xfa   :  { %1010 = vmatpush1.msra.mxu1 %v4855_v20  ;;  %796 = vmatprep.subr.mxu0 %v4795_v14 }
  0xfb   :  { %1012 = vmatprep.subr.mxu1 %v4857_v53  ;;  %799 = vmatpush1.msra.mxu0 %v4803_v21 }
  0xfc   :  { %1014 = vmatpush1.msra.mxu1 %v4865_v51  ;;  %802 = vmatprep.subr.mxu0 %v4812_v43 }
  0xfd   :  { %1016 = vmatprep.subr.mxu1 %v8929_v40  ;;  %805 = vmatpush1.msra.mxu0 %v8930_v6 }
  0xfe   :  { %1018 = vmatpush1.msra.mxu1 %v8931_v23  ;;  %808 = vmatprep.subr.mxu0 %v8932_v60  ;;  %v8942_v23 = vld [vmem:[#allocation28_spill] sm:$0xff]  ;;  %v8943_v60 = vld [vmem:[#allocation39_spill] sm:$0xff] }
  0xff   :  { %1020 = vmatprep.subr.mxu1 %v8933_v58  ;;  %811 = vmatpush1.msra.mxu0 %v8934_v42  ;;  %v8944_v58 = vld [vmem:[#allocation30_spill] sm:$0xff]  ;;  %v8945_v42 = vld [vmem:[#allocation43_spill] sm:$0xff] }
 0x100   :  { %1022 = vmatpush1.msra.mxu1 %v8935_v30  ;;  %814 = vmatprep.subr.mxu0 %v8936_v61  ;;  %v8946_v30 = vld [vmem:[#allocation31_spill] sm:$0xff]  ;;  %v8947_v61 = vld [vmem:[#allocation45_spill] sm:$0xff] }
 0x101   :  { %1024 = vmatprep.subr.mxu1 %v8937_v55  ;;  %817 = vmatpush1.msra.mxu0 %v8938_v48  ;;  %v8948_v55 = vld [vmem:[#allocation37_spill] sm:$0xff]  ;;  %v8949_v48 = vld [vmem:[#allocation48_spill] sm:$0xff] }
 0x102   :  { %1026 = vmatpush1.msra.mxu1 %v8939_v44  ;;  %820 = vmatprep.subr.mxu0 %v8940_v35  ;;  %v8950_v44 = vld [vmem:[#allocation38_spill] sm:$0xff]  ;;  %v8951_v35 = vld [vmem:[#allocation49_spill] sm:$0xff] }
 0x103   :  { %1028 = vmatprep.subr.mxu1 %v8941_v47  ;;  %823 = vmatpush1.msra.mxu0 %v8942_v23  ;;  %v8952_v47 = vld [vmem:[#allocation40_spill] sm:$0xff]  ;;  %v8953_v23 = vld [vmem:[#allocation50_spill] sm:$0xff] }
 0x104   :  { %1030 = vmatpush1.msra.mxu1 %v8943_v60  ;;  %826 = vmatprep.subr.mxu0 %v8944_v58  ;;  %v8954_v60 = vld [vmem:[#allocation41_spill] sm:$0xff]  ;;  %v8955_v58 = vld [vmem:[#allocation51_spill] sm:$0xff] }
 0x105   :  { %1032 = vmatprep.subr.mxu1 %v8945_v42  ;;  %829 = vmatpush1.msra.mxu0 %v8946_v30  ;;  %v8956_v42 = vld [vmem:[#allocation42_spill] sm:$0xff]  ;;  %v8957_v30 = vld [vmem:[#allocation52_spill] sm:$0xff] }
 0x106   :  { %1034 = vmatpush1.msra.mxu1 %v8947_v61  ;;  %832 = vmatprep.subr.mxu0 %v8948_v55  ;;  %v8958_v61 = vld [vmem:[#allocation44_spill] sm:$0xff]  ;;  %v8959_v55 = vld [vmem:[#allocation55_spill] sm:$0xff] }
 0x107   :  { %1036 = vmatprep.subr.mxu1 %v8949_v48  ;;  %835 = vmatpush1.msra.mxu0 %v8950_v44  ;;  %v8960_v48 = vld [vmem:[#allocation46_spill] sm:$0xff]  ;;  %v8961_v44 = vld [vmem:[#allocation59_spill] sm:$0xff] }
 0x108   :  { %1038 = vmatpush2.msra.mxu1 %v8951_v35  ;;  %838 = vmatprep.subr.mxu0 %v8952_v47  ;;  %v8962_v35 = vld [vmem:[#allocation47_spill] sm:$0xff]  ;;  %v8963_v47 = vld [vmem:[#allocation61_spill] sm:$0xff] }
 0x109   :  { %1040 = vmatprep.subr.mxu1 %v8953_v23  ;;  %841 = vmatpush1.msra.mxu0 %v8954_v60  ;;  %v8964_v23 = vld [vmem:[#allocation53_spill] sm:$0xff]  ;;  %v8965_v60 = vld [vmem:[#allocation64_spill] sm:$0xff] }
 0x10a   :  { %1042 = vmatpush2.msra.mxu1 %v8955_v58  ;;  %844 = vmatprep.subr.mxu0 %v8956_v42  ;;  %v8966_v58 = vld [vmem:[#allocation54_spill] sm:$0xff]  ;;  %v8967_v42 = vld [vmem:[#allocation65_spill] sm:$0xff] }
 0x10b   :  { %1044 = vmatprep.subr.mxu1 %v8957_v30  ;;  %847 = vmatpush1.msra.mxu0 %v8958_v61  ;;  %v8968_v30 = vld [vmem:[#allocation56_spill] sm:$0xff]  ;;  %v8969_v61 = vld [vmem:[#allocation66_spill] sm:$0xff] }
 0x10c   :  { %1046 = vmatpush2.msra.mxu1 %v8959_v55  ;;  %850 = vmatprep.subr.mxu0 %v8960_v48  ;;  %v8970_v55 = vld [vmem:[#allocation57_spill] sm:$0xff]  ;;  %v8971_v48 = vld [vmem:[#allocation67_spill] sm:$0xff] }
 0x10d   :  { %1048 = vmatprep.subr.mxu1 %v8961_v44  ;;  %853 = vmatpush1.msra.mxu0 %v8962_v35  ;;  %v8972_v44 = vld [vmem:[#allocation58_spill] sm:$0xff]  ;;  %v8973_v35 = vld [vmem:[#allocation68_spill] sm:$0xff] }
 0x10e   :  { %1050 = vmatpush2.msra.mxu1 %v8963_v47  ;;  %856 = vmatprep.subr.mxu0 %v8964_v23  ;;  %v8974_v47 = vld [vmem:[#allocation60_spill] sm:$0xff]  ;;  %v8975_v23 = vld [vmem:[#allocation69_spill] sm:$0xff] }
 0x10f   :  { %1052 = vmatprep.subr.mxu1 %v8965_v60  ;;  %859 = vmatpush2.msra.mxu0 %v8966_v58  ;;  %v8976_v60 = vld [vmem:[#allocation62_spill] sm:$0xff]  ;;  %v8977_v58 = vld [vmem:[#allocation73_spill] sm:$0xff] }
 0x110   :  { %1054 = vmatpush2.msra.mxu1 %v8967_v42  ;;  %862 = vmatprep.subr.mxu0 %v8968_v30  ;;  %v8978_v42 = vld [vmem:[#allocation63_spill] sm:$0xff]  ;;  %v8979_v30 = vld [vmem:[#allocation77_spill] sm:$0xff] }
 0x111   :  { %1056 = vmatprep.subr.mxu1 %v8969_v61  ;;  %865 = vmatpush2.msra.mxu0 %v8970_v55  ;;  %v8980_v61 = vld [vmem:[#allocation70_spill] sm:$0xff]  ;;  %v8981_v55 = vld [vmem:[#allocation80_spill] sm:$0xff] }
 0x112   :  { %1058 = vmatpush2.msra.mxu1 %v8971_v48  ;;  %868 = vmatprep.subr.mxu0 %v8972_v44  ;;  %v8982_v48 = vld [vmem:[#allocation71_spill] sm:$0xff]  ;;  %v8983_v44 = vld [vmem:[#allocation81_spill] sm:$0xff] }
 0x113   :  { %1060 = vmatprep.subr.mxu1 %v8973_v35  ;;  %871 = vmatpush2.msra.mxu0 %v8974_v47  ;;  %v8984_v35 = vld [vmem:[#allocation72_spill] sm:$0xff]  ;;  %v8985_v47 = vld [vmem:[#allocation82_spill] sm:$0xff] }
 0x114   :  { %1062 = vmatpush2.msra.mxu1 %v8975_v23  ;;  %874 = vmatprep.subr.mxu0 %v8976_v60  ;;  %v8986_v23 = vld [vmem:[#allocation74_spill] sm:$0xff]  ;;  %v8987_v60 = vld [vmem:[#allocation83_spill] sm:$0xff] }
 0x115   :  { %1064 = vmatprep.subr.mxu1 %v8977_v58  ;;  %877 = vmatpush2.msra.mxu0 %v8978_v42  ;;  %v8988_v58 = vld [vmem:[#allocation75_spill] sm:$0xff]  ;;  %v8989_v42 = vld [vmem:[#allocation84_spill] sm:$0xff] }
 0x116   :  { %1066 = vmatpush2.msra.mxu1 %v8979_v30  ;;  %880 = vmatprep.subr.mxu0 %v8980_v61  ;;  %v8990_v30 = vld [vmem:[#allocation76_spill] sm:$0xff]  ;;  %v8991_v61 = vld [vmem:[#allocation85_spill] sm:$0xff] }
 0x117   :  { %1068 = vmatprep.subr.mxu1 %v8981_v55  ;;  %883 = vmatpush2.msra.mxu0 %v8982_v48  ;;  %v8992_v55 = vld [vmem:[#allocation78_spill] sm:$0xff]  ;;  %v8993_v48 = vld [vmem:[#allocation89_spill] sm:$0xff] }
 0x118   :  { %1070 = vmatpush2.msra.mxu1 %v8983_v44  ;;  %886 = vmatprep.subr.mxu0 %v8984_v35  ;;  %v8994_v44 = vld [vmem:[#allocation79_spill] sm:$0xff] }
 0x119   :  { %1072 = vmatprep.subr.mxu1 %v8985_v47  ;;  %889 = vmatpush2.msra.mxu0 %v8986_v23  ;;  %v8995_v47 = vld [vmem:[#allocation86_spill] sm:$0xff]  ;;  %v8996_v23 = vld [vmem:[#allocation96_spill] sm:$0xff] }
 0x11a   :  { %1074 = vmatpush2.msra.mxu1 %v8987_v60  ;;  %892 = vmatprep.subr.mxu0 %v8988_v58  ;;  %v8997_v60 = vld [vmem:[#allocation87_spill] sm:$0xff] }
 0x11b   :  { %1076 = vmatprep.subr.mxu1 %v8989_v42  ;;  %895 = vmatpush2.msra.mxu0 %v8990_v30  ;;  %v8998_v42 = vld [vmem:[#allocation88_spill] sm:$0xff] }
 0x11c   :  { %1078 = vmatpush2.msra.mxu1 %v8991_v61  ;;  %898 = vmatprep.subr.mxu0 %v8992_v55  ;;  %v8999_v61 = vld [vmem:[#allocation90_spill] sm:$0xff] }
 0x11d   :  { %1080 = vmatprep.subr.mxu1 %v8993_v48  ;;  %901 = vmatpush2.msra.mxu0 %v8994_v44  ;;  %v9000_v48 = vld [vmem:[#allocation91_spill] sm:$0xff] }
 0x11e   :  { %1082 = vmatpush2.msra.mxu1 %v5202_v56  ;;  %904 = vmatprep.subr.mxu0 %v8995_v47  ;;  %v9001_v44 = vld [vmem:[#allocation99_spill] sm:$0xff]  ;;  %v9002_v56 = vld [vmem:[#allocation92_spill] sm:$0xff] }
 0x11f   :  { %1084 = vmatprep.subr.mxu1 %v8996_v23  ;;  %907 = vmatpush2.msra.mxu0 %v8997_v60  ;;  %v9003_v23 = vld [vmem:[#allocation94_spill] sm:$0xff] }
 0x120   :  { %1086 = vmatpush2.msra.mxu1 %v5251_v1  ;;  %910 = vmatprep.subr.mxu0 %v8998_v42  ;;  %v9004_v1 = vld [vmem:[#allocation95_spill] sm:$0xff] }
 0x121   :  { %1088 = vmatprep.subr.mxu1 %v5253_v59  ;;  %913 = vmatpush2.msra.mxu0 %v8999_v61  ;;  %v9005_v59 = vld [vmem:[#allocation101_spill] sm:$0xff] }
 0x122   :  { %1090 = vmatpush2.msra.mxu1 %v5255_v49  ;;  %916 = vmatprep.subr.mxu0 %v9000_v48  ;;  %v9006_v48 = vld [vmem:[#allocation102_spill] sm:$0xff] }
 0x123   :  { %1092 = vmatprep.subr.mxu1 %v9001_v44  ;;  %919 = vmatpush2.msra.mxu0 %v9002_v56 }
 0x124   :  { %1094 = vmatpush2.msra.mxu1 %v5259_v45  ;;  %922 = vmatprep.subr.mxu0 %v9003_v23  ;;  %v9007_v45 = vld [vmem:[#allocation103_spill] sm:$0xff] }
 0x125   :  { %1096 = vmatprep.subr.mxu1 %v5270_v36  ;;  %925 = vmatpush2.msra.mxu0 %v9004_v1 }
 0x126   :  { %1098 = vmatpush2.msra.mxu1 %v5282_v54  ;;  %928 = vmatprep.subr.mxu0 %v9005_v59  ;;  %v9008_v54 = vld [vmem:[#allocation104_spill] sm:$0xff] }
 0x127   :  { %1106 = vmatmul.mubr.f32.vlgmr.msra.gmra.mxu1 %v5352_v46  ;;  %1398 = vmatprep.subr.mxu1 %v4689_v10  ;;  %v9009_v10 = vld [vmem:[#allocation105_spill] sm:$0xff]  ;;  %v9138_v46 = vand.u32 4294901760, %v8988_v58 }
 0x128   :  { %931 = vmatpush2.msra.mxu0 %v9006_v48  ;;  %1114 = vmatprep.mubr.f32.mxu1 %v5376_v50 }
 0x129   :  { %1400 = vmatpush1.msra.mxu1 %v4691_v11  ;;  %934 = vmatprep.subr.mxu0 %v9007_v45  ;;  %v9010_v11 = vld [vmem:[#allocation107_spill] sm:$0xff] }
 0x12a   :  { %1402 = vmatprep.subr.mxu1 %v4693_v16  ;;  %937 = vmatpush2.msra.mxu0 %v5274_v34  ;;  %v9011_v16 = vld [vmem:[#allocation108_spill] sm:$0xff] }
 0x12b   :  { %1404 = vmatpush1.msra.mxu1 %v4695_v17  ;;  %940 = vmatprep.subr.mxu0 %v9008_v54  ;;  %v9012_v17 = vld [vmem:[#allocation20_spill] sm:$0xff] }
 0x12c   :  { %1118 = vmatmul.mubr.f32.gmra.mxu1 %v5380_v31  ;;  %1406 = vmatprep.subr.mxu1 %v4697_v18  ;;  %v9013_v31 = vand.u32 4294901760, %v9012_v17  ;;  %v9014_v18 = vand.u32 4294901760, %v4703_v24  ;;  %v9018_v24 = vand.u32 4294901760, %v4723_v32  ;;  %v9022_v32 = vand.u32 4294901760, %v4783_v8 }
 0x12d   :  { %943 = vmatpush2.msra.mxu0 %v9009_v10  ;;  %1408 = vmatpush1.msra.mxu1 %v4705_v25  ;;  %v9015_v25 = vand.u32 4294901760, %v4709_v26  ;;  %v9019_v26 = vand.u32 4294901760, %v4732_v37  ;;  %v9023_v37 = vand.u32 4294901760, %v4789_v12  ;;  %v9033_v12 = vld [vmem:[#allocation23_spill] sm:$0xff] }
 0x12e   :  { %1526 = vmatprep.mubr.f32.mxu1 %v5331_v19  ;;  %946 = vmatprep.subr.mxu0 %v9010_v11 }
 0x12f   :  { %1410 = vmatprep.subr.mxu1 %v4717_v29  ;;  %949 = vmatpush2.msra.mxu0 %v9011_v16  ;;  %v9016_v29 = vand.u32 4294901760, %v4712_v27  ;;  %v9020_v27 = vand.u32 4294901760, %v4743_v41  ;;  %v9024_v41 = vand.u32 4294901760, %v4792_v13  ;;  %v9034_v13 = vand.u32 4294901760, %v9033_v12 }
 0x130   :  { %1412 = vmatpush1.msra.mxu1 %v4725_v33  ;;  %955 = vmatmul.mubr.f32.vlgmr.msra.gmra.mxu0 %v5340_v0  ;;  %v9017_v33 = vand.u32 4294901760, %v4715_v28  ;;  %v9021_v28 = vand.u32 4294901760, %v4780_v7  ;;  %v9030_v7 = vld [vmem:[#allocation22_spill] sm:$0xff] }
 0x131   :  { %1127 = vmatprep.subr.mxu0 %v9013_v31  ;;  %1414 = vmatprep.subr.mxu1 %v4769_v62  ;;  %v9025_v62 = vand.u32 4294901760, %v4795_v14  ;;  %v9031_v8 = vand.u32 4294901760, %v9030_v7  ;;  %v9035_v14 = vld [vmem:[#allocation33_spill] sm:$0xff]  ;;  %v1576_v7 = vld [vmem:[#allocation8 + $0xf0] sm:$0xff] }
 0x132   :  { %962 = vmatprep.mubr.f32.mxu0 %v5362_v57  ;;  %1131 = vmatpush1.msra.mxu0 %v9014_v18  ;;  %v9050_v18 = vld [vmem:[#allocation43_spill] sm:$0xff]  ;;  %v9131_v57 = vld [vmem:[#allocation82_spill] sm:$0xff] }
 0x133   :  { %1416 = vmatpush1.msra.mxu1 %v4771_v63  ;;  %1135 = vmatprep.subr.mxu0 %v9015_v25  ;;  %v9026_v63 = vand.u32 4294901760, %v4803_v21  ;;  %v9039_v21 = vld [vmem:[#allocation25_spill] sm:$0xff]  ;;  %v9051_v25 = vld [vmem:[#allocation31_spill] sm:$0xff]  ;;  %v9132_v0 = vld [vmem:[#allocation74_spill] sm:$0xff] }
 0x134   :  { %1418 = vmatprep.subr.mxu1 %v4773_v2  ;;  %1139 = vmatpush1.msra.mxu0 %v9016_v29  ;;  %v9027_v2 = vand.u32 4294901760, %v4812_v43  ;;  %v9052_v29 = vand.u32 4294901760, %v9051_v25  ;;  %v9078_v25 = vld [vmem:[#allocation53_spill] sm:$0xff]  ;;  %v9133_v50 = vand.u32 4294901760, %v9132_v0 }
 0x135   :  { %1420 = vmatpush1.msra.mxu1 %v4775_v3  ;;  %965 = vmatmul.mubr.f32.gmra.mxu0 %v5367_v5  ;;  %v9028_v3 = vand.u32 4294901760, %v8930_v6  ;;  %v9048_v6 = vld [vmem:[#allocation30_spill] sm:$0xff]  ;;  %v9126_v5 = vld [vmem:[#allocation81_spill] sm:$0xff] }
 0x136   :  { %1143 = vmatprep.subr.mxu0 %v9017_v33  ;;  %1422 = vmatprep.subr.mxu1 %v4777_v4  ;;  %v9029_v4 = vld [vmem:[#allocation29_spill] sm:$0xff]  ;;  %v9049_v17 = vand.u32 4294901760, %v9048_v6 }
 0x137   :  { %1147 = vmatpush1.msra.mxu0 %v9018_v24  ;;  %1381 = vmatprep.mubr.f32.mxu0 %v5331_v19  ;;  %v9053_v33 = vld [vmem:[#allocation45_spill] sm:$0xff] }
 0x138   :  { %1424 = vmatpush1.msra.mxu1 %v4785_v9  ;;  %1151 = vmatprep.subr.mxu0 %v9019_v26  ;;  %v9032_v9 = vld [vmem:[#allocation32_spill] sm:$0xff]  ;;  %v9054_v24 = vld [vmem:[#allocation37_spill] sm:$0xff] }
 0x139   :  { %1426 = vmatprep.subr.mxu1 %v4797_v15  ;;  %1155 = vmatpush1.msra.mxu0 %v9020_v27  ;;  %v9055_v26 = vand.u32 4294901760, %v9054_v24  ;;  %v9056_v27 = vld [vmem:[#allocation48_spill] sm:$0xff]  ;;  %v1571_v24 = vld [vmem:[#allocation8 + $0xc8] sm:$0xff] }
 0x13a   :  { %1428 = vmatpush1.msra.mxu1 %v4805_v22  ;;  %1159 = vmatprep.subr.mxu0 %v9021_v28  ;;  %v9040_v22 = vand.u32 4294901760, %v9039_v21  ;;  %v9057_v28 = vld [vmem:[#allocation38_spill] sm:$0xff]  ;;  %v1574_v21 = vld [vmem:[#allocation8 + $0xe0] sm:$0xff] }
 0x13b   :  { %1430 = vmatprep.subr.mxu1 %v4849_v39  ;;  %1163 = vmatpush1.msra.mxu0 %v9022_v32  ;;  %v9042_v39 = vld [vmem:[#allocation26_spill] sm:$0xff]  ;;  %v9058_v32 = vand.u32 4294901760, %v9057_v28 }
 0x13c   :  { %1432 = vmatpush1.msra.mxu1 %v4851_v38  ;;  %1167 = vmatprep.subr.mxu0 %v9023_v37  ;;  %v9041_v38 = vld [vmem:[#allocation35_spill] sm:$0xff]  ;;  %v9043_v43 = vand.u32 4294901760, %v9042_v39  ;;  %v9059_v37 = vld [vmem:[#allocation49_spill] sm:$0xff] }
 0x13d   :  { %1434 = vmatprep.subr.mxu1 %v4853_v52  ;;  %1171 = vmatpush1.msra.mxu0 %v9024_v41  ;;  %v9045_v52 = vld [vmem:[#allocation28_spill] sm:$0xff] }
 0x13e   :  { %1436 = vmatpush1.msra.mxu1 %v4855_v20  ;;  %1175 = vmatprep.subr.mxu0 %v9025_v62  ;;  %v9038_v20 = vld [vmem:[#allocation34_spill] sm:$0xff]  ;;  %v9046_v31 = vand.u32 4294901760, %v9045_v52  ;;  %v9060_v41 = vld [vmem:[#allocation40_spill] sm:$0xff]  ;;  %v9074_v52 = vld [vmem:[#allocation59_spill] sm:$0xff] }
 0x13f   :  { %1438 = vmatprep.subr.mxu1 %v4857_v53  ;;  %1179 = vmatpush1.msra.mxu0 %v9026_v63  ;;  %v9044_v53 = vld [vmem:[#allocation36_spill] sm:$0xff]  ;;  %v9061_v62 = vand.u32 4294901760, %v9060_v41  ;;  %v1577_v63 = vld [vmem:[#allocation8 + $0xf8] sm:$0xff] }
 0x140   :  { %1440 = vmatpush1.msra.mxu1 %v4865_v51  ;;  %1183 = vmatprep.subr.mxu0 %v9027_v2  ;;  %v9036_v51 = vld [vmem:[#allocation24_spill] sm:$0xff]  ;;  %v9062_v2 = vld [vmem:[#allocation50_spill] sm:$0xff] }
 0x141   :  { %1442 = vmatprep.subr.mxu1 %v8929_v40  ;;  %1187 = vmatpush1.msra.mxu0 %v9028_v3  ;;  %v9037_v15 = vand.u32 4294901760, %v9036_v51  ;;  %v9047_v40 = vld [vmem:[#allocation39_spill] sm:$0xff]  ;;  %v9063_v3 = vld [vmem:[#allocation41_spill] sm:$0xff]  ;;  %v9069_v51 = vld [vmem:[#allocation44_spill] sm:$0xff] }
 0x142   :  { %1444 = vmatpush1.msra.mxu1 %v9029_v4  ;;  %1191 = vmatprep.subr.mxu0 %v9031_v8  ;;  %v9064_v4 = vand.u32 4294901760, %v9063_v3  ;;  %v9065_v8 = vld [vmem:[#allocation51_spill] sm:$0xff]  ;;  %v1570_v41 = vld [vmem:[#allocation8 + $0xc0] sm:$0xff] }
 0x143   :  { %1446 = vmatprep.subr.mxu1 %v9032_v9  ;;  %1195 = vmatpush1.msra.mxu0 %v9034_v13  ;;  %v9066_v9 = vld [vmem:[#allocation42_spill] sm:$0xff]  ;;  %v1575_v13 = vld [vmem:[#allocation8 + $0xe8] sm:$0xff] }
 0x144   :  { %1448 = vmatpush1.msra.mxu1 %v9035_v14  ;;  %1199 = vmatprep.subr.mxu0 %v9037_v15  ;;  %v9067_v12 = vand.u32 4294901760, %v9066_v9  ;;  %v9068_v14 = vld [vmem:[#allocation52_spill] sm:$0xff]  ;;  %v9070_v15 = vand.u32 4294901760, %v9069_v51  ;;  %v5630_v6 = vand.u32 4294901760, %v1575_v13  ;;  %v1569_v9 = vld [vmem:[#allocation8 + $0xb8] sm:$0xff] }
 0x145   :  { %1450 = vmatprep.subr.mxu1 %v9038_v20  ;;  %1203 = vmatpush1.msra.mxu0 %v9040_v22  ;;  %v5620_v20 = vand.u32 4294901760, %v1577_v63  ;;  %v9071_v22 = vld [vmem:[#allocation55_spill] sm:$0xff] }
 0x146   :  { %1452 = vmatpush1.msra.mxu1 %v9041_v38  ;;  %1207 = vmatprep.subr.mxu0 %v9043_v43  ;;  %v9072_v38 = vld [vmem:[#allocation46_spill] sm:$0xff]  ;;  %v5625_v43 = vand.u32 4294901760, %v1576_v7 }
 0x147   :  { %1454 = vmatprep.subr.mxu1 %v9044_v53  ;;  %1211 = vmatpush1.msra.mxu0 %v9046_v31  ;;  %v9073_v39 = vand.u32 4294901760, %v9072_v38  ;;  %v1573_v53 = vld [vmem:[#allocation8 + $0xd8] sm:$0xff] }
 0x148   :  { %1456 = vmatpush1.msra.mxu1 %v9047_v40  ;;  %1215 = vmatprep.subr.mxu0 %v9049_v17  ;;  %v9075_v31 = vld [vmem:[#allocation47_spill] sm:$0xff]  ;;  %v1572_v17 = vld [vmem:[#allocation8 + $0xd0] sm:$0xff] }
 0x149   :  { %1458 = vmatprep.subr.mxu1 %v9050_v18  ;;  %1219 = vmatpush1.msra.mxu0 %v9052_v29  ;;  %v9076_v40 = vand.u32 4294901760, %v9075_v31  ;;  %v9077_v18 = vld [vmem:[#allocation61_spill] sm:$0xff]  ;;  %v9079_v29 = vand.u32 4294901760, %v9078_v25  ;;  %v9096_v38 = vld [vmem:[#allocation67_spill] sm:$0xff]  ;;  %v5667_v31 = vand.u32 4294901760, %v1570_v41  ;;  %v9102_v25 = vld [vmem:[#allocation60_spill] sm:$0xff] }
 0x14a   :  { %1460 = vmatpush1.msra.mxu1 %v9053_v33  ;;  %1223 = vmatprep.subr.mxu0 %v9055_v26  ;;  %v5635_v33 = vand.u32 4294901760, %v1574_v21  ;;  %v9081_v26 = vld [vmem:[#allocation64_spill] sm:$0xff] }
 0x14b   :  { %1462 = vmatprep.subr.mxu1 %v9056_v27  ;;  %1227 = vmatpush1.msra.mxu0 %v9058_v32  ;;  %v9082_v27 = vld [vmem:[#allocation54_spill] sm:$0xff]  ;;  %v5641_v32 = vsub.f32 %v1577_v63, %v5620_v20  ;;  %v5657_v63 = vsub.f32 %v1575_v13, %v5630_v6  ;;  %9100 = vst [vmem:[#allocation88_spill] sm:$0xff] %v5667_v31 }
 0x14c   :  { %1464 = vmatpush2.msra.mxu1 %v9059_v37  ;;  %1231 = vmatprep.subr.mxu0 %v9061_v62  ;;  %9080 = vst [vmem:[#allocation27_spill] sm:$0xff] %v5635_v33  ;;  %v9083_v28 = vand.u32 4294901760, %v9082_v27  ;;  %v5643_v37 = vand.u32 4294901760, %v1573_v53  ;;  %v9086_v62 = vld [vmem:[#allocation65_spill] sm:$0xff]  ;;  %v5676_v27 = vand.u32 4294901760, %v1569_v9 }
 0x14d   :  { %1466 = vmatprep.subr.mxu1 %v9062_v2  ;;  %1235 = vmatpush1.msra.mxu0 %v9064_v4  ;;  %9084 = vst [vmem:[#allocation21_spill] sm:$0xff] %v5641_v32  ;;  %v9087_v2 = vld [vmem:[#allocation56_spill] sm:$0xff]  ;;  %v5649_v4 = vsub.f32 %v1576_v7, %v5625_v43  ;;  %9094 = vst [vmem:[#allocation78_spill] sm:$0xff] %v5657_v63  ;;  %v5665_v7 = vsub.f32 %v1574_v21, %v5635_v33  ;;  %v8394_v13 = vand.u32 4294901760, %v5641_v32  ;;  %v9107_v21 = vld [vmem:[#allocation62_spill] sm:$0xff] }
 0x14e   :  { %1468 = vmatpush2.msra.mxu1 %v9065_v8  ;;  %1239 = vmatprep.subr.mxu0 %v9067_v12  ;;  %9085 = vst [vmem:[#allocation72_spill] sm:$0xff] %v5643_v37  ;;  %v9088_v3 = vand.u32 4294901760, %v9087_v2  ;;  %v5651_v8 = vand.u32 4294901760, %v1572_v17  ;;  %v9091_v12 = vld [vmem:[#allocation66_spill] sm:$0xff]  ;;  %9105 = vst [vmem:[#allocation99_spill] sm:$0xff] %v5676_v27  ;;  %v9108_v2 = vand.u32 4294901760, %v9107_v21 }
 0x14f   :  { %1470 = vmatprep.subr.mxu1 %v9068_v14  ;;  %1243 = vmatpush1.msra.mxu0 %v9070_v15  ;;  %9089 = vst [vmem:[#allocation75_spill] sm:$0xff] %v5649_v4  ;;  %v9092_v14 = vld [vmem:[#allocation57_spill] sm:$0xff]  ;;  %v5659_v15 = vand.u32 4294901760, %v1571_v24  ;;  %9099 = vst [vmem:[#allocation87_spill] sm:$0xff] %v5665_v7  ;;  %v9139_v0 = vand.u32 4294901760, %v5665_v7 }
 0x150   :  { %1472 = vmatpush2.msra.mxu1 %v9071_v22  ;;  %1247 = vmatprep.subr.mxu0 %v9073_v39  ;;  %9090 = vst [vmem:[#allocation76_spill] sm:$0xff] %v5651_v8  ;;  %v9093_v51 = vand.u32 4294901760, %v9092_v14  ;;  %v1568_v22 = vld [vmem:[#allocation8 + $0xb0] sm:$0xff] }
 0x151   :  { %1474 = vmatprep.subr.mxu1 %v9074_v52  ;;  %1251 = vmatpush1.msra.mxu0 %v9076_v40  ;;  %9095 = vst [vmem:[#allocation86_spill] sm:$0xff] %v5659_v15  ;;  %v9097_v39 = vld [vmem:[#allocation58_spill] sm:$0xff]  ;;  %v1567_v40 = vld [vmem:[#allocation8 + $0xa8] sm:$0xff]  ;;  %v5685_v14 = vand.u32 4294901760, %v1568_v22 }
 0x152   :  { %1476 = vmatpush2.msra.mxu1 %v9077_v18  ;;  %1255 = vmatprep.subr.mxu0 %v9079_v29  ;;  %v9098_v52 = vand.u32 4294901760, %v9097_v39  ;;  %v9101_v18 = vld [vmem:[#allocation68_spill] sm:$0xff]  ;;  %v9103_v29 = vand.u32 4294901760, %v9102_v25  ;;  %v5694_v25 = vand.u32 4294901760, %v1567_v40 }
 0x153   :  { %1478 = vmatprep.subr.mxu1 %v9081_v26  ;;  %1259 = vmatpush2.msra.mxu0 %v9083_v28  ;;  %v5674_v26 = vsub.f32 %v1573_v53, %v5643_v37  ;;  %v1566_v28 = vld [vmem:[#allocation8 + $0xa0] sm:$0xff]  ;;  %9110 = vst [vmem:[#allocation94_spill] sm:$0xff] %v5685_v14  ;;  %v9112_v53 = vld [vmem:[#allocation63_spill] sm:$0xff] }
 0x154   :  { %1480 = vmatpush2.msra.mxu1 %v9086_v62  ;;  %1263 = vmatprep.subr.mxu0 %v9088_v3  ;;  %v9106_v62 = vld [vmem:[#allocation69_spill] sm:$0xff]  ;;  %v9113_v39 = vand.u32 4294901760, %v9112_v53  ;;  %9115 = vst [vmem:[#allocation101_spill] sm:$0xff] %v5694_v25  ;;  %v5703_v53 = vand.u32 4294901760, %v1566_v28 }
 0x155   :  { %1482 = vmatprep.subr.mxu1 %v9091_v12  ;;  %1267 = vmatpush2.msra.mxu0 %v9093_v51  ;;  %9104 = vst [vmem:[#allocation90_spill] sm:$0xff] %v5674_v26  ;;  %v5683_v12 = vsub.f32 %v1572_v17, %v5651_v8  ;;  %v1565_v51 = vld [vmem:[#allocation8 + $0x98] sm:$0xff]  ;;  %v9117_v17 = vld [vmem:[#allocation70_spill] sm:$0xff] }
 0x156   :  { %1484 = vmatpush2.msra.mxu1 %v9096_v38  ;;  %1271 = vmatprep.subr.mxu0 %v9098_v52  ;;  %v9111_v38 = vld [vmem:[#allocation73_spill] sm:$0xff]  ;;  %v9118_v21 = vand.u32 4294901760, %v9117_v17  ;;  %9120 = vst [vmem:[#allocation103_spill] sm:$0xff] %v5703_v53  ;;  %v9121_v52 = vld [vmem:[#allocation80_spill] sm:$0xff]  ;;  %v5729_v17 = vsub.f32 %v1568_v22, %v5685_v14  ;;  %v9137_v22 = vld [vmem:[#allocation83_spill] sm:$0xff] }
 0x157   :  { %1486 = vmatprep.subr.mxu1 %v9101_v18  ;;  %1275 = vmatpush2.msra.mxu0 %v9103_v29  ;;  %9109 = vst [vmem:[#allocation92_spill] sm:$0xff] %v5683_v12  ;;  %v5692_v18 = vsub.f32 %v1571_v24, %v5659_v15  ;;  %v1564_v29 = vld [vmem:[#allocation8 + $0x90] sm:$0xff]  ;;  %v9122_v24 = vld [vmem:[#allocation71_spill] sm:$0xff] }
 0x158   :  { %1488 = vmatpush2.msra.mxu1 %v9106_v62  ;;  %1279 = vmatprep.subr.mxu0 %v9108_v2  ;;  %v9116_v62 = vld [vmem:[#allocation77_spill] sm:$0xff]  ;;  %v9123_v3 = vand.u32 4294901760, %v9122_v24  ;;  %v1562_v2 = vld [vmem:[#allocation8 + $0x80] sm:$0xff]  ;;  %9129 = vst [vmem:[#allocation107_spill] sm:$0xff] %v5729_v17 }
 0x159   :  { %1490 = vmatprep.subr.mxu1 %v9111_v38  ;;  %1283 = vmatpush2.msra.mxu0 %v9113_v39  ;;  %9114 = vst [vmem:[#allocation95_spill] sm:$0xff] %v5692_v18  ;;  %v5701_v38 = vsub.f32 %v1570_v41, %v5667_v31  ;;  %v1563_v39 = vld [vmem:[#allocation8 + $0x88] sm:$0xff]  ;;  %v5717_v41 = vand.u32 4294901760, %v1565_v51 }
 0x15a   :  { %1492 = vmatpush2.msra.mxu1 %v9116_v62  ;;  %1287 = vmatprep.subr.mxu0 %v9118_v21  ;;  %v5711_v62 = vsub.f32 %v5641_v32, %v8394_v13  ;;  %v5715_v21 = vsub.f32 %v1569_v9, %v5676_v27  ;;  %v5731_v9 = vand.u32 4294901760, %v1564_v29  ;;  %v5745_v13 = vand.u32 4294901760, %v1563_v39 }
 0x15b   :  { %9119 = vst [vmem:[#allocation102_spill] sm:$0xff] %v5701_v38  ;;  %1494 = vmatprep.subr.mxu1 %v9121_v52  ;;  %1291 = vmatpush2.msra.mxu0 %v9123_v3  ;;  %9125 = vst [vmem:[#allocation105_spill] sm:$0xff] %v5717_v41  ;;  %v9127_v52 = vand.u32 4294901760, %v8984_v35  ;;  %v9128_v3 = vand.u32 4294901760, %v5649_v4  ;;  %v9134_v35 = vand.u32 4294901760, %v5657_v63  ;;  %v9168_v32 = vand.u32 4294901760, %v8999_v61 }
 0x15c   :  { %9124 = vst [vmem:[#allocation104_spill] sm:$0xff] %v5715_v21  ;;  %1496 = vmatpush2.msra.mxu1 %v9126_v5  ;;  %9130 = vst [vmem:[#allocation108_spill] sm:$0xff] %v5731_v9  ;;  %v5785_v58 = vsub.f32 %v1564_v29, %v5731_v9  ;;  %v1560_v29 = vld [vmem:[#allocation8 + $0x70] sm:$0xff] }
 0x15d   :  { %1295 = vmatprep.subr.mxu0 %v9127_v52  ;;  %v5725_v24 = vsub.f32 %v5649_v4, %v9128_v3  ;;  %1498 = vmatprep.subr.mxu1 %v9131_v57  ;;  %v5739_v5 = vsub.f32 %v5657_v63, %v9134_v35  ;;  %v5743_v3 = vsub.f32 %v1567_v40, %v5694_v25  ;;  %v5759_v52 = vand.u32 4294901760, %v1562_v2  ;;  %v9142_v40 = vld [vmem:[#allocation84_spill] sm:$0xff] }
 0x15e   :  { %1299 = vmatpush2.msra.mxu0 %v9133_v50  ;;  %9136 = vst [vmem:[#allocation29_spill] sm:$0xff] %v5745_v13  ;;  %1500 = vmatpush2.msra.mxu1 %v9137_v22  ;;  %v5753_v57 = vsub.f32 %v5665_v7, %v9139_v0  ;;  %v5757_v35 = vsub.f32 %v1566_v28, %v5703_v53  ;;  %v9143_v63 = vand.u32 4294901760, %v8990_v30  ;;  %v9146_v28 = vld [vmem:[#allocation85_spill] sm:$0xff]  ;;  %v9147_v7 = vand.u32 4294901760, %v8992_v55  ;;  %v1561_v0 = vld [vmem:[#allocation8 + $0x78] sm:$0xff] }
 0x15f   :  { %9135 = vst [vmem:[#allocation20_spill] sm:$0xff] %v5743_v3  ;;  %1303 = vmatprep.subr.mxu0 %v9138_v46  ;;  %9141 = vst [vmem:[#allocation32_spill] sm:$0xff] %v5759_v52  ;;  %1502 = vmatprep.subr.mxu1 %v9142_v40  ;;  %v9144_v46 = vand.u32 4294901760, %v5674_v26  ;;  %v5772_v50 = vsub.f32 %v1565_v51, %v5717_v41  ;;  %v9150_v51 = vld [vmem:[#allocation89_spill] sm:$0xff]  ;;  %v9164_v4 = vand.u32 4294901760, %v8998_v42 }
 0x160   :  { %9140 = vst [vmem:[#allocation22_spill] sm:$0xff] %v5757_v35  ;;  %1307 = vmatpush2.msra.mxu0 %v9143_v63  ;;  %1504 = vmatpush2.msra.mxu1 %v9146_v28  ;;  %v9148_v63 = vand.u32 4294901760, %v5683_v12  ;;  %9149 = vst [vmem:[#allocation33_spill] sm:$0xff] %v5785_v58 }
 0x161   :  { %v5768_v22 = vsub.f32 %v5674_v26, %v9144_v46  ;;  %9145 = vst [vmem:[#allocation23_spill] sm:$0xff] %v5772_v50  ;;  %1311 = vmatprep.subr.mxu0 %v9147_v7  ;;  %1506 = vmatprep.subr.mxu1 %v9150_v51  ;;  %v9151_v26 = vld [vmem:[#allocation79_spill] sm:$0xff]  ;;  %v9153_v7 = vand.u32 4294901760, %v5692_v18  ;;  %v5798_v46 = vsub.f32 %v1563_v39, %v5745_v13  ;;  %v9156_v51 = vand.u32 4294901760, %v8995_v47  ;;  %v1559_v39 = vld [vmem:[#allocation8 + $0x68] sm:$0xff] }
 0x162   :  { %v5781_v40 = vsub.f32 %v5683_v12, %v9148_v63  ;;  %v9152_v28 = vand.u32 4294901760, %v9151_v26  ;;  %v9155_v12 = vld [vmem:[#allocation93_spill] sm:$0xff]  ;;  %v5811_v63 = vsub.f32 %v1562_v2, %v5759_v52  ;;  %v5835_v47 = vand.u32 4294901760, %v1560_v29 }
 0x163   :  { %v5794_v30 = vsub.f32 %v5692_v18, %v9153_v7  ;;  %9154 = vst [vmem:[#allocation24_spill] sm:$0xff] %v5798_v46  ;;  %1508 = vmatpush2.msra.mxu1 %v9155_v12  ;;  %v9159_v18 = vld [vmem:[#allocation96_spill] sm:$0xff]  ;;  %v9160_v12 = vand.u32 4294901760, %v8997_v60  ;;  %v9163_v2 = vld [vmem:[#allocation97_spill] sm:$0xff]  ;;  %v5847_v60 = vand.u32 4294901760, %v1559_v39  ;;  %v9206_v13 = vand.u32 4294901760, %v5274_v34 }
 0x164   :  { %1315 = vmatpush2.msra.mxu0 %v9152_v28  ;;  %v9157_v28 = vand.u32 4294901760, %v5701_v38  ;;  %9158 = vst [vmem:[#allocation34_spill] sm:$0xff] %v5811_v63  ;;  %1510 = vmatprep.subr.mxu1 %v9159_v18  ;;  %v1558_v7 = vld [vmem:[#allocation8 + $0x60] sm:$0xff]  ;;  %v9165_v18 = vand.u32 4294901760, %v5729_v17  ;;  %9166 = vst [vmem:[#allocation35_spill] sm:$0xff] %v5835_v47 }
 0x165   :  { %1319 = vmatprep.subr.mxu0 %v9156_v51  ;;  %v9161_v51 = vand.u32 4294901760, %v5715_v21  ;;  %1512 = vmatpush2.msra.mxu1 %v9163_v2  ;;  %9170 = vst [vmem:[#allocation26_spill] sm:$0xff] %v5847_v60  ;;  %v5859_v42 = vand.u32 4294901760, %v1558_v7 }
 0x166   :  { %v5807_v55 = vsub.f32 %v5701_v38, %v9157_v28  ;;  %1323 = vmatpush2.msra.mxu0 %v9160_v12  ;;  %v5823_v38 = vand.u32 4294901760, %v1561_v0  ;;  %v5832_v12 = vsub.f32 %v5729_v17, %v9165_v18  ;;  %v1557_v28 = vld [vmem:[#allocation8 + $0x58] sm:$0xff]  ;;  %v1555_v18 = vld [vmem:[#allocation8 + $0x48] sm:$0xff] }
 0x167   :  { %v5820_v26 = vsub.f32 %v5715_v21, %v9161_v51  ;;  %1327 = vmatprep.subr.mxu0 %v9164_v4  ;;  %v9167_v21 = vld [vmem:[#allocation98_spill] sm:$0xff]  ;;  %v9169_v4 = vand.u32 4294901760, %v5743_v3  ;;  %v9171_v17 = vld [vmem:[#allocation91_spill] sm:$0xff]  ;;  %9174 = vst [vmem:[#allocation36_spill] sm:$0xff] %v5859_v42  ;;  %v5873_v61 = vand.u32 4294901760, %v1557_v28 }
 0x168   :  { %9162 = vst [vmem:[#allocation25_spill] sm:$0xff] %v5823_v38  ;;  %1514 = vmatprep.subr.mxu1 %v9167_v21  ;;  %1331 = vmatpush2.msra.mxu0 %v9168_v32  ;;  %v1556_v51 = vld [vmem:[#allocation8 + $0x50] sm:$0xff]  ;;  %v9172_v52 = vand.u32 4294901760, %v9171_v17  ;;  %v9173_v32 = vand.u32 4294901760, %v5757_v35  ;;  %v9176_v17 = vand.u32 4294901760, %v5772_v50 }
 0x169   :  { %v5844_v2 = vsub.f32 %v5743_v3, %v9169_v4  ;;  %1516 = vmatpush2.msra.mxu1 %v5255_v49  ;;  %v9175_v3 = vand.u32 4294901760, %v9002_v56  ;;  %9178 = vst [vmem:[#allocation39_spill] sm:$0xff] %v5873_v61  ;;  %v1554_v4 = vld [vmem:[#allocation8 + $0x40] sm:$0xff] }
 0x16a   :  { %1335 = vmatprep.subr.mxu0 %v9172_v52  ;;  %v5856_v21 = vsub.f32 %v5757_v35, %v9173_v32  ;;  %1518 = vmatprep.subr.mxu1 %v9001_v44  ;;  %v5868_v52 = vsub.f32 %v5772_v50, %v9176_v17  ;;  %v5871_v32 = vsub.f32 %v1561_v0, %v5823_v38  ;;  %v9179_v35 = vld [vmem:[#allocation100_spill] sm:$0xff]  ;;  %v9180_v44 = vand.u32 4294901760, %v9003_v23  ;;  %v1553_v50 = vld [vmem:[#allocation8 + $0x38] sm:$0xff] }
 0x16b   :  { %1339 = vmatpush2.msra.mxu0 %v9175_v3  ;;  %1520 = vmatpush2.msra.mxu1 %v9179_v35  ;;  %v9181_v3 = vand.u32 4294901760, %v5785_v58  ;;  %v5885_v17 = vsub.f32 %v1560_v29, %v5835_v47  ;;  %v5887_v0 = vand.u32 4294901760, %v1556_v51  ;;  %v9184_v35 = vand.u32 4294901760, %v9004_v1  ;;  %v9188_v47 = vld [vmem:[#allocation106_spill] sm:$0xff] }
 0x16c   :  { %9177 = vst [vmem:[#allocation28_spill] sm:$0xff] %v5871_v32  ;;  %1343 = vmatprep.subr.mxu0 %v9180_v44  ;;  %1522 = vmatprep.subr.mxu1 %v5270_v36  ;;  %v9185_v44 = vand.u32 4294901760, %v5798_v46  ;;  %v5901_v29 = vand.u32 4294901760, %v1555_v18  ;;  %v9189_v36 = vand.u32 4294901760, %v9005_v59  ;;  %v5923_v1 = vsub.f32 %v1557_v28, %v5873_v61 }
 0x16d   :  { %v5882_v49 = vsub.f32 %v5785_v58, %v9181_v3  ;;  %9182 = vst [vmem:[#allocation30_spill] sm:$0xff] %v5885_v17  ;;  %9183 = vst [vmem:[#allocation43_spill] sm:$0xff] %v5887_v0  ;;  %1347 = vmatpush2.msra.mxu0 %v9184_v35  ;;  %v5899_v3 = vsub.f32 %v1559_v39, %v5847_v60  ;;  %v1552_v58 = vld [vmem:[#allocation8 + $0x30] sm:$0xff]  ;;  %1524 = vmatpush2.msra.mxu1 %v9188_v47  ;;  %v9190_v35 = vand.u32 4294901760, %v5811_v63 }
 0x16e   :  { %v5896_v56 = vsub.f32 %v5798_v46, %v9185_v44  ;;  %9187 = vst [vmem:[#allocation45_spill] sm:$0xff] %v5901_v29  ;;  %1351 = vmatprep.subr.mxu0 %v9189_v36  ;;  %v5913_v44 = vsub.f32 %v1558_v7, %v5859_v42  ;;  %v5915_v39 = vand.u32 4294901760, %v1554_v4  ;;  %v1551_v46 = vld [vmem:[#allocation8 + $0x28] sm:$0xff]  ;;  %v9193_v60 = vld [vmem:[#allocation110_spill] sm:$0xff]  ;;  %v9194_v47 = vand.u32 4294901760, %v5711_v62  ;;  %9195 = vst [vmem:[#allocation38_spill] sm:$0xff] %v5923_v1 }
 0x16f   :  { %9186 = vst [vmem:[#allocation31_spill] sm:$0xff] %v5899_v3  ;;  %v5910_v23 = vsub.f32 %v5811_v63, %v9190_v35  ;;  %1528 = vmatmul.mubr.f32.vlgmr.msra.gmra.mxu1 %v9193_v60  ;;  %v5925_v35 = vand.u32 4294901760, %v1553_v50  ;;  %v1550_v63 = vld [vmem:[#allocation8 + $0x20] sm:$0xff]  ;;  %v9197_v7 = vand.u32 4294901760, %v9006_v48  ;;  %v9198_v42 = vld [vmem:[#allocation113_spill] sm:$0xff]  ;;  %v5935_v59 = vand.u32 4294901760, %v1552_v58 }
 0x170   :  { %9191 = vst [vmem:[#allocation37_spill] sm:$0xff] %v5913_v44  ;;  %9192 = vst [vmem:[#allocation48_spill] sm:$0xff] %v5915_v39  ;;  %1776 = vmatprep.subr.mxu1 %v9194_v47  ;;  %1534 = vmatprep.mubr.f32.mxu1 %v9198_v42  ;;  %v5933_v47 = vsub.f32 %v1556_v51, %v5887_v0  ;;  %v1549_v36 = vld [vmem:[#allocation8 + $0x18] sm:$0xff]  ;;  %v9201_v28 = vand.u32 4294901760, %v5725_v24  ;;  %v9202_v61 = vand.u32 4294901760, %v9007_v45  ;;  %v5946_v62 = vand.u32 4294901760, %v1551_v46 }
 0x171   :  { %9196 = vst [vmem:[#allocation49_spill] sm:$0xff] %v5925_v35  ;;  %1355 = vmatpush2.msra.mxu0 %v9197_v7  ;;  %9200 = vst [vmem:[#allocation50_spill] sm:$0xff] %v5935_v59  ;;  %v5944_v38 = vsub.f32 %v1555_v18, %v5901_v29  ;;  %v1548_v51 = vld [vmem:[#allocation8 + $0x10] sm:$0xff]  ;;  %v9205_v0 = vand.u32 4294901760, %v5739_v5  ;;  %v1547_v18 = vld [vmem:[#allocation8 + $0x8] sm:$0xff]  ;;  %v9209_v48 = vand.u32 4294901760, %v5753_v57 }
 0x172   :  { %9199 = vst [vmem:[#allocation40_spill] sm:$0xff] %v5933_v47  ;;  %1782 = vmatpush1.msra.mxu1 %v9201_v28  ;;  %1359 = vmatprep.subr.mxu0 %v9202_v61  ;;  %9204 = vst [vmem:[#allocation51_spill] sm:$0xff] %v5946_v62  ;;  %v5955_v61 = vsub.f32 %v1554_v4, %v5915_v39  ;;  %v5957_v28 = vand.u32 4294901760, %v1550_v63  ;;  %v9210_v7 = vand.u32 4294901760, %v9008_v54  ;;  %v9211_v5 = vand.u32 4294901760, %v5871_v32  ;;  %v1546_v24 = vld [vmem:[#allocation8] sm:$0xff] }
 0x173   :  { %9203 = vst [vmem:[#allocation41_spill] sm:$0xff] %v5944_v38  ;;  %1788 = vmatprep.subr.mxu1 %v9205_v0  ;;  %1363 = vmatpush2.msra.mxu0 %v9206_v13  ;;  %v5970_v0 = vsub.f32 %v1553_v50, %v5925_v35  ;;  %v5972_v4 = vand.u32 4294901760, %v1549_v36  ;;  %v9214_v45 = vld [vmem:[#allocation114_spill] sm:$0xff]  ;;  %v9215_v57 = vand.u32 4294901760, %v5768_v22  ;;  %v9216_v54 = vand.u32 4294901760, %v5885_v17 }
 0x174   :  { %9207 = vst [vmem:[#allocation42_spill] sm:$0xff] %v5955_v61  ;;  %9208 = vst [vmem:[#allocation52_spill] sm:$0xff] %v5957_v28  ;;  %1794 = vmatpush1.msra.mxu1 %v9209_v48  ;;  %1367 = vmatprep.subr.mxu0 %v9210_v7  ;;  %v5966_v34 = vsub.f32 %v5871_v32, %v9211_v5  ;;  %v5984_v5 = vsub.f32 %v1552_v58, %v5935_v59  ;;  %v5986_v50 = vand.u32 4294901760, %v1548_v51 }
 0x175   :  { %9212 = vst [vmem:[#allocation44_spill] sm:$0xff] %v5970_v0  ;;  %9213 = vst [vmem:[#allocation55_spill] sm:$0xff] %v5972_v4  ;;  %1536 = vmatmul.mubr.f32.gmra.mxu1 %v9214_v45  ;;  %1800 = vmatprep.subr.mxu1 %v9215_v57  ;;  %v5980_v48 = vsub.f32 %v5885_v17, %v9216_v54  ;;  %v9219_v13 = vand.u32 4294901760, %v9009_v10  ;;  %v9220_v32 = vand.u32 4294901760, %v5781_v40  ;;  %v9221_v22 = vand.u32 4294901760, %v5899_v3  ;;  %v9252_v17 = vld [vmem:[#allocation119_spill] sm:$0xff] }
 0x176   :  { %9217 = vst [vmem:[#allocation46_spill] sm:$0xff] %v5984_v5  ;;  %9218 = vst [vmem:[#allocation59_spill] sm:$0xff] %v5986_v50  ;;  %v5999_v7 = vsub.f32 %v1551_v46, %v5946_v62  ;;  %v6001_v58 = vand.u32 4294901760, %v1547_v18  ;;  %2156 = vmatprep.mubr.f32.mxu1 %v5331_v19  ;;  %v9224_v10 = vand.u32 4294901760, %v9010_v11  ;;  %v9225_v40 = vand.u32 4294901760, %v5913_v44  ;;  %v1609_v11 = vld [vmem:[#allocation8 + $0x1f8] sm:$0xff] }
 0x177   :  { %1371 = vmatpush2.msra.mxu0 %v9219_v13  ;;  %1806 = vmatpush1.msra.mxu1 %v9220_v32  ;;  %v5995_v57 = vsub.f32 %v5899_v3, %v9221_v22  ;;  %v6013_v22 = vsub.f32 %v1550_v63, %v5957_v28  ;;  %v6015_v54 = vand.u32 4294901760, %v1546_v24  ;;  %v9228_v46 = vand.u32 4294901760, %v5794_v30 }
 0x178   :  { %9222 = vst [vmem:[#allocation47_spill] sm:$0xff] %v5999_v7  ;;  %9223 = vst [vmem:[#allocation61_spill] sm:$0xff] %v6001_v58  ;;  %1375 = vmatprep.subr.mxu0 %v9224_v10  ;;  %v6009_v32 = vsub.f32 %v5913_v44, %v9225_v40  ;;  %v9229_v19 = vand.u32 4294901760, %v9011_v16  ;;  %v9230_v10 = vand.u32 4294901760, %v5923_v1  ;;  %v6029_v63 = vsub.f32 %v1549_v36, %v5972_v4 }
 0x179   :  { %9226 = vst [vmem:[#allocation53_spill] sm:$0xff] %v6013_v22  ;;  %9227 = vst [vmem:[#allocation64_spill] sm:$0xff] %v6015_v54  ;;  %1812 = vmatprep.subr.mxu1 %v9228_v46  ;;  %v9232_v44 = vand.u32 4294901760, %v5807_v55  ;;  %v9235_v55 = vand.u32 4294901760, %v5820_v26  ;;  %v9236_v36 = vand.u32 4294901760, %v5944_v38  ;;  %v6055_v46 = vsub.f32 %v1547_v18, %v6001_v58 }
 0x17a   :  { %1379 = vmatpush2.msra.mxu0 %v9229_v19  ;;  %v6025_v40 = vsub.f32 %v5923_v1, %v9230_v10  ;;  %9231 = vst [vmem:[#allocation54_spill] sm:$0xff] %v6029_v63  ;;  %v9233_v19 = vand.u32 4294901760, %v5933_v47  ;;  %v6042_v10 = vsub.f32 %v1548_v51, %v5986_v50  ;;  %v1608_v51 = vld [vmem:[#allocation8 + $0x1f0] sm:$0xff]  ;;  %v6067_v13 = vsub.f32 %v1546_v24, %v6015_v54 }
 0x17b   :  { %1818 = vmatpush1.msra.mxu1 %v9232_v44  ;;  %1383 = vmatmul.mubr.f32.vlgmr.msra.gmra.mxu0 %v9193_v60  ;;  %v6051_v16 = vsub.f32 %v5944_v38, %v9236_v36  ;;  %9237 = vst [vmem:[#allocation56_spill] sm:$0xff] %v6055_v46  ;;  %v9240_v18 = vand.u32 4294901760, %v5832_v12  ;;  %v9241_v26 = vand.u32 4294901760, %v5970_v0  ;;  %v1606_v36 = vld [vmem:[#allocation8 + $0x1e0] sm:$0xff]  ;;  %v9243_v24 = vand.u32 4294901760, %v5844_v2 }
 0x17c   :  { %v6038_v30 = vsub.f32 %v5933_v47, %v9233_v19  ;;  %9234 = vst [vmem:[#allocation65_spill] sm:$0xff] %v6042_v10  ;;  %1611 = vmatprep.subr.mxu0 %v5620_v20  ;;  %1824 = vmatprep.subr.mxu1 %v9235_v55  ;;  %v9238_v55 = vand.u32 4294901760, %v5955_v61  ;;  %9239 = vst [vmem:[#allocation66_spill] sm:$0xff] %v6067_v13  ;;  %v1607_v19 = vld [vmem:[#allocation8 + $0x1e8] sm:$0xff]  ;;  %v9246_v1 = vand.u32 4294901760, %v5856_v21  ;;  %v9249_v3 = vand.u32 4294901760, %v5868_v52 }
 0x17d   :  { %1389 = vmatprep.mubr.f32.mxu0 %v9198_v42  ;;  %1613 = vmatpush1.msra.mxu0 %v5625_v43  ;;  %v6076_v47 = vsub.f32 %v5970_v0, %v9241_v26  ;;  %v6091_v0 = vand.u32 4294901760, %v1608_v51  ;;  %v1604_v26 = vld [vmem:[#allocation8 + $0x1d0] sm:$0xff]  ;;  %v9253_v52 = vand.u32 4294901760, %v6029_v63 }
 0x17e   :  { %v6063_v44 = vsub.f32 %v5955_v61, %v9238_v55  ;;  %1830 = vmatpush1.msra.mxu1 %v9240_v18  ;;  %1615 = vmatprep.subr.mxu0 %v5630_v6  ;;  %v6079_v61 = vand.u32 4294901760, %v1609_v11  ;;  %v9244_v18 = vand.u32 4294901760, %v5984_v5  ;;  %v1605_v55 = vld [vmem:[#allocation8 + $0x1d8] sm:$0xff] }
 0x17f   :  { %1836 = vmatprep.subr.mxu1 %v9243_v24  ;;  %1617 = vmatpush1.msra.mxu0 %v5635_v33  ;;  %9245 = vst [vmem:[#allocation67_spill] sm:$0xff] %v6091_v0  ;;  %v9247_v24 = vand.u32 4294901760, %v5999_v7  ;;  %v9290_v33 = vld [vmem:[#allocation32_spill] sm:$0xff] }
 0x180   :  { %9242 = vst [vmem:[#allocation57_spill] sm:$0xff] %v6079_v61  ;;  %v6088_v38 = vsub.f32 %v5984_v5, %v9244_v18  ;;  %1842 = vmatpush1.msra.mxu1 %v9246_v1  ;;  %1391 = vmatmul.mubr.f32.gmra.mxu0 %v9214_v45  ;;  %v6103_v5 = vand.u32 4294901760, %v1607_v19  ;;  %v9250_v1 = vand.u32 4294901760, %v6013_v22  ;;  %v1603_v18 = vld [vmem:[#allocation8 + $0x1c8] sm:$0xff]  ;;  %v6126_v21 = vsub.f32 %v1609_v11, %v6079_v61 }
 0x181   :  { %v6100_v12 = vsub.f32 %v5999_v7, %v9247_v24  ;;  %1619 = vmatprep.subr.mxu0 %v5643_v37  ;;  %1848 = vmatprep.subr.mxu1 %v9249_v3  ;;  %v6115_v7 = vand.u32 4294901760, %v1606_v36  ;;  %v6123_v3 = vsub.f32 %v6029_v63, %v9253_v52  ;;  %v1602_v24 = vld [vmem:[#allocation8 + $0x1c0] sm:$0xff]  ;;  %v9257_v37 = vand.u32 4294901760, %v6042_v10  ;;  %v1601_v63 = vld [vmem:[#allocation8 + $0x1b8] sm:$0xff] }
 0x182   :  { %9248 = vst [vmem:[#allocation58_spill] sm:$0xff] %v6103_v5  ;;  %v6112_v2 = vsub.f32 %v6013_v22, %v9250_v1  ;;  %1621 = vmatpush1.msra.mxu0 %v5651_v8  ;;  %1743 = vmatprep.mubr.f32.mxu0 %v9252_v17  ;;  %9254 = vst [vmem:[#allocation60_spill] sm:$0xff] %v6126_v21  ;;  %v6128_v1 = vand.u32 4294901760, %v1605_v55  ;;  %v9256_v22 = vand.u32 4294901760, %v5882_v49  ;;  %v6142_v11 = vand.u32 4294901760, %v1604_v26 }
 0x183   :  { %9251 = vst [vmem:[#allocation68_spill] sm:$0xff] %v6115_v7  ;;  %1623 = vmatprep.subr.mxu0 %v5659_v15  ;;  %v6137_v8 = vsub.f32 %v6042_v10, %v9257_v37  ;;  %v6140_v52 = vsub.f32 %v1608_v51, %v6091_v0  ;;  %v9260_v45 = vand.u32 4294901760, %v5896_v56  ;;  %v6154_v37 = vsub.f32 %v1607_v19, %v6103_v5  ;;  %v1600_v10 = vld [vmem:[#allocation8 + $0x1b0] sm:$0xff] }
 0x184   :  { %9255 = vst [vmem:[#allocation69_spill] sm:$0xff] %v6128_v1  ;;  %1854 = vmatpush1.msra.mxu1 %v9256_v22  ;;  %9259 = vst [vmem:[#allocation73_spill] sm:$0xff] %v6142_v11  ;;  %1625 = vmatpush1.msra.mxu0 %v5667_v31  ;;  %v9261_v22 = vand.u32 4294901760, %v6055_v46  ;;  %v6156_v51 = vand.u32 4294901760, %v1603_v18  ;;  %v9264_v15 = vand.u32 4294901760, %v5910_v23  ;;  %v6170_v19 = vand.u32 4294901760, %v1602_v24 }
 0x185   :  { %9258 = vst [vmem:[#allocation62_spill] sm:$0xff] %v6140_v52  ;;  %1860 = vmatprep.subr.mxu1 %v9260_v45  ;;  %9262 = vst [vmem:[#allocation63_spill] sm:$0xff] %v6154_v37  ;;  %1627 = vmatprep.subr.mxu0 %v5676_v27  ;;  %v9265_v45 = vand.u32 4294901760, %v6067_v13  ;;  %v9268_v31 = vand.u32 4294901760, %v5966_v34  ;;  %v6178_v56 = vsub.f32 %v1605_v55, %v6128_v1  ;;  %v1597_v23 = vld [vmem:[#allocation8 + $0x198] sm:$0xff]  ;;  %v9274_v55 = vand.u32 4294901760, %v5995_v57 }
 0x186   :  { %v6151_v17 = vsub.f32 %v6055_v46, %v9261_v22  ;;  %9263 = vst [vmem:[#allocation77_spill] sm:$0xff] %v6156_v51  ;;  %1866 = vmatpush1.msra.mxu1 %v9264_v15  ;;  %v6168_v22 = vsub.f32 %v1606_v36, %v6115_v7  ;;  %9267 = vst [vmem:[#allocation80_spill] sm:$0xff] %v6170_v19  ;;  %v1599_v46 = vld [vmem:[#allocation8 + $0x1a8] sm:$0xff]  ;;  %1629 = vmatpush1.msra.mxu0 %v5685_v14  ;;  %v9271_v36 = vand.u32 4294901760, %v5980_v48 }
 0x187   :  { %v6165_v49 = vsub.f32 %v6067_v13, %v9265_v45  ;;  %1872 = vmatprep.subr.mxu1 %v9268_v31  ;;  %9269 = vst [vmem:[#allocation71_spill] sm:$0xff] %v6178_v56  ;;  %v6180_v45 = vand.u32 4294901760, %v1601_v63  ;;  %v1598_v13 = vld [vmem:[#allocation8 + $0x1a0] sm:$0xff]  ;;  %1631 = vmatprep.subr.mxu0 %v5694_v25  ;;  %v6188_v14 = vsub.f32 %v1604_v26, %v6142_v11  ;;  %v6190_v15 = vand.u32 4294901760, %v1600_v10  ;;  %v1596_v31 = vld [vmem:[#allocation8 + $0x190] sm:$0xff] }
 0x188   :  { %9266 = vst [vmem:[#allocation70_spill] sm:$0xff] %v6168_v22  ;;  %1878 = vmatpush1.msra.mxu1 %v9271_v36  ;;  %1633 = vmatpush1.msra.mxu0 %v5703_v53  ;;  %v6198_v25 = vsub.f32 %v1603_v18, %v6156_v51  ;;  %v6200_v34 = vand.u32 4294901760, %v1599_v46  ;;  %v9277_v26 = vand.u32 4294901760, %v6009_v32  ;;  %v6208_v53 = vsub.f32 %v1602_v24, %v6170_v19  ;;  %v1595_v36 = vld [vmem:[#allocation8 + $0x188] sm:$0xff] }
 0x189   :  { %9270 = vst [vmem:[#allocation81_spill] sm:$0xff] %v6180_v45  ;;  %9272 = vst [vmem:[#allocation82_spill] sm:$0xff] %v6188_v14  ;;  %1884 = vmatprep.subr.mxu1 %v9274_v55  ;;  %1635 = vmatprep.subr.mxu0 %v5717_v41  ;;  %v6210_v48 = vand.u32 4294901760, %v1598_v13  ;;  %v9280_v18 = vand.u32 4294901760, %v6025_v40  ;;  %v9281_v32 = vand.u32 4294901760, %v6126_v21  ;;  %v6222_v55 = vsub.f32 %v1601_v63, %v6180_v45  ;;  %v1594_v41 = vld [vmem:[#allocation8 + $0x180] sm:$0xff] }
 0x18a   :  { %9273 = vst [vmem:[#allocation74_spill] sm:$0xff] %v6190_v15  ;;  %9275 = vst [vmem:[#allocation83_spill] sm:$0xff] %v6198_v25  ;;  %1890 = vmatpush1.msra.mxu1 %v9277_v26  ;;  %1637 = vmatpush1.msra.mxu0 %v5731_v9  ;;  %v6224_v24 = vand.u32 4294901760, %v1597_v23  ;;  %v9284_v27 = vand.u32 4294901760, %v6038_v30  ;;  %v9285_v40 = vld [vmem:[#allocation29_spill] sm:$0xff]  ;;  %v6236_v57 = vsub.f32 %v1600_v10, %v6190_v15  ;;  %v6238_v63 = vand.u32 4294901760, %v1596_v31 }
 0x18b   :  { %9276 = vst [vmem:[#allocation84_spill] sm:$0xff] %v6200_v34  ;;  %9278 = vst [vmem:[#allocation85_spill] sm:$0xff] %v6208_v53  ;;  %1896 = vmatprep.subr.mxu1 %v9280_v18  ;;  %v6218_v26 = vsub.f32 %v6126_v21, %v9281_v32  ;;  %1639 = vmatprep.subr.mxu0 %v9285_v40  ;;  %v9286_v18 = vand.u32 4294901760, %v6140_v52  ;;  %v9289_v21 = vand.u32 4294901760, %v6051_v16  ;;  %v6252_v32 = vand.u32 4294901760, %v1595_v36  ;;  %v9295_v40 = vld [vmem:[#allocation25_spill] sm:$0xff] }
 0x18c   :  { %9279 = vst [vmem:[#allocation89_spill] sm:$0xff] %v6210_v48  ;;  %9282 = vst [vmem:[#allocation79_spill] sm:$0xff] %v6222_v55  ;;  %1902 = vmatpush1.msra.mxu1 %v9284_v27  ;;  %1641 = vmatpush1.msra.mxu0 %v9290_v33  ;;  %v9291_v27 = vand.u32 4294901760, %v6154_v37  ;;  %v9294_v10 = vand.u32 4294901760, %v6063_v44  ;;  %v9296_v16 = vand.u32 4294901760, %v6168_v22  ;;  %v9300_v33 = vld [vmem:[#allocation35_spill] sm:$0xff] }
 0x18d   :  { %9283 = vst [vmem:[#allocation93_spill] sm:$0xff] %v6224_v24  ;;  %v6232_v9 = vsub.f32 %v6140_v52, %v9286_v18  ;;  %9287 = vst [vmem:[#allocation96_spill] sm:$0xff] %v6236_v57  ;;  %1908 = vmatprep.subr.mxu1 %v9289_v21  ;;  %v6250_v52 = vsub.f32 %v1599_v46, %v6200_v34  ;;  %1643 = vmatprep.subr.mxu0 %v9295_v40  ;;  %v6266_v18 = vand.u32 4294901760, %v1594_v41 }
 0x18e   :  { %9288 = vst [vmem:[#allocation97_spill] sm:$0xff] %v6238_v63  ;;  %v6246_v30 = vsub.f32 %v6154_v37, %v9291_v27  ;;  %9293 = vst [vmem:[#allocation91_spill] sm:$0xff] %v6252_v32  ;;  %1914 = vmatpush1.msra.mxu1 %v9294_v10  ;;  %v6260_v21 = vsub.f32 %v6168_v22, %v9296_v16  ;;  %v6264_v37 = vsub.f32 %v1598_v13, %v6210_v48  ;;  %v9304_v22 = vld [vmem:[#allocation26_spill] sm:$0xff]  ;;  %v1593_v16 = vld [vmem:[#allocation8 + $0x178] sm:$0xff] }
 0x18f   :  { %9292 = vst [vmem:[#allocation98_spill] sm:$0xff] %v6250_v52  ;;  %9298 = vst [vmem:[#allocation106_spill] sm:$0xff] %v6266_v18  ;;  %v9299_v46 = vand.u32 4294901760, %v6076_v47  ;;  %1645 = vmatpush1.msra.mxu0 %v9300_v33  ;;  %v1967_v44 = vand.u32 4294901760, %v6218_v26  ;;  %v9301_v10 = vand.u32 4294901760, %v6178_v56  ;;  %v6279_v27 = vsub.f32 %v1597_v23, %v6224_v24 }
 0x190   :  { %9297 = vst [vmem:[#allocation100_spill] sm:$0xff] %v6264_v37  ;;  %v9303_v13 = vand.u32 4294901760, %v6088_v38  ;;  %1647 = vmatprep.subr.mxu0 %v9304_v22  ;;  %v1973_v47 = vand.u32 4294901760, %v6232_v9  ;;  %v9307_v23 = vand.u32 4294901760, %v6100_v12  ;;  %v9308_v38 = vld [vmem:[#allocation36_spill] sm:$0xff]  ;;  %v9309_v9 = vand.u32 4294901760, %v6198_v25 }
 0x191   :  { %1920 = vmatprep.subr.mxu1 %v9299_v46  ;;  %v6275_v40 = vsub.f32 %v6178_v56, %v9301_v10  ;;  %9302 = vst [vmem:[#allocation125_spill] sm:$0xff] %v6279_v27  ;;  %v9305_v46 = vand.u32 4294901760, %v6188_v14  ;;  %v6292_v56 = vsub.f32 %v1596_v31, %v6238_v63  ;;  %1649 = vmatpush1.msra.mxu0 %v9308_v38  ;;  %v1592_v31 = vld [vmem:[#allocation8 + $0x170] sm:$0xff]  ;;  %v9312_v12 = vld [vmem:[#allocation39_spill] sm:$0xff] }
 0x192   :  { %1926 = vmatpush1.msra.mxu1 %v9303_v13  ;;  %v1979_v13 = vand.u32 4294901760, %v6246_v30  ;;  %v6301_v22 = vsub.f32 %v6198_v25, %v9309_v9  ;;  %v6305_v10 = vsub.f32 %v1595_v36, %v6252_v32  ;;  %1651 = vmatprep.subr.mxu0 %v9312_v12  ;;  %v9313_v30 = vand.u32 4294901760, %v6208_v53  ;;  %v1591_v36 = vld [vmem:[#allocation8 + $0x168] sm:$0xff]  ;;  %v1590_v9 = vld [vmem:[#allocation8 + $0x160] sm:$0xff] }
 0x193   :  { %v6288_v26 = vsub.f32 %v6188_v14, %v9305_v46  ;;  %9306 = vst [vmem:[#allocation126_spill] sm:$0xff] %v6292_v56  ;;  %1932 = vmatprep.subr.mxu1 %v9307_v23  ;;  %v9311_v14 = vand.u32 4294901760, %v6112_v2  ;;  %v1985_v23 = vand.u32 4294901760, %v6260_v21  ;;  %v6318_v46 = vsub.f32 %v1594_v41, %v6266_v18  ;;  %v9316_v2 = vld [vmem:[#allocation43_spill] sm:$0xff] }
 0x194   :  { %9310 = vst [vmem:[#allocation127_spill] sm:$0xff] %v6305_v10  ;;  %v6314_v38 = vsub.f32 %v6208_v53, %v9313_v30  ;;  %v9315_v25 = vand.u32 4294901760, %v6123_v3  ;;  %1653 = vmatpush1.msra.mxu0 %v9316_v2  ;;  %v9317_v21 = vand.u32 4294901760, %v6222_v55  ;;  %v6330_v53 = vand.u32 4294901760, %v1593_v16  ;;  %v1589_v30 = vld [vmem:[#allocation8 + $0x158] sm:$0xff] }
 0x195   :  { %1938 = vmatpush1.msra.mxu1 %v9311_v14  ;;  %9314 = vst [vmem:[#allocation128_spill] sm:$0xff] %v6318_v46  ;;  %v1991_v14 = vand.u32 4294901760, %v6275_v40  ;;  %v9319_v41 = vand.u32 4294901760, %v6137_v8  ;;  %1655 = vmatprep.subr.mxu0 %v5901_v29  ;;  %v9320_v3 = vand.u32 4294901760, %v6236_v57  ;;  %v9322_v2 = vand.u32 4294901760, %v6151_v17 }
 0x196   :  { %1944 = vmatprep.subr.mxu1 %v9315_v25  ;;  %v6327_v12 = vsub.f32 %v6222_v55, %v9317_v21  ;;  %9318 = vst [vmem:[#allocation129_spill] sm:$0xff] %v6330_v53  ;;  %v1997_v25 = vand.u32 4294901760, %v6288_v26  ;;  %v6342_v55 = vand.u32 4294901760, %v1592_v31  ;;  %1657 = vmatpush1.msra.mxu0 %v5915_v39  ;;  %v2003_v8 = vand.u32 4294901760, %v6301_v22  ;;  %v1588_v21 = vld [vmem:[#allocation8 + $0x150] sm:$0xff] }
 0x197   :  { %1950 = vmatpush1.msra.mxu1 %v9319_v41  ;;  %v6339_v40 = vsub.f32 %v6236_v57, %v9320_v3  ;;  %v9323_v41 = vand.u32 4294901760, %v6250_v52  ;;  %v6354_v57 = vand.u32 4294901760, %v1591_v36  ;;  %v9325_v29 = vand.u32 4294901760, %v6165_v49  ;;  %1659 = vmatprep.subr.mxu0 %v5925_v35  ;;  %v1587_v3 = vld [vmem:[#allocation8 + $0x148] sm:$0xff] }
 0x198   :  { %9321 = vst [vmem:[#allocation130_spill] sm:$0xff] %v6342_v55  ;;  %1956 = vmatprep.subr.mxu1 %v9322_v2  ;;  %v2009_v17 = vand.u32 4294901760, %v6314_v38  ;;  %v9326_v2 = vand.u32 4294901760, %v6264_v37  ;;  %1661 = vmatpush1.msra.mxu0 %v5935_v59  ;;  %v2015_v49 = vand.u32 4294901760, %v6327_v12  ;;  %v6376_v38 = vsub.f32 %v1593_v16, %v6330_v53  ;;  %v1585_v16 = vld [vmem:[#allocation8 + $0x138] sm:$0xff] }
 0x199   :  { %v6351_v26 = vsub.f32 %v6250_v52, %v9323_v41  ;;  %9324 = vst [vmem:[#allocation131_spill] sm:$0xff] %v6354_v57  ;;  %1962 = vmatpush1.msra.mxu1 %v9325_v29  ;;  %v6366_v52 = vand.u32 4294901760, %v1590_v9  ;;  %v9328_v29 = vand.u32 4294901760, %v6279_v27  ;;  %1663 = vmatprep.subr.mxu0 %v5946_v62  ;;  %v9331_v41 = vand.u32 4294901760, %v6292_v56 }
 0x19a   :  { %v6363_v22 = vsub.f32 %v6264_v37, %v9326_v2  ;;  %1968 = vmatprep.subr.mxu1 %v1967_v44  ;;  %9329 = vst [vmem:[#allocation133_spill] sm:$0xff] %v6376_v38  ;;  %v6378_v2 = vand.u32 4294901760, %v1589_v30  ;;  %v1586_v37 = vld [vmem:[#allocation8 + $0x140] sm:$0xff]  ;;  %v2021_v44 = vand.u32 4294901760, %v6339_v40  ;;  %v6388_v59 = vsub.f32 %v1592_v31, %v6342_v55  ;;  %1665 = vmatpush1.msra.mxu0 %v5957_v28  ;;  %v1584_v31 = vld [vmem:[#allocation8 + $0x130] sm:$0xff] }
 0x19b   :  { %9327 = vst [vmem:[#allocation132_spill] sm:$0xff] %v6366_v52  ;;  %v6373_v35 = vsub.f32 %v6279_v27, %v9328_v29  ;;  %1974 = vmatpush2.msra.mxu1 %v1973_v47  ;;  %v6385_v12 = vsub.f32 %v6292_v56, %v9331_v41  ;;  %v6390_v29 = vand.u32 4294901760, %v1588_v21  ;;  %v2027_v47 = vand.u32 4294901760, %v6351_v26  ;;  %1667 = vmatprep.subr.mxu0 %v5972_v4 }
 0x19c   :  { %9330 = vst [vmem:[#allocation134_spill] sm:$0xff] %v6378_v2  ;;  %9332 = vst [vmem:[#allocation135_spill] sm:$0xff] %v6388_v59  ;;  %1980 = vmatprep.subr.mxu1 %v1979_v13  ;;  %v9333_v27 = vand.u32 4294901760, %v6305_v10  ;;  %v6400_v62 = vsub.f32 %v1591_v36, %v6354_v57  ;;  %v6402_v41 = vand.u32 4294901760, %v1587_v3  ;;  %v2033_v13 = vand.u32 4294901760, %v6363_v22  ;;  %v1583_v36 = vld [vmem:[#allocation8 + $0x128] sm:$0xff]  ;;  %1669 = vmatpush1.msra.mxu0 %v5986_v50 }
 0x19d   :  { %1986 = vmatpush2.msra.mxu1 %v1985_v23  ;;  %v9335_v56 = vand.u32 4294901760, %v6318_v46  ;;  %v6412_v28 = vsub.f32 %v1590_v9, %v6366_v52  ;;  %v2039_v23 = vand.u32 4294901760, %v6373_v35  ;;  %v6420_v22 = vsub.f32 %v1589_v30, %v6378_v2  ;;  %1671 = vmatprep.subr.mxu0 %v6001_v58  ;;  %v1581_v35 = vld [vmem:[#allocation8 + $0x118] sm:$0xff] }
 0x19e   :  { %v6397_v40 = vsub.f32 %v6305_v10, %v9333_v27  ;;  %9334 = vst [vmem:[#allocation136_spill] sm:$0xff] %v6400_v62  ;;  %v6414_v27 = vand.u32 4294901760, %v1586_v37  ;;  %1992 = vmatprep.subr.mxu1 %v1991_v14  ;;  %v6422_v4 = vand.u32 4294901760, %v1585_v16  ;;  %v2045_v9 = vand.u32 4294901760, %v6385_v12  ;;  %1673 = vmatpush1.msra.mxu0 %v6015_v54  ;;  %v1580_v12 = vld [vmem:[#allocation8 + $0x110] sm:$0xff] }
 0x19f   :  { %v6409_v26 = vsub.f32 %v6318_v46, %v9335_v56  ;;  %9336 = vst [vmem:[#allocation137_spill] sm:$0xff] %v6412_v28  ;;  %v1582_v56 = vld [vmem:[#allocation8 + $0x120] sm:$0xff]  ;;  %1998 = vmatpush2.msra.mxu1 %v1997_v25  ;;  %v6428_v14 = vsub.f32 %v1588_v21, %v6390_v29  ;;  %v6430_v50 = vand.u32 4294901760, %v1584_v31  ;;  %v6436_v25 = vsub.f32 %v1587_v3, %v6402_v41 }
 0x1a0   :  { %2004 = vmatprep.subr.mxu1 %v2003_v8  ;;  %v2051_v30 = vand.u32 4294901760, %v6397_v40  ;;  %v6438_v58 = vand.u32 4294901760, %v1583_v36  ;;  %1675 = vmatprep.subr.mxu0 %v6079_v61  ;;  %v6444_v8 = vsub.f32 %v1586_v37, %v6414_v27  ;;  %v6446_v54 = vand.u32 4294901760, %v1582_v56  ;;  %v1579_v40 = vld [vmem:[#allocation8 + $0x108] sm:$0xff]  ;;  %v1578_v46 = vld [vmem:[#allocation8 + $0x100] sm:$0xff] }
 0x1a1   :  { %2010 = vmatpush2.msra.mxu1 %v2009_v17  ;;  %v2057_v21 = vand.u32 4294901760, %v6409_v26  ;;  %1677 = vmatpush2.msra.mxu0 %v6091_v0  ;;  %v9337_v3 = vand.u32 4294901760, %v6376_v38  ;;  %v6454_v61 = vsub.f32 %v1585_v16, %v6422_v4  ;;  %v6456_v26 = vand.u32 4294901760, %v1581_v35 }
 0x1a2   :  { %2016 = vmatprep.subr.mxu1 %v2015_v49  ;;  %1679 = vmatprep.subr.mxu0 %v6103_v5  ;;  %v9340_v37 = vand.u32 4294901760, %v6388_v59  ;;  %v6464_v39 = vsub.f32 %v1584_v31, %v6430_v50  ;;  %v9342_v16 = vand.u32 4294901760, %v6400_v62  ;;  %v9344_v31 = vand.u32 4294901760, %v6412_v28 }
 0x1a3   :  { %v2062_v10 = vsub.f32 %v6376_v38, %v9337_v3  ;;  %9338 = vst [vmem:[#allocation138_spill] sm:$0xff] %v6454_v61  ;;  %9339 = vst [vmem:[#allocation139_spill] sm:$0xff] %v6456_v26  ;;  %2022 = vmatpush2.msra.mxu1 %v2021_v44  ;;  %v6466_v3 = vand.u32 4294901760, %v1580_v12  ;;  %1681 = vmatpush2.msra.mxu0 %v6115_v7  ;;  %v6474_v38 = vsub.f32 %v1583_v36, %v6438_v58 }
 0x1a4   :  { %v2068_v49 = vsub.f32 %v6388_v59, %v9340_v37  ;;  %9341 = vst [vmem:[#allocation140_spill] sm:$0xff] %v6464_v39  ;;  %2028 = vmatprep.subr.mxu1 %v2027_v47  ;;  %v2074_v44 = vsub.f32 %v6400_v62, %v9342_v16  ;;  %v6476_v37 = vand.u32 4294901760, %v1579_v40  ;;  %1683 = vmatprep.subr.mxu0 %v6128_v1  ;;  %v6486_v16 = vand.u32 4294901760, %v1578_v46 }
 0x1a5   :  { %9343 = vst [vmem:[#allocation141_spill] sm:$0xff] %v6474_v38  ;;  %2034 = vmatpush2.msra.mxu1 %v2033_v13  ;;  %v2080_v47 = vsub.f32 %v6412_v28, %v9344_v31  ;;  %v6484_v59 = vsub.f32 %v1582_v56, %v6446_v54  ;;  %1685 = vmatpush2.msra.mxu0 %v6142_v11  ;;  %v2063_v36 = vand.u32 4294901760, %v2062_v10  ;;  %v9346_v17 = vand.u32 4294901760, %v6420_v22 }
 0x1a6   :  { %2040 = vmatprep.subr.mxu1 %v2039_v23  ;;  %v6494_v1 = vsub.f32 %v1581_v35, %v6456_v26  ;;  %1687 = vmatprep.subr.mxu0 %v6156_v51  ;;  %v2069_v56 = vand.u32 4294901760, %v2068_v49  ;;  %v9348_v31 = vand.u32 4294901760, %v6428_v14  ;;  %v6502_v10 = vsub.f32 %v1580_v12, %v6466_v3 }
 0x1a7   :  { %9345 = vst [vmem:[#allocation142_spill] sm:$0xff] %v6484_v59  ;;  %v2086_v13 = vsub.f32 %v6420_v22, %v9346_v17  ;;  %2046 = vmatpush2.msra.mxu1 %v2045_v9  ;;  %1689 = vmatpush2.msra.mxu0 %v6170_v19  ;;  %v2075_v17 = vand.u32 4294901760, %v2074_v44  ;;  %v9350_v35 = vand.u32 4294901760, %v6436_v25  ;;  %v6510_v49 = vsub.f32 %v1579_v40, %v6476_v37 }
 0x1a8   :  { %9347 = vst [vmem:[#allocation143_spill] sm:$0xff] %v6494_v1  ;;  %v2092_v23 = vsub.f32 %v6428_v14, %v9348_v31  ;;  %9349 = vst [vmem:[#allocation144_spill] sm:$0xff] %v6502_v10  ;;  %2052 = vmatprep.subr.mxu1 %v2051_v30  ;;  %1691 = vmatprep.subr.mxu0 %v6180_v45  ;;  %v2081_v31 = vand.u32 4294901760, %v2080_v47  ;;  %v9352_v12 = vand.u32 4294901760, %v6444_v8  ;;  %v9354_v40 = vand.u32 4294901760, %v6454_v61 }
 0x1a9   :  { %v2098_v9 = vsub.f32 %v6436_v25, %v9350_v35  ;;  %9351 = vst [vmem:[#allocation145_spill] sm:$0xff] %v6510_v49  ;;  %2058 = vmatpush2.msra.mxu1 %v2057_v21  ;;  %v6518_v44 = vsub.f32 %v1578_v46, %v6486_v16  ;;  %1693 = vmatpush2.msra.mxu0 %v6190_v15  ;;  %v2087_v35 = vand.u32 4294901760, %v2086_v13  ;;  %v9356_v13 = vand.u32 4294901760, %v6474_v38 }
 0x1aa   :  { %v2104_v30 = vsub.f32 %v6444_v8, %v9352_v12  ;;  %2064 = vmatprep.subr.mxu1 %v2063_v36  ;;  %v2110_v21 = vsub.f32 %v6454_v61, %v9354_v40  ;;  %1695 = vmatprep.subr.mxu0 %v6200_v34  ;;  %v2093_v47 = vand.u32 4294901760, %v2092_v23  ;;  %v9355_v12 = vand.u32 4294901760, %v6464_v39 }
 0x1ab   :  { %9353 = vst [vmem:[#allocation146_spill] sm:$0xff] %v6518_v44  ;;  %2070 = vmatpush2.msra.mxu1 %v2069_v56  ;;  %1697 = vmatpush2.msra.mxu0 %v6210_v48  ;;  %v2099_v36 = vand.u32 4294901760, %v2098_v9  ;;  %v2122_v40 = vsub.f32 %v6474_v38, %v9356_v13  ;;  %v9357_v23 = vand.u32 4294901760, %v6484_v59  ;;  %v8572_v46 = vand.u32 4294901760, %v6518_v44 }
 0x1ac   :  { %v2116_v0 = vsub.f32 %v6464_v39, %v9355_v12  ;;  %2076 = vmatprep.subr.mxu1 %v2075_v17  ;;  %1699 = vmatprep.subr.mxu0 %v6224_v24  ;;  %v2105_v56 = vand.u32 4294901760, %v2104_v30  ;;  %v2111_v17 = vand.u32 4294901760, %v2110_v21  ;;  %v9358_v9 = vand.u32 4294901760, %v6494_v1 }
 0x1ad   :  { %2082 = vmatpush2.msra.mxu1 %v2081_v31  ;;  %v2128_v12 = vsub.f32 %v6484_v59, %v9357_v23  ;;  %1701 = vmatpush2.msra.mxu0 %v6238_v63  ;;  %v9359_v30 = vand.u32 4294901760, %v6502_v10  ;;  %v2123_v23 = vand.u32 4294901760, %v2122_v40 }
 0x1ae   :  { %2088 = vmatprep.subr.mxu1 %v2087_v35  ;;  %v2134_v13 = vsub.f32 %v6494_v1, %v9358_v9  ;;  %1703 = vmatprep.subr.mxu0 %v6252_v32  ;;  %v2117_v31 = vand.u32 4294901760, %v2116_v0  ;;  %v9360_v35 = vand.u32 4294901760, %v6510_v49  ;;  %v2152_v0 = vsub.f32 %v6518_v44, %v8572_v46  ;;  %v9376_v46 = vld [vmem:[#allocation87_spill] sm:$0xff] }
 0x1af   :  { %2094 = vmatpush2.msra.mxu1 %v2093_v47  ;;  %v2140_v62 = vsub.f32 %v6502_v10, %v9359_v30  ;;  %1705 = vmatpush2.msra.mxu0 %v6266_v18  ;;  %v2129_v9 = vand.u32 4294901760, %v2128_v12  ;;  %v9362_v12 = vld [vmem:[#allocation114_spill] sm:$0xff] }
 0x1b0   :  { %2100 = vmatprep.subr.mxu1 %v2099_v36  ;;  %v2146_v21 = vsub.f32 %v6510_v49, %v9360_v35  ;;  %1707 = vmatprep.subr.mxu0 %v6330_v53  ;;  %v2135_v47 = vand.u32 4294901760, %v2134_v13  ;;  %v9364_v13 = vld [vmem:[#allocation76_spill] sm:$0xff]  ;;  %v9366_v30 = vld [vmem:[#allocation86_spill] sm:$0xff] }
 0x1b1   :  { %2106 = vmatpush2.msra.mxu1 %v2105_v56  ;;  %1709 = vmatpush2.msra.mxu0 %v6342_v55  ;;  %v2141_v36 = vand.u32 4294901760, %v2140_v62  ;;  %v2153_v56 = vand.u32 4294901760, %v2152_v0  ;;  %v9361_v62 = vld [vmem:[#allocation27_spill] sm:$0xff]  ;;  %v9368_v35 = vld [vmem:[#allocation120_spill] sm:$0xff] }
 0x1b2   :  { %2112 = vmatprep.subr.mxu1 %v2111_v17  ;;  %1711 = vmatprep.subr.mxu0 %v6354_v57  ;;  %v2147_v40 = vand.u32 4294901760, %v2146_v21  ;;  %v9363_v17 = vld [vmem:[#allocation72_spill] sm:$0xff]  ;;  %v9369_v21 = vld [vmem:[#allocation21_spill] sm:$0xff]  ;;  %v9371_v0 = vld [vmem:[#allocation123_spill] sm:$0xff] }
 0x1b3   :  { %2118 = vmatpush2.msra.mxu1 %v2117_v31  ;;  %1713 = vmatpush2.msra.mxu0 %v6366_v52  ;;  %v9365_v31 = vld [vmem:[#allocation115_spill] sm:$0xff] }
 0x1b4   :  { %2124 = vmatprep.subr.mxu1 %v2123_v23  ;;  %1715 = vmatprep.subr.mxu0 %v6378_v2  ;;  %v9367_v23 = vld [vmem:[#allocation88_spill] sm:$0xff] }
 0x1b5   :  { %2130 = vmatpush2.msra.mxu1 %v2129_v9  ;;  %1717 = vmatpush2.msra.mxu0 %v6390_v29  ;;  %v9370_v9 = vld [vmem:[#allocation99_spill] sm:$0xff] }
 0x1b6   :  { %2136 = vmatprep.subr.mxu1 %v2135_v47  ;;  %1719 = vmatprep.subr.mxu0 %v6402_v41  ;;  %v9372_v47 = vld [vmem:[#allocation75_spill] sm:$0xff] }
 0x1b7   :  { %2142 = vmatpush2.msra.mxu1 %v2141_v36  ;;  %1721 = vmatpush2.msra.mxu0 %v6414_v27  ;;  %v9373_v36 = vld [vmem:[#allocation94_spill] sm:$0xff] }
 0x1b8   :  { %2148 = vmatprep.subr.mxu1 %v2147_v40  ;;  %1723 = vmatprep.subr.mxu0 %v6422_v4  ;;  %v9374_v40 = vld [vmem:[#allocation78_spill] sm:$0xff] }
 0x1b9   :  { %2154 = vmatpush2.msra.mxu1 %v2153_v56  ;;  %1725 = vmatpush2.msra.mxu0 %v6430_v50  ;;  %v9375_v56 = vld [vmem:[#allocation101_spill] sm:$0xff] }
 0x1ba   :  { %2158 = vmatmul.mubr.f32.vlgmr.msra.gmra.mxu1 %v9193_v60  ;;  %2386 = vmatprep.subr.mxu1 %v5620_v20  ;;  %v9381_v60 = vld [vmem:[#allocation92_spill] sm:$0xff] }
 0x1bb   :  { %2164 = vmatprep.mubr.f32.mxu1 %v9198_v42  ;;  %2388 = vmatpush1.msra.mxu1 %v5625_v43  ;;  %v9380_v42 = vld [vmem:[#allocation105_spill] sm:$0xff] }
 0x1bc   :  { %1727 = vmatprep.subr.mxu0 %v6438_v58  ;;  %2390 = vmatprep.subr.mxu1 %v5630_v6 }
 0x1bd   :  { %1729 = vmatpush2.msra.mxu0 %v6446_v54  ;;  %2392 = vmatpush1.msra.mxu1 %v9361_v62 }
 0x1be   :  { %1731 = vmatprep.subr.mxu0 %v6456_v26  ;;  %2166 = vmatmul.mubr.f32.gmra.mxu1 %v9362_v12  ;;  %v9378_v12 = vld [vmem:[#allocation124_spill] sm:$0xff] }
 0x1bf   :  { %2394 = vmatprep.subr.mxu1 %v9363_v17  ;;  %1733 = vmatpush2.msra.mxu0 %v6466_v3 }
 0x1c0   :  { %2396 = vmatpush1.msra.mxu1 %v9364_v13  ;;  %2516 = vmatprep.mubr.f32.mxu1 %v9365_v31  ;;  %v9377_v31 = vld [vmem:[#allocation103_spill] sm:$0xff] }
 0x1c1   :  { %1735 = vmatprep.subr.mxu0 %v6476_v37  ;;  %2398 = vmatprep.subr.mxu1 %v9366_v30 }
 0x1c2   :  { %1737 = vmatpush2.msra.mxu0 %v6486_v16  ;;  %2400 = vmatpush1.msra.mxu1 %v9367_v23 }
 0x1c3   :  { %1749 = vmatmul.mubr.f32.vlgmr.msra.gmra.mxu0 %v9368_v35  ;;  %2174 = vmatprep.subr.mxu0 %v9369_v21  ;;  %v9379_v35 = vld [vmem:[#allocation90_spill] sm:$0xff] }
 0x1c4   :  { %2402 = vmatprep.subr.mxu1 %v9370_v9  ;;  %1759 = vmatprep.mubr.f32.mxu0 %v9371_v0  ;;  %v9382_v0 = vld [vmem:[#allocation111_spill] sm:$0xff] }
 0x1c5   :  { %2177 = vmatpush1.msra.mxu0 %v9372_v47  ;;  %2404 = vmatpush1.msra.mxu1 %v9373_v36  ;;  %v9383_v47 = vld [vmem:[#allocation108_spill] sm:$0xff]  ;;  %v9384_v36 = vld [vmem:[#allocation95_spill] sm:$0xff] }
 0x1c6   :  { %2180 = vmatprep.subr.mxu0 %v9374_v40  ;;  %2406 = vmatprep.subr.mxu1 %v9375_v56  ;;  %v9385_v40 = vld [vmem:[#allocation29_spill] sm:$0xff]  ;;  %v9386_v56 = vld [vmem:[#allocation102_spill] sm:$0xff] }
 0x1c7   :  { %2183 = vmatpush1.msra.mxu0 %v9376_v46  ;;  %2408 = vmatpush1.msra.mxu1 %v9377_v31  ;;  %v9387_v46 = vld [vmem:[#allocation32_spill] sm:$0xff] }
 0x1c8   :  { %1765 = vmatmul.mubr.f32.gmra.mxu0 %v9378_v12  ;;  %2186 = vmatprep.subr.mxu0 %v9379_v35  ;;  %v9388_v31 = vld [vmem:[#allocation104_spill] sm:$0xff]  ;;  %v9389_v12 = vld [vmem:[#allocation25_spill] sm:$0xff]  ;;  %v9390_v35 = vld [vmem:[#allocation107_spill] sm:$0xff] }
 0x1c9   :  { %2410 = vmatprep.subr.mxu1 %v9380_v42  ;;  %2189 = vmatpush1.msra.mxu0 %v9381_v60  ;;  %v9391_v60 = vld [vmem:[#allocation20_spill] sm:$0xff] }
 0x1ca   :  { %2366 = vmatprep.mubr.f32.mxu0 %v9382_v0  ;;  %2412 = vmatpush1.msra.mxu1 %v9383_v47  ;;  %v9392_v0 = vld [vmem:[#allocation26_spill] sm:$0xff] }
 0x1cb   :  { %2192 = vmatprep.subr.mxu0 %v9384_v36  ;;  %2414 = vmatprep.subr.mxu1 %v9385_v40  ;;  %v9393_v47 = vld [vmem:[#allocation22_spill] sm:$0xff]  ;;  %v9394_v36 = vld [vmem:[#allocation36_spill] sm:$0xff]  ;;  %v9395_v40 = vld [vmem:[#allocation23_spill] sm:$0xff] }
 0x1cc   :  { %2195 = vmatpush1.msra.mxu0 %v9386_v56  ;;  %2416 = vmatpush1.msra.mxu1 %v9387_v46  ;;  %v9396_v56 = vld [vmem:[#allocation39_spill] sm:$0xff]  ;;  %v9397_v46 = vld [vmem:[#allocation33_spill] sm:$0xff] }
 0x1cd   :  { %2198 = vmatprep.subr.mxu0 %v9388_v31  ;;  %2418 = vmatprep.subr.mxu1 %v9389_v12  ;;  %v9398_v31 = vld [vmem:[#allocation43_spill] sm:$0xff]  ;;  %v9399_v12 = vld [vmem:[#allocation24_spill] sm:$0xff] }
 0x1ce   :  { %2201 = vmatpush1.msra.mxu0 %v9390_v35  ;;  %2420 = vmatpush1.msra.mxu1 %v9300_v33  ;;  %v9400_v35 = vld [vmem:[#allocation45_spill] sm:$0xff]  ;;  %v9401_v33 = vld [vmem:[#allocation34_spill] sm:$0xff] }
 0x1cf   :  { %2204 = vmatprep.subr.mxu0 %v9391_v60  ;;  %2422 = vmatprep.subr.mxu1 %v9392_v0  ;;  %v9402_v60 = vld [vmem:[#allocation48_spill] sm:$0xff] }
 0x1d0   :  { %2207 = vmatpush1.msra.mxu0 %v9393_v47  ;;  %2424 = vmatpush1.msra.mxu1 %v9394_v36  ;;  %v9403_v0 = vld [vmem:[#allocation28_spill] sm:$0xff]  ;;  %v9404_v47 = vld [vmem:[#allocation49_spill] sm:$0xff]  ;;  %v9405_v36 = vld [vmem:[#allocation30_spill] sm:$0xff] }
 0x1d1   :  { %2210 = vmatprep.subr.mxu0 %v9395_v40  ;;  %2426 = vmatprep.subr.mxu1 %v9396_v56  ;;  %v9406_v40 = vld [vmem:[#allocation50_spill] sm:$0xff]  ;;  %v9407_v56 = vld [vmem:[#allocation31_spill] sm:$0xff] }
 0x1d2   :  { %2213 = vmatpush1.msra.mxu0 %v9397_v46  ;;  %2428 = vmatpush1.msra.mxu1 %v9398_v31  ;;  %v9408_v46 = vld [vmem:[#allocation51_spill] sm:$0xff]  ;;  %v9409_v31 = vld [vmem:[#allocation37_spill] sm:$0xff] }
 0x1d3   :  { %2216 = vmatprep.subr.mxu0 %v9399_v12  ;;  %2430 = vmatprep.subr.mxu1 %v9400_v35  ;;  %v9410_v12 = vld [vmem:[#allocation52_spill] sm:$0xff]  ;;  %v9411_v35 = vld [vmem:[#allocation38_spill] sm:$0xff] }
 0x1d4   :  { %2219 = vmatpush1.msra.mxu0 %v9401_v33  ;;  %2432 = vmatpush1.msra.mxu1 %v9402_v60  ;;  %v9412_v33 = vld [vmem:[#allocation55_spill] sm:$0xff]  ;;  %v9413_v60 = vld [vmem:[#allocation40_spill] sm:$0xff] }
 0x1d5   :  { %2222 = vmatprep.subr.mxu0 %v9403_v0  ;;  %2434 = vmatprep.subr.mxu1 %v9404_v47  ;;  %v9414_v0 = vld [vmem:[#allocation59_spill] sm:$0xff]  ;;  %v9415_v47 = vld [vmem:[#allocation41_spill] sm:$0xff] }
 0x1d6   :  { %2225 = vmatpush1.msra.mxu0 %v9405_v36  ;;  %2436 = vmatpush1.msra.mxu1 %v9406_v40  ;;  %v9416_v36 = vld [vmem:[#allocation61_spill] sm:$0xff]  ;;  %v9417_v40 = vld [vmem:[#allocation42_spill] sm:$0xff] }
 0x1d7   :  { %2228 = vmatprep.subr.mxu0 %v9407_v56  ;;  %2438 = vmatprep.subr.mxu1 %v9408_v46  ;;  %v9418_v56 = vld [vmem:[#allocation64_spill] sm:$0xff] }
 0x1d8   :  { %2231 = vmatpush1.msra.mxu0 %v9409_v31  ;;  %2440 = vmatpush1.msra.mxu1 %v9410_v12  ;;  %v9419_v46 = vld [vmem:[#allocation44_spill] sm:$0xff]  ;;  %v9420_v31 = vld [vmem:[#allocation57_spill] sm:$0xff]  ;;  %v9421_v12 = vld [vmem:[#allocation46_spill] sm:$0xff] }
 0x1d9   :  { %2234 = vmatprep.subr.mxu0 %v9411_v35  ;;  %2442 = vmatprep.subr.mxu1 %v9412_v33  ;;  %v9422_v35 = vld [vmem:[#allocation67_spill] sm:$0xff] }
 0x1da   :  { %2237 = vmatpush1.msra.mxu0 %v9413_v60  ;;  %2444 = vmatpush1.msra.mxu1 %v9414_v0  ;;  %v9423_v33 = vld [vmem:[#allocation47_spill] sm:$0xff]  ;;  %v9424_v0 = vld [vmem:[#allocation53_spill] sm:$0xff] }
 0x1db   :  { %2240 = vmatprep.subr.mxu0 %v9415_v47  ;;  %2446 = vmatprep.subr.mxu1 %v9416_v36  ;;  %v9425_v36 = vld [vmem:[#allocation54_spill] sm:$0xff] }
 0x1dc   :  { %2243 = vmatpush1.msra.mxu0 %v9417_v40  ;;  %2448 = vmatpush1.msra.mxu1 %v9418_v56  ;;  %v9426_v40 = vld [vmem:[#allocation69_spill] sm:$0xff] }
 0x1dd   :  { %2246 = vmatprep.subr.mxu0 %v9419_v46  ;;  %2450 = vmatprep.subr.mxu1 %v9420_v31  ;;  %v9427_v56 = vld [vmem:[#allocation65_spill] sm:$0xff]  ;;  %v9428_v31 = vld [vmem:[#allocation56_spill] sm:$0xff] }
 0x1de   :  { %2249 = vmatpush1.msra.mxu0 %v9421_v12  ;;  %2452 = vmatpush2.msra.mxu1 %v9422_v35  ;;  %v9429_v35 = vld [vmem:[#allocation66_spill] sm:$0xff] }
 0x1df   :  { %2252 = vmatprep.subr.mxu0 %v9423_v33  ;;  %2454 = vmatprep.subr.mxu1 %v6103_v5  ;;  %v9430_v5 = vld [vmem:[#allocation60_spill] sm:$0xff] }
 0x1e0   :  { %2255 = vmatpush1.msra.mxu0 %v9424_v0  ;;  %2456 = vmatpush2.msra.mxu1 %v6115_v7  ;;  %v9431_v7 = vld [vmem:[#allocation62_spill] sm:$0xff] }
 0x1e1   :  { %2258 = vmatprep.subr.mxu0 %v9425_v36  ;;  %2458 = vmatprep.subr.mxu1 %v9426_v40  ;;  %v9432_v40 = vld [vmem:[#allocation63_spill] sm:$0xff] }
 0x1e2   :  { %2261 = vmatpush1.msra.mxu0 %v9427_v56  ;;  %2460 = vmatpush2.msra.mxu1 %v6142_v11  ;;  %v9433_v11 = vld [vmem:[#allocation70_spill] sm:$0xff] }
 0x1e3   :  { %2264 = vmatprep.subr.mxu0 %v9428_v31  ;;  %2462 = vmatprep.subr.mxu1 %v6156_v51  ;;  %v9434_v51 = vld [vmem:[#allocation71_spill] sm:$0xff] }
 0x1e4   :  { %2267 = vmatpush1.msra.mxu0 %v9429_v35  ;;  %2464 = vmatpush2.msra.mxu1 %v6170_v19  ;;  %v9435_v19 = vld [vmem:[#allocation82_spill] sm:$0xff] }
 0x1e5   :  { %2270 = vmatprep.subr.mxu0 %v9430_v5  ;;  %2466 = vmatprep.subr.mxu1 %v6180_v45  ;;  %v9436_v45 = vld [vmem:[#allocation83_spill] sm:$0xff] }
 0x1e6   :  { %2273 = vmatpush2.msra.mxu0 %v9431_v7  ;;  %2468 = vmatpush2.msra.mxu1 %v6190_v15  ;;  %v9437_v15 = vld [vmem:[#allocation85_spill] sm:$0xff] }
 0x1e7   :  { %2276 = vmatprep.subr.mxu0 %v9432_v40  ;;  %2470 = vmatprep.subr.mxu1 %v6200_v34  ;;  %v9438_v34 = vld [vmem:[#allocation79_spill] sm:$0xff] }
 0x1e8   :  { %2279 = vmatpush2.msra.mxu0 %v9433_v11  ;;  %2472 = vmatpush2.msra.mxu1 %v6210_v48  ;;  %v9439_v48 = vld [vmem:[#allocation96_spill] sm:$0xff] }
 0x1e9   :  { %2282 = vmatprep.subr.mxu0 %v9434_v51  ;;  %2474 = vmatprep.subr.mxu1 %v6224_v24  ;;  %v9440_v24 = vld [vmem:[#allocation98_spill] sm:$0xff] }
 0x1ea   :  { %2285 = vmatpush2.msra.mxu0 %v9435_v19  ;;  %2476 = vmatpush2.msra.mxu1 %v6238_v63  ;;  %v9441_v63 = vld [vmem:[#allocation100_spill] sm:$0xff] }
 0x1eb   :  { %2288 = vmatprep.subr.mxu0 %v9436_v45  ;;  %2478 = vmatprep.subr.mxu1 %v6252_v32  ;;  %v9442_v32 = vld [vmem:[#allocation125_spill] sm:$0xff] }
 0x1ec   :  { %2291 = vmatpush2.msra.mxu0 %v9437_v15  ;;  %2480 = vmatpush2.msra.mxu1 %v6266_v18  ;;  %v9443_v18 = vld [vmem:[#allocation126_spill] sm:$0xff] }
 0x1ed   :  { %2294 = vmatprep.subr.mxu0 %v9438_v34  ;;  %2482 = vmatprep.subr.mxu1 %v6330_v53  ;;  %v9444_v53 = vld [vmem:[#allocation127_spill] sm:$0xff] }
 0x1ee   :  { %2297 = vmatpush2.msra.mxu0 %v9439_v48  ;;  %2484 = vmatpush2.msra.mxu1 %v6342_v55  ;;  %v9445_v55 = vld [vmem:[#allocation128_spill] sm:$0xff] }
 0x1ef   :  { %2300 = vmatprep.subr.mxu0 %v9440_v24  ;;  %2486 = vmatprep.subr.mxu1 %v6354_v57  ;;  %v9446_v57 = vld [vmem:[#allocation133_spill] sm:$0xff] }
 0x1f0   :  { %2303 = vmatpush2.msra.mxu0 %v9441_v63  ;;  %2488 = vmatpush2.msra.mxu1 %v6366_v52  ;;  %v9447_v52 = vld [vmem:[#allocation135_spill] sm:$0xff] }
 0x1f1   :  { %2306 = vmatprep.subr.mxu0 %v9442_v32  ;;  %2490 = vmatprep.subr.mxu1 %v6378_v2  ;;  %v9448_v2 = vld [vmem:[#allocation136_spill] sm:$0xff] }
 0x1f2   :  { %2309 = vmatpush2.msra.mxu0 %v9443_v18  ;;  %2492 = vmatpush2.msra.mxu1 %v6390_v29 }
 0x1f3   :  { %2312 = vmatprep.subr.mxu0 %v9444_v53  ;;  %2494 = vmatprep.subr.mxu1 %v6402_v41 }
 0x1f4   :  { %2315 = vmatpush2.msra.mxu0 %v9445_v55  ;;  %2496 = vmatpush2.msra.mxu1 %v6414_v27 }
 0x1f5   :  { %2318 = vmatprep.subr.mxu0 %v9446_v57  ;;  %2498 = vmatprep.subr.mxu1 %v6422_v4 }
 0x1f6   :  { %2321 = vmatpush2.msra.mxu0 %v9447_v52  ;;  %2500 = vmatpush2.msra.mxu1 %v6430_v50 }
 0x1f7   :  { %2324 = vmatprep.subr.mxu0 %v9448_v2  ;;  %2502 = vmatprep.subr.mxu1 %v6438_v58 }
 0x1f8   :  { %2327 = vmatpush2.msra.mxu0 %v6412_v28  ;;  %2504 = vmatpush2.msra.mxu1 %v6446_v54  ;;  %v9449_v28 = vld [vmem:[#allocation116_spill] sm:$0xff] }
 0x1f9   :  { %2330 = vmatprep.subr.mxu0 %v6420_v22  ;;  %2506 = vmatprep.subr.mxu1 %v6456_v26  ;;  %v9450_v26 = vld [vmem:[#allocation121_spill] sm:$0xff] }
 0x1fa   :  { %2333 = vmatpush2.msra.mxu0 %v6428_v14  ;;  %2508 = vmatpush2.msra.mxu1 %v6466_v3 }
 0x1fb   :  { %2336 = vmatprep.subr.mxu0 %v6436_v25  ;;  %2510 = vmatprep.subr.mxu1 %v6476_v37 }
 0x1fc   :  { %2339 = vmatpush2.msra.mxu0 %v6444_v8  ;;  %2512 = vmatpush2.msra.mxu1 %v6486_v16 }
 0x1fd   :  { %2342 = vmatprep.subr.mxu0 %v6454_v61  ;;  %2520 = vmatmul.mubr.f32.vlgmr.msra.gmra.mxu1 %v9449_v28  ;;  %v9451_v61 = vld [vmem:[#allocation122_spill] sm:$0xff]  ;;  %v9461_v28 = vld [vmem:[#allocation101_spill] sm:$0xff] }
 0x1fe   :  { %2812 = vmatprep.subr.mxu1 %v5620_v20  ;;  %2345 = vmatpush2.msra.mxu0 %v6464_v39  ;;  %v9452_v20 = vld [vmem:[#allocation109_spill] sm:$0xff] }
 0x1ff   :  { %2528 = vmatprep.mubr.f32.mxu1 %v9450_v26  ;;  %2814 = vmatpush1.msra.mxu1 %v5625_v43  ;;  %v9453_v43 = vld [vmem:[#allocation112_spill] sm:$0xff]  ;;  %v9459_v26 = vld [vmem:[#allocation78_spill] sm:$0xff] }
 0x200   :  { %2348 = vmatprep.subr.mxu0 %v6474_v38  ;;  %2816 = vmatprep.subr.mxu1 %v5630_v6  ;;  %v9454_v6 = vand.u32 4294901760, %v9369_v21  ;;  %v9465_v21 = vld [vmem:[#allocation118_spill] sm:$0xff] }
 0x201   :  { %2351 = vmatpush2.msra.mxu0 %v6484_v59  ;;  %2818 = vmatpush1.msra.mxu1 %v9361_v62  ;;  %v9455_v62 = vld [vmem:[#allocation117_spill] sm:$0xff] }
 0x202   :  { %2354 = vmatprep.subr.mxu0 %v6494_v1  ;;  %2532 = vmatmul.mubr.f32.gmra.mxu1 %v9451_v61  ;;  %v9458_v61 = vld [vmem:[#allocation94_spill] sm:$0xff]  ;;  %v9546_v1 = vld [vmem:[#allocation80_spill] sm:$0xff] }
 0x203   :  { %2820 = vmatprep.subr.mxu1 %v9363_v17  ;;  %2357 = vmatpush2.msra.mxu0 %v6502_v10  ;;  %v9456_v17 = vld [vmem:[#allocation75_spill] sm:$0xff] }
 0x204   :  { %2822 = vmatpush1.msra.mxu1 %v9364_v13  ;;  %2940 = vmatprep.mubr.f32.mxu1 %v9452_v20  ;;  %v9457_v13 = vand.u32 4294901760, %v9456_v17  ;;  %v9468_v17 = vld [vmem:[#allocation92_spill] sm:$0xff]  ;;  %v2983_v10 = vld [vmem:[#allocation10 + $0xb8] sm:$0xff] }
 0x205   :  { %2360 = vmatprep.subr.mxu0 %v6510_v49  ;;  %2824 = vmatprep.subr.mxu1 %v9366_v30  ;;  %v9460_v30 = vand.u32 4294901760, %v9459_v26  ;;  %v2984_v49 = vld [vmem:[#allocation10 + $0xc0] sm:$0xff] }
 0x206   :  { %2363 = vmatpush2.msra.mxu0 %v6518_v44  ;;  %2826 = vmatpush1.msra.mxu1 %v9367_v23  ;;  %v9462_v23 = vld [vmem:[#allocation87_spill] sm:$0xff] }
 0x207   :  { %2369 = vmatmul.mubr.f32.vlgmr.msra.gmra.mxu0 %v9453_v43  ;;  %2541 = vmatprep.subr.mxu0 %v9454_v6  ;;  %v9463_v44 = vand.u32 4294901760, %v9462_v23  ;;  %v9464_v43 = vld [vmem:[#allocation103_spill] sm:$0xff]  ;;  %v9476_v23 = vld [vmem:[#allocation32_spill] sm:$0xff] }
 0x208   :  { %2828 = vmatprep.subr.mxu1 %v9370_v9  ;;  %2376 = vmatprep.mubr.f32.mxu0 %v9455_v62  ;;  %v9466_v9 = vld [vmem:[#allocation90_spill] sm:$0xff]  ;;  %v9515_v62 = vld [vmem:[#allocation55_spill] sm:$0xff] }
 0x209   :  { %2545 = vmatpush1.msra.mxu0 %v9457_v13  ;;  %2830 = vmatpush1.msra.mxu1 %v9458_v61  ;;  %v9467_v6 = vand.u32 4294901760, %v9466_v9  ;;  %v9469_v13 = vand.u32 4294901760, %v9468_v17  ;;  %v9470_v61 = vld [vmem:[#allocation108_spill] sm:$0xff]  ;;  %v9480_v17 = vld [vmem:[#allocation107_spill] sm:$0xff] }
 0x20a   :  { %2549 = vmatprep.subr.mxu0 %v9460_v30  ;;  %2832 = vmatprep.subr.mxu1 %v9461_v28  ;;  %v9471_v28 = vld [vmem:[#allocation95_spill] sm:$0xff]  ;;  %v9477_v9 = vld [vmem:[#allocation104_spill] sm:$0xff] }
 0x20b   :  { %2553 = vmatpush1.msra.mxu0 %v9463_v44  ;;  %2834 = vmatpush1.msra.mxu1 %v9464_v43  ;;  %v9472_v26 = vand.u32 4294901760, %v9471_v28  ;;  %v9473_v44 = vld [vmem:[#allocation29_spill] sm:$0xff]  ;;  %v9474_v43 = vld [vmem:[#allocation102_spill] sm:$0xff] }
 0x20c   :  { %2379 = vmatmul.mubr.f32.gmra.mxu0 %v9465_v21  ;;  %2557 = vmatprep.subr.mxu0 %v9467_v6  ;;  %v9475_v30 = vand.u32 4294901760, %v9474_v43  ;;  %v9478_v6 = vand.u32 4294901760, %v9477_v9  ;;  %v9482_v21 = vld [vmem:[#allocation35_spill] sm:$0xff] }
 0x20d   :  { %2836 = vmatprep.subr.mxu1 %v9380_v42  ;;  %2561 = vmatpush1.msra.mxu0 %v9469_v13  ;;  %v9479_v42 = vld [vmem:[#allocation25_spill] sm:$0xff]  ;;  %v9481_v13 = vand.u32 4294901760, %v9480_v17 }
 0x20e   :  { %2795 = vmatprep.mubr.f32.mxu0 %v9452_v20  ;;  %2838 = vmatpush1.msra.mxu1 %v9470_v61  ;;  %v9483_v61 = vld [vmem:[#allocation20_spill] sm:$0xff]  ;;  %v9543_v20 = vld [vmem:[#allocation77_spill] sm:$0xff] }
 0x20f   :  { %2565 = vmatprep.subr.mxu0 %v9472_v26  ;;  %2840 = vmatprep.subr.mxu1 %v9473_v44  ;;  %v9484_v28 = vand.u32 4294901760, %v9483_v61  ;;  %v9485_v26 = vld [vmem:[#allocation26_spill] sm:$0xff] }
 0x210   :  { %2569 = vmatpush1.msra.mxu0 %v9475_v30  ;;  %2842 = vmatpush1.msra.mxu1 %v9476_v23  ;;  %v9486_v44 = vld [vmem:[#allocation22_spill] sm:$0xff]  ;;  %v9488_v30 = vld [vmem:[#allocation36_spill] sm:$0xff]  ;;  %v9489_v23 = vld [vmem:[#allocation23_spill] sm:$0xff] }
 0x211   :  { %2573 = vmatprep.subr.mxu0 %v9478_v6  ;;  %2844 = vmatprep.subr.mxu1 %v9479_v42  ;;  %v9487_v43 = vand.u32 4294901760, %v9486_v44  ;;  %v9490_v9 = vand.u32 4294901760, %v9489_v23  ;;  %v9491_v6 = vld [vmem:[#allocation39_spill] sm:$0xff]  ;;  %v9492_v42 = vld [vmem:[#allocation33_spill] sm:$0xff] }
 0x212   :  { %2577 = vmatpush1.msra.mxu0 %v9481_v13  ;;  %2846 = vmatpush1.msra.mxu1 %v9482_v21  ;;  %v9493_v17 = vand.u32 4294901760, %v9492_v42  ;;  %v9494_v13 = vld [vmem:[#allocation43_spill] sm:$0xff]  ;;  %v9495_v21 = vld [vmem:[#allocation24_spill] sm:$0xff] }
 0x213   :  { %2581 = vmatprep.subr.mxu0 %v9484_v28  ;;  %2848 = vmatprep.subr.mxu1 %v9485_v26  ;;  %v9496_v61 = vand.u32 4294901760, %v9495_v21  ;;  %v9497_v28 = vld [vmem:[#allocation45_spill] sm:$0xff]  ;;  %v9498_v26 = vld [vmem:[#allocation34_spill] sm:$0xff] }
 0x214   :  { %2585 = vmatpush1.msra.mxu0 %v9487_v43  ;;  %2850 = vmatpush1.msra.mxu1 %v9488_v30  ;;  %v9499_v44 = vand.u32 4294901760, %v9498_v26  ;;  %v9500_v43 = vld [vmem:[#allocation48_spill] sm:$0xff] }
 0x215   :  { %2589 = vmatprep.subr.mxu0 %v9490_v9  ;;  %2852 = vmatprep.subr.mxu1 %v9491_v6  ;;  %v9501_v30 = vld [vmem:[#allocation28_spill] sm:$0xff]  ;;  %v9503_v9 = vld [vmem:[#allocation49_spill] sm:$0xff]  ;;  %v9504_v6 = vld [vmem:[#allocation30_spill] sm:$0xff] }
 0x216   :  { %2593 = vmatpush1.msra.mxu0 %v9493_v17  ;;  %2854 = vmatpush1.msra.mxu1 %v9494_v13  ;;  %v9502_v23 = vand.u32 4294901760, %v9501_v30  ;;  %v9505_v42 = vand.u32 4294901760, %v9504_v6  ;;  %v9506_v17 = vld [vmem:[#allocation50_spill] sm:$0xff]  ;;  %v9507_v13 = vld [vmem:[#allocation31_spill] sm:$0xff]  ;;  %v9516_v6 = vand.u32 4294901760, %v9413_v60  ;;  %v9525_v60 = vand.u32 4294901760, %v9419_v46 }
 0x217   :  { %2597 = vmatprep.subr.mxu0 %v9496_v61  ;;  %2856 = vmatprep.subr.mxu1 %v9497_v28  ;;  %v9508_v21 = vand.u32 4294901760, %v9507_v13  ;;  %v9509_v61 = vld [vmem:[#allocation51_spill] sm:$0xff]  ;;  %v9510_v28 = vld [vmem:[#allocation37_spill] sm:$0xff]  ;;  %v9513_v30 = vld [vmem:[#allocation38_spill] sm:$0xff]  ;;  %v9532_v46 = vand.u32 4294901760, %v9424_v0 }
 0x218   :  { %2601 = vmatpush1.msra.mxu0 %v9499_v44  ;;  %2858 = vmatpush1.msra.mxu1 %v9500_v43  ;;  %v9511_v26 = vand.u32 4294901760, %v9510_v28  ;;  %v2991_v44 = vld [vmem:[#allocation10 + $0xf8] sm:$0xff]  ;;  %v9512_v43 = vld [vmem:[#allocation52_spill] sm:$0xff] }
 0x219   :  { %2605 = vmatprep.subr.mxu0 %v9502_v23  ;;  %2860 = vmatprep.subr.mxu1 %v9503_v9  ;;  %v9514_v23 = vand.u32 4294901760, %v9513_v30  ;;  %v2990_v9 = vld [vmem:[#allocation10 + $0xf0] sm:$0xff]  ;;  %v6791_v13 = vand.u32 4294901760, %v2991_v44  ;;  %v336_v30 = vpop.f32.mrf.mxu0 }
 0x21a   :  { %2609 = vmatpush1.msra.mxu0 %v9505_v42  ;;  %2862 = vmatpush1.msra.mxu1 %v9506_v17  ;;  %v9517_v42 = vld [vmem:[#allocation59_spill] sm:$0xff]  ;;  %v9518_v17 = vand.u32 4294901760, %v9415_v47  ;;  %v9527_v47 = vand.u32 4294901760, %v9421_v12 }
 0x21b   :  { %2613 = vmatprep.subr.mxu0 %v9508_v21  ;;  %2864 = vmatprep.subr.mxu1 %v9509_v61  ;;  %9519 = vst [vmem:[#allocation27_spill] sm:$0xff] %v6791_v13  ;;  %v9520_v21 = vld [vmem:[#allocation61_spill] sm:$0xff]  ;;  %v9521_v61 = vld [vmem:[#allocation42_spill] sm:$0xff]  ;;  %v2987_v12 = vld [vmem:[#allocation10 + $0xd8] sm:$0xff] }
 0x21c   :  { %2617 = vmatpush1.msra.mxu0 %v9511_v26  ;;  %2866 = vmatpush1.msra.mxu1 %v9512_v43  ;;  %v9522_v28 = vand.u32 4294901760, %v9521_v61  ;;  %v6796_v26 = vand.u32 4294901760, %v2990_v9  ;;  %v745_v43 = vpop.f32.mrf.mxu1  ;;  %v2988_v61 = vld [vmem:[#allocation10 + $0xe0] sm:$0xff] }
 0x21d   :  { %2621 = vmatprep.subr.mxu0 %v9514_v23  ;;  %2868 = vmatprep.subr.mxu1 %v9515_v62  ;;  %v9524_v62 = vld [vmem:[#allocation64_spill] sm:$0xff]  ;;  %v9526_v23 = vld [vmem:[#allocation57_spill] sm:$0xff]  ;;  %v6824_v0 = vand.u32 4294901760, %v2988_v61  ;;  %v6846_v59 = vadd.f32 %v745_v43, %v336_v30  ;;  %v9554_v43 = vld [vmem:[#allocation74_spill] sm:$0xff]  ;;  %v9555_v30 = vand.u32 4294901760, %v9432_v40 }
 0x21e   :  { %2625 = vmatpush1.msra.mxu0 %v9516_v6  ;;  %2870 = vmatpush1.msra.mxu1 %v9517_v42  ;;  %9523 = vst [vmem:[#allocation72_spill] sm:$0xff] %v6796_v26  ;;  %v2989_v6 = vld [vmem:[#allocation10 + $0xe8] sm:$0xff]  ;;  %v9528_v42 = vld [vmem:[#allocation67_spill] sm:$0xff] }
 0x21f   :  { %2629 = vmatprep.subr.mxu0 %v9518_v17  ;;  %2872 = vmatprep.subr.mxu1 %v9520_v21  ;;  %v9529_v17 = vand.u32 4294901760, %v9423_v33  ;;  %v6808_v21 = vsub.f32 %v2991_v44, %v6791_v13  ;;  %v9535_v33 = vand.u32 4294901760, %v9425_v36  ;;  %v2986_v44 = vld [vmem:[#allocation10 + $0xd0] sm:$0xff]  ;;  %9539 = vst [vmem:[#allocation21_spill] sm:$0xff] %v6824_v0  ;;  %v9540_v13 = vld [vmem:[#allocation73_spill] sm:$0xff] }
 0x220   :  { %2633 = vmatpush1.msra.mxu0 %v9522_v28  ;;  %2874 = vmatpush1.msra.mxu1 %v9524_v62  ;;  %v9531_v28 = vld [vmem:[#allocation58_spill] sm:$0xff]  ;;  %v6814_v62 = vsub.f32 %v2990_v9, %v6796_v26  ;;  %v2985_v9 = vld [vmem:[#allocation10 + $0xc8] sm:$0xff] }
 0x221   :  { %2637 = vmatprep.subr.mxu0 %v9525_v60  ;;  %2876 = vmatprep.subr.mxu1 %v9526_v23  ;;  %9530 = vst [vmem:[#allocation76_spill] sm:$0xff] %v6808_v21  ;;  %v747_v60 = vpop.f32.mrf.mxu1  ;;  %v338_v23 = vpop.f32.mrf.mxu0  ;;  %v2982_v36 = vld [vmem:[#allocation10 + $0xb0] sm:$0xff] }
 0x222   :  { %2641 = vmatpush1.msra.mxu0 %v9527_v47  ;;  %2878 = vmatpush2.msra.mxu1 %v9528_v42  ;;  %9533 = vst [vmem:[#allocation86_spill] sm:$0xff] %v6814_v62  ;;  %v9534_v47 = vld [vmem:[#allocation68_spill] sm:$0xff]  ;;  %v6819_v42 = vand.u32 4294901760, %v2989_v6 }
 0x223   :  { %2645 = vmatprep.subr.mxu0 %v9529_v17  ;;  %2880 = vmatprep.subr.mxu1 %v9531_v28  ;;  %v9537_v17 = vld [vmem:[#allocation69_spill] sm:$0xff]  ;;  %v9538_v28 = vand.u32 4294901760, %v9427_v56  ;;  %v753_v26 = vpop.f32.mrf.mxu1  ;;  %v9544_v56 = vand.u32 4294901760, %v9429_v35  ;;  %v6848_v35 = vadd.f32 %v747_v60, %v338_v23  ;;  %v9556_v60 = vand.u32 4294901760, %v6808_v21 }
 0x224   :  { %2649 = vmatpush1.msra.mxu0 %v9532_v46  ;;  %2882 = vmatpush2.msra.mxu1 %v9534_v47  ;;  %9536 = vst [vmem:[#allocation88_spill] sm:$0xff] %v6819_v42  ;;  %v352_v46 = vpop.f32.mrf.mxu0  ;;  %v9541_v47 = vand.u32 4294901760, %v9428_v31  ;;  %v9547_v31 = vand.u32 4294901760, %v9430_v5  ;;  %v6856_v5 = vand.u32 4294901760, %v2984_v49  ;;  %v6871_v23 = vand.u32 4294901760, %v2983_v10 }
 0x225   :  { %2653 = vmatprep.subr.mxu0 %v9535_v33  ;;  %2884 = vmatprep.subr.mxu1 %v9537_v17  ;;  %v6830_v33 = vand.u32 4294901760, %v2987_v12  ;;  %v9551_v17 = vand.u32 4294901760, %v9431_v7  ;;  %v755_v39 = vpop.f32.mrf.mxu1  ;;  %v6866_v7 = vsub.f32 %v6808_v21, %v9556_v60  ;;  %v2977_v60 = vld [vmem:[#allocation10 + $0x88] sm:$0xff] }
 0x226   :  { %2657 = vmatpush1.msra.mxu0 %v9538_v28  ;;  %2886 = vmatpush2.msra.mxu1 %v9540_v13  ;;  %v6836_v28 = vand.u32 4294901760, %v2986_v44  ;;  %v6842_v13 = vsub.f32 %v2989_v6, %v6819_v42  ;;  %9553 = vst [vmem:[#allocation46_spill] sm:$0xff] %v6856_v5  ;;  %v2980_v6 = vld [vmem:[#allocation10 + $0xa0] sm:$0xff]  ;;  %v6858_v42 = vadd.f32 %v753_v26, %v352_v46  ;;  %v354_v38 = vpop.f32.mrf.mxu0  ;;  %9558 = vst [vmem:[#allocation53_spill] sm:$0xff] %v6871_v23  ;;  %v9565_v21 = vld [vmem:[#allocation89_spill] sm:$0xff] }
 0x227   :  { %2661 = vmatprep.subr.mxu0 %v9541_v47  ;;  %9542 = vst [vmem:[#allocation99_spill] sm:$0xff] %v6830_v33  ;;  %2888 = vmatprep.subr.mxu1 %v9543_v20  ;;  %v6844_v47 = vand.u32 4294901760, %v2985_v9  ;;  %v2981_v20 = vld [vmem:[#allocation10 + $0xa8] sm:$0xff]  ;;  %v9559_v26 = vld [vmem:[#allocation84_spill] sm:$0xff]  ;;  %v9560_v46 = vand.u32 4294901760, %v9433_v11 }
 0x228   :  { %2665 = vmatpush1.msra.mxu0 %v9544_v56  ;;  %9545 = vst [vmem:[#allocation105_spill] sm:$0xff] %v6836_v28  ;;  %2890 = vmatpush2.msra.mxu1 %v9546_v1  ;;  %9548 = vst [vmem:[#allocation40_spill] sm:$0xff] %v6842_v13  ;;  %v9550_v56 = vld [vmem:[#allocation81_spill] sm:$0xff]  ;;  %v6854_v1 = vsub.f32 %v2988_v61, %v6824_v0  ;;  %v6869_v61 = vsub.f32 %v2987_v12, %v6830_v33  ;;  %v6886_v12 = vand.u32 4294901760, %v2981_v20 }
 0x229   :  { %2669 = vmatprep.subr.mxu0 %v9547_v31  ;;  %9549 = vst [vmem:[#allocation41_spill] sm:$0xff] %v6844_v47  ;;  %2892 = vmatprep.subr.mxu1 %v9550_v56  ;;  %v2979_v31 = vld [vmem:[#allocation10 + $0x98] sm:$0xff]  ;;  %v9561_v56 = vand.u32 4294901760, %v6814_v62  ;;  %v9570_v33 = vld [vmem:[#allocation93_spill] sm:$0xff] }
 0x22a   :  { %2673 = vmatpush2.msra.mxu0 %v9551_v17  ;;  %9552 = vst [vmem:[#allocation44_spill] sm:$0xff] %v6854_v1  ;;  %2894 = vmatpush2.msra.mxu1 %v9554_v43  ;;  %9557 = vst [vmem:[#allocation47_spill] sm:$0xff] %v6869_v61  ;;  %v2978_v17 = vld [vmem:[#allocation10 + $0x90] sm:$0xff]  ;;  %v6882_v43 = vsub.f32 %v2986_v44, %v6836_v28  ;;  %v6899_v44 = vadd.f32 %v755_v39, %v354_v38  ;;  %v6901_v28 = vpop.f32.mrf.mxu1  ;;  %v9574_v11 = vld [vmem:[#allocation97_spill] sm:$0xff]  ;;  %v6933_v38 = vpop.f32.mrf.mxu0 }
 0x22b   :  { %2677 = vmatprep.subr.mxu0 %v9555_v30  ;;  %2896 = vmatprep.subr.mxu1 %v9559_v26  ;;  %v6879_v40 = vsub.f32 %v6814_v62, %v9561_v56  ;;  %v6884_v30 = vand.u32 4294901760, %v2982_v36  ;;  %9564 = vst [vmem:[#allocation56_spill] sm:$0xff] %v6886_v12  ;;  %v9566_v26 = vand.u32 4294901760, %v9434_v51  ;;  %v6895_v56 = vand.u32 4294901760, %v2980_v6  ;;  %v9578_v51 = vld [vmem:[#allocation91_spill] sm:$0xff] }
 0x22c   :  { %2681 = vmatpush2.msra.mxu0 %v9560_v46  ;;  %9562 = vst [vmem:[#allocation54_spill] sm:$0xff] %v6882_v43  ;;  %2898 = vmatpush2.msra.mxu1 %v9565_v21  ;;  %v6893_v46 = vsub.f32 %v2985_v9, %v6844_v47  ;;  %v6897_v62 = vand.u32 4294901760, %v2979_v31  ;;  %v9571_v21 = vand.u32 4294901760, %v9435_v19  ;;  %v6910_v9 = vand.u32 4294901760, %v2978_v17 }
 0x22d   :  { %9563 = vst [vmem:[#allocation65_spill] sm:$0xff] %v6884_v30  ;;  %2685 = vmatprep.subr.mxu0 %v9566_v26  ;;  %9568 = vst [vmem:[#allocation60_spill] sm:$0xff] %v6895_v56  ;;  %2900 = vmatprep.subr.mxu1 %v9570_v33  ;;  %v6908_v26 = vsub.f32 %v2984_v49, %v6856_v5  ;;  %v9575_v47 = vand.u32 4294901760, %v9436_v45  ;;  %v6918_v33 = vsub.f32 %v2983_v10, %v6871_v23  ;;  %v2975_v10 = vld [vmem:[#allocation10 + $0x78] sm:$0xff]  ;;  %v9582_v23 = vld [vmem:[#allocation106_spill] sm:$0xff] }
 0x22e   :  { %9567 = vst [vmem:[#allocation66_spill] sm:$0xff] %v6893_v46  ;;  %9569 = vst [vmem:[#allocation62_spill] sm:$0xff] %v6897_v62  ;;  %2689 = vmatpush2.msra.mxu0 %v9571_v21  ;;  %2902 = vmatpush2.msra.mxu1 %v9574_v11  ;;  %v6920_v19 = vand.u32 4294901760, %v2977_v60  ;;  %v2976_v21 = vld [vmem:[#allocation10 + $0x80] sm:$0xff]  ;;  %v9579_v49 = vand.u32 4294901760, %v9437_v15  ;;  %v6931_v39 = vsub.f32 %v2981_v20, %v6886_v12  ;;  %v9584_v15 = vand.u32 4294901760, %v6842_v13  ;;  %v6950_v12 = vpop.f32.mrf.mxu1 }
 0x22f   :  { %9572 = vst [vmem:[#allocation63_spill] sm:$0xff] %v6908_v26  ;;  %9573 = vst [vmem:[#allocation70_spill] sm:$0xff] %v6910_v9  ;;  %2693 = vmatprep.subr.mxu0 %v9575_v47  ;;  %2904 = vmatprep.subr.mxu1 %v9578_v51  ;;  %v6928_v47 = vsub.f32 %v2982_v36, %v6884_v30  ;;  %v9583_v51 = vand.u32 4294901760, %v9438_v34  ;;  %v6945_v36 = vsub.f32 %v2980_v6, %v6895_v56  ;;  %v2974_v45 = vld [vmem:[#allocation10 + $0x70] sm:$0xff] }
 0x230   :  { %9576 = vst [vmem:[#allocation71_spill] sm:$0xff] %v6918_v33  ;;  %9577 = vst [vmem:[#allocation82_spill] sm:$0xff] %v6920_v19  ;;  %2697 = vmatpush2.msra.mxu0 %v9579_v49  ;;  %2906 = vmatpush2.msra.mxu1 %v9582_v23  ;;  %v6941_v49 = vsub.f32 %v6842_v13, %v9584_v15  ;;  %v6948_v20 = vsub.f32 %v2979_v31, %v6897_v62  ;;  %v9587_v23 = vld [vmem:[#allocation129_spill] sm:$0xff]  ;;  %v9588_v34 = vand.u32 4294901760, %v9439_v48  ;;  %v9592_v13 = vld [vmem:[#allocation130_spill] sm:$0xff] }
 0x231   :  { %9580 = vst [vmem:[#allocation83_spill] sm:$0xff] %v6928_v47  ;;  %9581 = vst [vmem:[#allocation85_spill] sm:$0xff] %v6931_v39  ;;  %2701 = vmatprep.subr.mxu0 %v9583_v51  ;;  %2908 = vmatprep.subr.mxu1 %v9587_v23  ;;  %v9589_v51 = vand.u32 4294901760, %v6854_v1  ;;  %v6962_v6 = vsub.f32 %v2978_v17, %v6910_v9  ;;  %v6964_v31 = vand.u32 4294901760, %v2976_v21  ;;  %v9593_v62 = vand.u32 4294901760, %v9440_v24  ;;  %v9597_v17 = vld [vmem:[#allocation131_spill] sm:$0xff] }
 0x232   :  { %9585 = vst [vmem:[#allocation79_spill] sm:$0xff] %v6945_v36  ;;  %9586 = vst [vmem:[#allocation96_spill] sm:$0xff] %v6948_v20  ;;  %2705 = vmatpush2.msra.mxu0 %v9588_v34  ;;  %2910 = vmatpush2.msra.mxu1 %v9592_v13  ;;  %v9594_v48 = vand.u32 4294901760, %v6869_v61  ;;  %v6978_v11 = vand.u32 4294901760, %v2975_v10  ;;  %v9599_v24 = vand.u32 4294901760, %v6882_v43  ;;  %v6990_v34 = vand.u32 4294901760, %v2974_v45 }
 0x233   :  { %v6958_v15 = vsub.f32 %v6854_v1, %v9589_v51  ;;  %9590 = vst [vmem:[#allocation98_spill] sm:$0xff] %v6962_v6  ;;  %9591 = vst [vmem:[#allocation100_spill] sm:$0xff] %v6964_v31  ;;  %2709 = vmatprep.subr.mxu0 %v9593_v62  ;;  %v6976_v51 = vsub.f32 %v2977_v60, %v6920_v19  ;;  %2912 = vmatprep.subr.mxu1 %v9597_v17  ;;  %v9598_v1 = vand.u32 4294901760, %v9441_v63  ;;  %v958_v60 = vpop.f32.mrf.mxu0  ;;  %v2973_v13 = vld [vmem:[#allocation10 + $0x68] sm:$0xff] }
 0x234   :  { %v6972_v23 = vsub.f32 %v6869_v61, %v9594_v48  ;;  %9596 = vst [vmem:[#allocation126_spill] sm:$0xff] %v6978_v11  ;;  %v6986_v62 = vsub.f32 %v6882_v43, %v9599_v24  ;;  %9600 = vst [vmem:[#allocation127_spill] sm:$0xff] %v6990_v34  ;;  %v9601_v61 = vld [vmem:[#allocation132_spill] sm:$0xff]  ;;  %v9602_v19 = vand.u32 4294901760, %v9442_v32  ;;  %v7003_v48 = vpop.f32.mrf.mxu1  ;;  %v9604_v43 = vld [vmem:[#allocation134_spill] sm:$0xff]  ;;  %v7016_v24 = vsub.f32 %v2976_v21, %v6964_v31 }
 0x235   :  { %9595 = vst [vmem:[#allocation125_spill] sm:$0xff] %v6976_v51  ;;  %2713 = vmatpush2.msra.mxu0 %v9598_v1  ;;  %2914 = vmatpush2.msra.mxu1 %v9601_v61  ;;  %v9603_v1 = vand.u32 4294901760, %v6893_v46  ;;  %v9605_v61 = vand.u32 4294901760, %v9443_v18  ;;  %v9611_v21 = vand.u32 4294901760, %v9445_v55  ;;  %v9615_v55 = vand.u32 4294901760, %v9446_v57 }
 0x236   :  { %2717 = vmatprep.subr.mxu0 %v9602_v19  ;;  %2916 = vmatprep.subr.mxu1 %v9604_v43  ;;  %v9606_v19 = vand.u32 4294901760, %v6908_v26  ;;  %9607 = vst [vmem:[#allocation128_spill] sm:$0xff] %v7016_v24  ;;  %v9608_v43 = vand.u32 4294901760, %v9444_v53  ;;  %v957_v57 = vadd.f32 %v6933_v38, %v6846_v59  ;;  %v9626_v38 = vand.u32 4294901760, %v6420_v22  ;;  %v2967_v22 = vld [vmem:[#allocation10 + $0x38] sm:$0xff] }
 0x237   :  { %v6999_v17 = vsub.f32 %v6893_v46, %v9603_v1  ;;  %2721 = vmatpush2.msra.mxu0 %v9605_v61  ;;  %2918 = vmatpush2.msra.mxu1 %v6390_v29  ;;  %v9609_v61 = vand.u32 4294901760, %v6918_v33  ;;  %v7029_v1 = vsub.f32 %v2975_v10, %v6978_v11  ;;  %v9612_v29 = vand.u32 4294901760, %v6928_v47 }
 0x238   :  { %v7012_v63 = vsub.f32 %v6908_v26, %v9606_v19  ;;  %2725 = vmatprep.subr.mxu0 %v9608_v43  ;;  %2920 = vmatprep.subr.mxu1 %v6402_v41  ;;  %v7046_v10 = vsub.f32 %v2974_v45, %v6990_v34  ;;  %v2972_v19 = vld [vmem:[#allocation10 + $0x60] sm:$0xff]  ;;  %v966_v41 = vpop.f32.mrf.mxu0  ;;  %v7062_v45 = vand.u32 4294901760, %v2973_v13  ;;  %v9630_v59 = vand.u32 4294901760, %v6428_v14 }
 0x239   :  { %v7025_v32 = vsub.f32 %v6918_v33, %v9609_v61  ;;  %9610 = vst [vmem:[#allocation133_spill] sm:$0xff] %v7029_v1  ;;  %2729 = vmatpush2.msra.mxu0 %v9611_v21  ;;  %v7038_v43 = vsub.f32 %v6928_v47, %v9612_v29  ;;  %v9613_v61 = vand.u32 4294901760, %v6931_v39  ;;  %2922 = vmatpush2.msra.mxu1 %v6414_v27  ;;  %v9616_v29 = vand.u32 4294901760, %v6945_v36  ;;  %v7064_v47 = vpop.f32.mrf.mxu1 }
 0x23a   :  { %9614 = vst [vmem:[#allocation135_spill] sm:$0xff] %v7046_v10  ;;  %2733 = vmatprep.subr.mxu0 %v9615_v55  ;;  %9618 = vst [vmem:[#allocation136_spill] sm:$0xff] %v7062_v45  ;;  %2924 = vmatprep.subr.mxu1 %v6422_v4  ;;  %v9619_v27 = vand.u32 4294901760, %v9447_v52  ;;  %v9622_v4 = vand.u32 4294901760, %v6976_v51  ;;  %v959_v55 = vadd.f32 %v958_v60, %v6848_v35  ;;  %v9656_v33 = vand.u32 4294901760, %v6941_v49 }
 0x23b   :  { %v7043_v18 = vsub.f32 %v6931_v39, %v9613_v61  ;;  %v7055_v53 = vsub.f32 %v6945_v36, %v9616_v29  ;;  %v9617_v61 = vand.u32 4294901760, %v6948_v20  ;;  %v9620_v29 = vand.u32 4294901760, %v6962_v6  ;;  %2926 = vmatpush2.msra.mxu1 %v6430_v50  ;;  %v9624_v50 = vld [vmem:[#allocation137_spill] sm:$0xff] }
 0x23c   :  { %2737 = vmatpush2.msra.mxu0 %v9619_v27  ;;  %v9621_v36 = vand.u32 4294901760, %v9448_v2  ;;  %v7085_v52 = vsub.f32 %v6976_v51, %v9622_v4  ;;  %v7088_v27 = vand.u32 4294901760, %v2972_v19  ;;  %2928 = vmatprep.subr.mxu1 %v6438_v58  ;;  %v1529_v2 = vpop.f32.mrf.mxu1  ;;  %v968_v51 = vpop.f32.mrf.mxu0  ;;  %v7103_v60 = vsub.f32 %v2973_v13, %v7062_v45  ;;  %v2968_v13 = vld [vmem:[#allocation10 + $0x40] sm:$0xff] }
 0x23d   :  { %v7060_v39 = vsub.f32 %v6948_v20, %v9617_v61  ;;  %v7075_v21 = vsub.f32 %v6962_v6, %v9620_v29  ;;  %v2971_v20 = vld [vmem:[#allocation10 + $0x58] sm:$0xff]  ;;  %v2970_v29 = vld [vmem:[#allocation10 + $0x50] sm:$0xff]  ;;  %v9625_v61 = vand.u32 4294901760, %v9624_v50  ;;  %2930 = vmatpush2.msra.mxu1 %v6446_v54  ;;  %v2969_v50 = vld [vmem:[#allocation10 + $0x48] sm:$0xff]  ;;  %v1108_v54 = vadd.f32 %v6901_v28, %v957_v57 }
 0x23e   :  { %2741 = vmatprep.subr.mxu0 %v9621_v36  ;;  %9623 = vst [vmem:[#allocation75_spill] sm:$0xff] %v7088_v27  ;;  %9627 = vst [vmem:[#allocation94_spill] sm:$0xff] %v7103_v60  ;;  %v9629_v36 = vld [vmem:[#allocation139_spill] sm:$0xff]  ;;  %v7117_v58 = vand.u32 4294901760, %v2970_v29  ;;  %v967_v4 = vadd.f32 %v966_v41, %v6858_v42  ;;  %v1384_v14 = vpop.f32.mrf.mxu0  ;;  %v9634_v57 = vand.u32 4294901760, %v7029_v1  ;;  %v9636_v42 = vand.u32 4294901760, %v6444_v8 }
 0x23f   :  { %2745 = vmatpush2.msra.mxu0 %v9625_v61  ;;  %v7105_v61 = vand.u32 4294901760, %v2971_v20  ;;  %2932 = vmatprep.subr.mxu1 %v9629_v36  ;;  %v9633_v36 = vand.u32 4294901760, %v6436_v25  ;;  %v1385_v25 = vadd.f32 %v1384_v14, %v1108_v54  ;;  %v1110_v41 = vadd.f32 %v6950_v12, %v959_v55  ;;  %v2965_v14 = vld [vmem:[#allocation10 + $0x28] sm:$0xff]  ;;  %v9647_v54 = vld [vmem:[#allocation140_spill] sm:$0xff] }
 0x240   :  { %2749 = vmatprep.subr.mxu0 %v9626_v38  ;;  %v9631_v38 = vand.u32 4294901760, %v7016_v24  ;;  %9632 = vst [vmem:[#allocation101_spill] sm:$0xff] %v7117_v58  ;;  %2934 = vmatpush2.msra.mxu1 %v6466_v3  ;;  %v1531_v3 = vpop.f32.mrf.mxu1  ;;  %v1386_v8 = vpop.f32.mrf.mxu0  ;;  %v7151_v55 = vand.u32 4294901760, %v2968_v13  ;;  %v1120_v6 = vadd.f32 %v7003_v48, %v967_v4  ;;  %v7177_v4 = vand.u32 4294901760, %v2965_v14 }
 0x241   :  { %9628 = vst [vmem:[#allocation78_spill] sm:$0xff] %v7105_v61  ;;  %2753 = vmatpush2.msra.mxu0 %v9630_v59  ;;  %v7127_v59 = vsub.f32 %v7029_v1, %v9634_v57  ;;  %2936 = vmatprep.subr.mxu1 %v6476_v37  ;;  %v7141_v57 = vand.u32 4294901760, %v2969_v50  ;;  %v2966_v1 = vld [vmem:[#allocation10 + $0x30] sm:$0xff]  ;;  %v7149_v12 = vsub.f32 %v2971_v20, %v7105_v61  ;;  %v9649_v20 = vld [vmem:[#allocation113_spill] sm:$0xff] }
 0x242   :  { %v7115_v35 = vsub.f32 %v7016_v24, %v9631_v38  ;;  %2757 = vmatprep.subr.mxu0 %v9633_v36  ;;  %v7130_v38 = vsub.f32 %v2972_v19, %v7088_v27  ;;  %v9637_v36 = vand.u32 4294901760, %v7046_v10  ;;  %v969_v19 = vadd.f32 %v968_v51, %v6899_v44  ;;  %2938 = vmatpush2.msra.mxu1 %v6486_v16  ;;  %v9639_v37 = vld [vmem:[#allocation138_spill] sm:$0xff] }
 0x243   :  { %2761 = vmatpush2.msra.mxu0 %v9636_v42  ;;  %9638 = vst [vmem:[#allocation103_spill] sm:$0xff] %v7141_v57  ;;  %v9640_v24 = vand.u32 4294901760, %v9639_v37  ;;  %9641 = vst [vmem:[#allocation90_spill] sm:$0xff] %v7149_v12  ;;  %v9643_v42 = vld [vmem:[#allocation110_spill] sm:$0xff]  ;;  %v1530_v44 = vadd.f32 %v1529_v2, %v1385_v25  ;;  %v1387_v51 = vadd.f32 %v1386_v8, %v1110_v41  ;;  %v2964_v37 = vld [vmem:[#allocation10 + $0x20] sm:$0xff]  ;;  %v1537_v8 = vpop.f32.mrf.mxu1 }
 0x244   :  { %9635 = vst [vmem:[#allocation87_spill] sm:$0xff] %v7130_v38  ;;  %v7139_v28 = vsub.f32 %v7046_v10, %v9637_v36  ;;  %9642 = vst [vmem:[#allocation92_spill] sm:$0xff] %v7151_v55  ;;  %2942 = vmatmul.mubr.f32.vlgmr.msra.gmra.mxu1 %v9643_v42  ;;  %v9644_v36 = vand.u32 4294901760, %v6866_v7  ;;  %v7157_v16 = vsub.f32 %v2970_v29, %v7117_v58  ;;  %v9648_v10 = vand.u32 4294901760, %v9647_v54  ;;  %v2963_v2 = vld [vmem:[#allocation10 + $0x18] sm:$0xff]  ;;  %v9652_v25 = vld [vmem:[#allocation141_spill] sm:$0xff]  ;;  %v1392_v54 = vpop.f32.mrf.mxu0 }
 0x245   :  { %2765 = vmatprep.subr.mxu0 %v9640_v24  ;;  %v7159_v24 = vand.u32 4294901760, %v2967_v22  ;;  %2948 = vmatprep.mubr.f32.mxu1 %v9649_v20  ;;  %v9651_v29 = vand.u32 4294901760, %v6879_v40  ;;  %v9653_v41 = vand.u32 4294901760, %v9652_v25  ;;  %1542 = vst [vmem:[#allocation11] sm:$0xff] %v1530_v44  ;;  %v7175_v48 = vsub.f32 %v2969_v50, %v7141_v57  ;;  %9655 = vst [vmem:[#allocation32_spill] sm:$0xff] %v7177_v4  ;;  %v2962_v7 = vld [vmem:[#allocation10 + $0x10] sm:$0xff] }
 0x246   :  { %3190 = vmatprep.subr.mxu1 %v9644_v36  ;;  %9645 = vst [vmem:[#allocation108_spill] sm:$0xff] %v7157_v16  ;;  %2769 = vmatpush2.msra.mxu0 %v9648_v10  ;;  %v7167_v36 = vand.u32 4294901760, %v2966_v1  ;;  %v1532_v10 = vadd.f32 %v1531_v3, %v1387_v51  ;;  %v9657_v40 = vld [vmem:[#allocation142_spill] sm:$0xff]  ;;  %v1393_v25 = vadd.f32 %v1392_v54, %v1120_v6  ;;  %v7187_v44 = vand.u32 4294901760, %v2964_v37  ;;  %v9662_v51 = vld [vmem:[#allocation143_spill] sm:$0xff]  ;;  %v1394_v49 = vpop.f32.mrf.mxu0 }
 0x247   :  { %9646 = vst [vmem:[#allocation95_spill] sm:$0xff] %v7159_v24  ;;  %3196 = vmatpush1.msra.mxu1 %v9651_v29  ;;  %2773 = vmatprep.subr.mxu0 %v9653_v41  ;;  %9654 = vst [vmem:[#allocation102_spill] sm:$0xff] %v7175_v48  ;;  %v9658_v29 = vand.u32 4294901760, %v9657_v40  ;;  %v1122_v41 = vadd.f32 %v7064_v47, %v969_v19  ;;  %v7185_v3 = vsub.f32 %v2968_v13, %v7151_v55  ;;  %v2961_v13 = vld [vmem:[#allocation10 + $0x8] sm:$0xff]  ;;  %v9666_v19 = vld [vmem:[#allocation114_spill] sm:$0xff]  ;;  %v1539_v40 = vpop.f32.mrf.mxu1 }
 0x248   :  { %9650 = vst [vmem:[#allocation29_spill] sm:$0xff] %v7167_v36  ;;  %3202 = vmatprep.subr.mxu1 %v9656_v33  ;;  %9660 = vst [vmem:[#allocation25_spill] sm:$0xff] %v7187_v44  ;;  %v9661_v50 = vand.u32 4294901760, %v6958_v15  ;;  %v9663_v26 = vand.u32 4294901760, %v9662_v51  ;;  %v7196_v6 = vsub.f32 %v2967_v22, %v7159_v24  ;;  %v7198_v47 = vand.u32 4294901760, %v2963_v2  ;;  %2950 = vmatmul.mubr.f32.gmra.mxu1 %v9666_v19 }
 0x249   :  { %2777 = vmatpush2.msra.mxu0 %v9658_v29  ;;  %9659 = vst [vmem:[#allocation104_spill] sm:$0xff] %v7185_v3  ;;  %1543 = vst [vmem:[#allocation11 + $0x8] sm:$0xff] %v1532_v10  ;;  %v9667_v15 = vand.u32 4294901760, %v6972_v23  ;;  %v1538_v54 = vadd.f32 %v1537_v8, %v1393_v25  ;;  %v1395_v29 = vadd.f32 %v1394_v49, %v1122_v41  ;;  %v7206_v10 = vand.u32 4294901760, %v2962_v7  ;;  %v2960_v41 = vld [vmem:[#allocation10] sm:$0xff]  ;;  %v9676_v49 = vld [vmem:[#allocation109_spill] sm:$0xff] }
 0x24a   :  { %3208 = vmatpush1.msra.mxu1 %v9661_v50  ;;  %2781 = vmatprep.subr.mxu0 %v9663_v26  ;;  %9664 = vst [vmem:[#allocation107_spill] sm:$0xff] %v7196_v6  ;;  %9665 = vst [vmem:[#allocation35_spill] sm:$0xff] %v7198_v47  ;;  %v7204_v26 = vsub.f32 %v2966_v1, %v7167_v36  ;;  %v9670_v50 = vld [vmem:[#allocation144_spill] sm:$0xff]  ;;  %v9672_v22 = vand.u32 4294901760, %v6986_v62  ;;  %v9673_v33 = vand.u32 4294901760, %v7103_v60  ;;  %v9674_v23 = vand.u32 4294901760, %v7130_v38 }
 0x24b   :  { %3214 = vmatprep.subr.mxu1 %v9667_v15  ;;  %9669 = vst [vmem:[#allocation26_spill] sm:$0xff] %v7206_v10  ;;  %v9671_v51 = vand.u32 4294901760, %v9670_v50  ;;  %v7224_v25 = vsub.f32 %v2965_v14, %v7177_v4  ;;  %3570 = vmatprep.mubr.f32.mxu1 %v9676_v49  ;;  %v9677_v62 = vld [vmem:[#allocation145_spill] sm:$0xff]  ;;  %1544 = vst [vmem:[#allocation11 + $0x10] sm:$0xff] %v1538_v54  ;;  %v1540_v50 = vadd.f32 %v1539_v40, %v1395_v29  ;;  %v9682_v14 = vld [vmem:[#allocation146_spill] sm:$0xff] }
 0x24c   :  { %9668 = vst [vmem:[#allocation20_spill] sm:$0xff] %v7204_v26  ;;  %3220 = vmatpush1.msra.mxu1 %v9672_v22  ;;  %v7215_v46 = vsub.f32 %v7103_v60, %v9673_v33  ;;  %v7220_v8 = vsub.f32 %v7130_v38, %v9674_v23  ;;  %v9678_v15 = vand.u32 4294901760, %v9677_v62  ;;  %v8669_v33 = vand.u32 4294901760, %v7185_v3  ;;  %v3023_v23 = vld [vmem:[#allocation10 + $0x1f8] sm:$0xff] }
 0x24d   :  { %2785 = vmatpush2.msra.mxu0 %v9671_v51  ;;  %9675 = vst [vmem:[#allocation22_spill] sm:$0xff] %v7224_v25  ;;  %v7231_v51 = vsub.f32 %v2964_v37, %v7187_v44  ;;  %v7233_v22 = vand.u32 4294901760, %v2961_v13  ;;  %v9681_v1 = vand.u32 4294901760, %v6999_v17  ;;  %v9683_v38 = vand.u32 4294901760, %v9682_v14  ;;  %1545 = vst [vmem:[#allocation11 + $0x18] sm:$0xff] %v1540_v50  ;;  %v3021_v50 = vld [vmem:[#allocation10 + $0x1e8] sm:$0xff] }
 0x24e   :  { %2789 = vmatprep.subr.mxu0 %v9678_v15  ;;  %v9684_v62 = vand.u32 4294901760, %v7149_v12  ;;  %v7247_v37 = vsub.f32 %v2963_v2, %v7198_v47  ;;  %v9686_v29 = vand.u32 4294901760, %v7012_v63  ;;  %v9687_v17 = vand.u32 4294901760, %v7157_v16  ;;  %v3022_v2 = vld [vmem:[#allocation10 + $0x1f0] sm:$0xff] }
 0x24f   :  { %9679 = vst [vmem:[#allocation36_spill] sm:$0xff] %v7231_v51  ;;  %9680 = vst [vmem:[#allocation23_spill] sm:$0xff] %v7233_v22  ;;  %3226 = vmatprep.subr.mxu1 %v9681_v1  ;;  %2793 = vmatpush2.msra.mxu0 %v9683_v38  ;;  %v7259_v15 = vsub.f32 %v2962_v7, %v7206_v10  ;;  %v7261_v14 = vand.u32 4294901760, %v2960_v41  ;;  %v9691_v63 = vand.u32 4294901760, %v7025_v32  ;;  %v7273_v1 = vand.u32 4294901760, %v3023_v23  ;;  %v9694_v7 = vld [vmem:[#allocation72_spill] sm:$0xff] }
 0x250   :  { %v7243_v40 = vsub.f32 %v7149_v12, %v9684_v62  ;;  %9685 = vst [vmem:[#allocation39_spill] sm:$0xff] %v7247_v37  ;;  %3232 = vmatpush1.msra.mxu1 %v9686_v29  ;;  %2797 = vmatmul.mubr.f32.vlgmr.msra.gmra.mxu0 %v9643_v42  ;;  %v7255_v38 = vsub.f32 %v7157_v16, %v9687_v17  ;;  %v9690_v62 = vld [vmem:[#allocation27_spill] sm:$0xff]  ;;  %v9692_v29 = vand.u32 4294901760, %v7175_v48  ;;  %v9696_v49 = vand.u32 4294901760, %v7038_v43 }
 0x251   :  { %9688 = vst [vmem:[#allocation33_spill] sm:$0xff] %v7259_v15  ;;  %9689 = vst [vmem:[#allocation43_spill] sm:$0xff] %v7261_v14  ;;  %3025 = vmatprep.subr.mxu0 %v9690_v62  ;;  %3238 = vmatprep.subr.mxu1 %v9691_v63  ;;  %v7281_v32 = vsub.f32 %v7185_v3, %v8669_v33  ;;  %v9698_v54 = vand.u32 4294901760, %v7196_v6  ;;  %v7297_v3 = vand.u32 4294901760, %v3022_v2  ;;  %v3020_v63 = vld [vmem:[#allocation10 + $0x1e0] sm:$0xff]  ;;  %v3019_v33 = vld [vmem:[#allocation10 + $0x1d8] sm:$0xff] }
 0x252   :  { %v7270_v17 = vsub.f32 %v7175_v48, %v9692_v29  ;;  %9693 = vst [vmem:[#allocation24_spill] sm:$0xff] %v7273_v1  ;;  %2803 = vmatprep.mubr.f32.mxu0 %v9649_v20  ;;  %3027 = vmatpush1.msra.mxu0 %v9694_v7  ;;  %v7285_v29 = vsub.f32 %v2961_v13, %v7233_v22  ;;  %v9697_v48 = vld [vmem:[#allocation88_spill] sm:$0xff]  ;;  %v9700_v13 = vand.u32 4294901760, %v7043_v18  ;;  %v9703_v60 = vand.u32 4294901760, %v7055_v53  ;;  %v9717_v7 = vld [vmem:[#allocation41_spill] sm:$0xff] }
 0x253   :  { %3244 = vmatpush1.msra.mxu1 %v9696_v49  ;;  %3029 = vmatprep.subr.mxu0 %v9697_v48  ;;  %v7294_v12 = vsub.f32 %v7196_v6, %v9698_v54  ;;  %9699 = vst [vmem:[#allocation34_spill] sm:$0xff] %v7297_v3  ;;  %v9701_v49 = vand.u32 4294901760, %v7204_v26  ;;  %v7310_v6 = vsub.f32 %v2960_v41, %v7261_v14  ;;  %v7324_v54 = vand.u32 4294901760, %v3021_v50  ;;  %v3018_v41 = vld [vmem:[#allocation10 + $0x1d0] sm:$0xff]  ;;  %v9712_v48 = vld [vmem:[#allocation119_spill] sm:$0xff] }
 0x254   :  { %9695 = vst [vmem:[#allocation45_spill] sm:$0xff] %v7285_v29  ;;  %3250 = vmatprep.subr.mxu1 %v9700_v13  ;;  %3031 = vmatpush1.msra.mxu0 %v6824_v0  ;;  %v9704_v13 = vand.u32 4294901760, %v7224_v25  ;;  %v9708_v53 = vand.u32 4294901760, %v7060_v39  ;;  %v9709_v18 = vand.u32 4294901760, %v7231_v51  ;;  %v9711_v0 = vld [vmem:[#allocation105_spill] sm:$0xff]  ;;  %v9713_v39 = vand.u32 4294901760, %v7247_v37 }
 0x255   :  { %v7306_v16 = vsub.f32 %v7204_v26, %v9701_v49  ;;  %9702 = vst [vmem:[#allocation48_spill] sm:$0xff] %v7310_v6  ;;  %3256 = vmatpush1.msra.mxu1 %v9703_v60  ;;  %2805 = vmatmul.mubr.f32.gmra.mxu0 %v9666_v19  ;;  %v7322_v49 = vsub.f32 %v3023_v23, %v7273_v1  ;;  %9706 = vst [vmem:[#allocation49_spill] sm:$0xff] %v7324_v54  ;;  %v9707_v26 = vld [vmem:[#allocation99_spill] sm:$0xff]  ;;  %v3017_v23 = vld [vmem:[#allocation10 + $0x1c8] sm:$0xff]  ;;  %v9720_v20 = vand.u32 4294901760, %v7085_v52 }
 0x256   :  { %v7319_v43 = vsub.f32 %v7224_v25, %v9704_v13  ;;  %3033 = vmatprep.subr.mxu0 %v9707_v26  ;;  %3262 = vmatprep.subr.mxu1 %v9708_v53  ;;  %v7333_v19 = vsub.f32 %v7231_v51, %v9709_v18  ;;  %v7336_v25 = vand.u32 4294901760, %v3020_v63  ;;  %v7344_v53 = vsub.f32 %v7247_v37, %v9713_v39  ;;  %v3016_v13 = vld [vmem:[#allocation10 + $0x1c0] sm:$0xff] }
 0x257   :  { %9705 = vst [vmem:[#allocation28_spill] sm:$0xff] %v7322_v49  ;;  %3035 = vmatpush1.msra.mxu0 %v9711_v0  ;;  %3157 = vmatprep.mubr.f32.mxu0 %v9712_v48  ;;  %v7347_v60 = vsub.f32 %v3022_v2, %v7297_v3  ;;  %v7349_v18 = vand.u32 4294901760, %v3019_v33  ;;  %v9716_v51 = vand.u32 4294901760, %v7075_v21  ;;  %v9718_v26 = vand.u32 4294901760, %v7259_v15  ;;  %v3015_v2 = vld [vmem:[#allocation10 + $0x1b8] sm:$0xff] }
 0x258   :  { %9710 = vst [vmem:[#allocation30_spill] sm:$0xff] %v7336_v25  ;;  %3037 = vmatprep.subr.mxu0 %v9717_v7  ;;  %v7361_v37 = vand.u32 4294901760, %v3018_v41  ;;  %v7369_v48 = vsub.f32 %v3021_v50, %v7324_v54  ;;  %v7371_v7 = vand.u32 4294901760, %v3017_v23  ;;  %v9723_v39 = vand.u32 4294901760, %v7115_v35 }
 0x259   :  { %9714 = vst [vmem:[#allocation50_spill] sm:$0xff] %v7347_v60  ;;  %9715 = vst [vmem:[#allocation31_spill] sm:$0xff] %v7349_v18  ;;  %3268 = vmatpush1.msra.mxu1 %v9716_v51  ;;  %v7358_v0 = vsub.f32 %v7259_v15, %v9718_v26  ;;  %3039 = vmatpush1.msra.mxu0 %v6856_v5  ;;  %v3014_v26 = vld [vmem:[#allocation10 + $0x1b0] sm:$0xff]  ;;  %v9724_v15 = vld [vmem:[#allocation53_spill] sm:$0xff]  ;;  %v7383_v21 = vsub.f32 %v3020_v63, %v7336_v25  ;;  %v7385_v50 = vand.u32 4294901760, %v3016_v13 }
 0x25a   :  { %9719 = vst [vmem:[#allocation51_spill] sm:$0xff] %v7361_v37  ;;  %3274 = vmatprep.subr.mxu1 %v9720_v20  ;;  %9721 = vst [vmem:[#allocation37_spill] sm:$0xff] %v7369_v48  ;;  %3041 = vmatprep.subr.mxu0 %v9724_v15  ;;  %v9725_v20 = vand.u32 4294901760, %v7285_v29  ;;  %v3013_v51 = vld [vmem:[#allocation10 + $0x1a8] sm:$0xff]  ;;  %v9728_v62 = vand.u32 4294901760, %v7127_v59  ;;  %v7393_v52 = vsub.f32 %v3019_v33, %v7349_v18  ;;  %v9731_v63 = vand.u32 4294901760, %v7139_v28 }
 0x25b   :  { %9722 = vst [vmem:[#allocation52_spill] sm:$0xff] %v7371_v7  ;;  %3280 = vmatpush1.msra.mxu1 %v9723_v39  ;;  %9726 = vst [vmem:[#allocation38_spill] sm:$0xff] %v7383_v21  ;;  %3043 = vmatpush1.msra.mxu0 %v6884_v30  ;;  %v9732_v15 = vld [vmem:[#allocation56_spill] sm:$0xff]  ;;  %v7407_v35 = vsub.f32 %v3018_v41, %v7361_v37  ;;  %v7409_v33 = vand.u32 4294901760, %v3014_v26  ;;  %v3011_v39 = vld [vmem:[#allocation10 + $0x198] sm:$0xff]  ;;  %v9736_v42 = vand.u32 4294901760, %v7215_v46 }
 0x25c   :  { %v7380_v5 = vsub.f32 %v7285_v29, %v9725_v20  ;;  %9727 = vst [vmem:[#allocation55_spill] sm:$0xff] %v7385_v50  ;;  %3286 = vmatprep.subr.mxu1 %v9728_v62  ;;  %9729 = vst [vmem:[#allocation59_spill] sm:$0xff] %v7393_v52  ;;  %v7395_v20 = vand.u32 4294901760, %v3015_v2  ;;  %v3012_v29 = vld [vmem:[#allocation10 + $0x1a0] sm:$0xff]  ;;  %3045 = vmatprep.subr.mxu0 %v9732_v15  ;;  %v9733_v62 = vand.u32 4294901760, %v7310_v6  ;;  %v9737_v28 = vand.u32 4294901760, %v7322_v49 }
 0x25d   :  { %3292 = vmatpush1.msra.mxu1 %v9731_v63  ;;  %9734 = vst [vmem:[#allocation42_spill] sm:$0xff] %v7407_v35  ;;  %9735 = vst [vmem:[#allocation64_spill] sm:$0xff] %v7409_v33  ;;  %3047 = vmatpush1.msra.mxu0 %v6895_v56  ;;  %v7423_v41 = vand.u32 4294901760, %v3013_v51  ;;  %v9740_v15 = vand.u32 4294901760, %v7220_v8  ;;  %v9741_v46 = vld [vmem:[#allocation62_spill] sm:$0xff]  ;;  %v9745_v59 = vand.u32 4294901760, %v7347_v60 }
 0x25e   :  { %9730 = vst [vmem:[#allocation61_spill] sm:$0xff] %v7395_v20  ;;  %v7404_v30 = vsub.f32 %v7310_v6, %v9733_v62  ;;  %3298 = vmatprep.subr.mxu1 %v9736_v42  ;;  %v7417_v63 = vsub.f32 %v7322_v49, %v9737_v28  ;;  %v7421_v62 = vsub.f32 %v3017_v23, %v7371_v7  ;;  %v3010_v6 = vld [vmem:[#allocation10 + $0x190] sm:$0xff]  ;;  %v7433_v49 = vand.u32 4294901760, %v3012_v29 }
 0x25f   :  { %9739 = vst [vmem:[#allocation67_spill] sm:$0xff] %v7423_v41  ;;  %3304 = vmatpush1.msra.mxu1 %v9740_v15  ;;  %3049 = vmatprep.subr.mxu0 %v9741_v46  ;;  %v7431_v28 = vsub.f32 %v3016_v13, %v7385_v50  ;;  %v9744_v23 = vand.u32 4294901760, %v7243_v40  ;;  %v7441_v8 = vsub.f32 %v7347_v60, %v9745_v59  ;;  %v7447_v56 = vand.u32 4294901760, %v3011_v39  ;;  %v3009_v13 = vld [vmem:[#allocation10 + $0x188] sm:$0xff]  ;;  %v9749_v40 = vld [vmem:[#allocation82_spill] sm:$0xff] }
 0x260   :  { %9738 = vst [vmem:[#allocation57_spill] sm:$0xff] %v7421_v62  ;;  %9743 = vst [vmem:[#allocation68_spill] sm:$0xff] %v7433_v49  ;;  %3051 = vmatpush1.msra.mxu0 %v6910_v9  ;;  %v7445_v42 = vsub.f32 %v3015_v2, %v7395_v20  ;;  %v9748_v46 = vand.u32 4294901760, %v7255_v38  ;;  %v7455_v59 = vsub.f32 %v3014_v26, %v7409_v33  ;;  %v7457_v60 = vand.u32 4294901760, %v3010_v6  ;;  %v3008_v26 = vld [vmem:[#allocation10 + $0x180] sm:$0xff]  ;;  %v3006_v15 = vld [vmem:[#allocation10 + $0x170] sm:$0xff] }
 0x261   :  { %9742 = vst [vmem:[#allocation58_spill] sm:$0xff] %v7431_v28  ;;  %3310 = vmatprep.subr.mxu1 %v9744_v23  ;;  %9747 = vst [vmem:[#allocation73_spill] sm:$0xff] %v7447_v56  ;;  %3053 = vmatprep.subr.mxu0 %v9749_v40  ;;  %v9752_v2 = vand.u32 4294901760, %v7270_v17  ;;  %v9753_v38 = vand.u32 4294901760, %v7369_v48  ;;  %v7470_v9 = vsub.f32 %v3013_v51, %v7423_v41  ;;  %v9755_v40 = vand.u32 4294901760, %v7281_v32  ;;  %v3007_v51 = vld [vmem:[#allocation10 + $0x178] sm:$0xff] }
 0x262   :  { %9746 = vst [vmem:[#allocation69_spill] sm:$0xff] %v7445_v42  ;;  %3316 = vmatpush1.msra.mxu1 %v9748_v46  ;;  %9750 = vst [vmem:[#allocation77_spill] sm:$0xff] %v7455_v59  ;;  %3055 = vmatpush1.msra.mxu0 %v6964_v31  ;;  %v9756_v17 = vand.u32 4294901760, %v7383_v21  ;;  %v7484_v23 = vand.u32 4294901760, %v3009_v13  ;;  %v3387_v32 = vand.u32 4294901760, %v7441_v8  ;;  %v3005_v8 = vld [vmem:[#allocation10 + $0x168] sm:$0xff] }
 0x263   :  { %9751 = vst [vmem:[#allocation80_spill] sm:$0xff] %v7457_v60  ;;  %3322 = vmatprep.subr.mxu1 %v9752_v2  ;;  %v7466_v46 = vsub.f32 %v7369_v48, %v9753_v38  ;;  %9754 = vst [vmem:[#allocation81_spill] sm:$0xff] %v7470_v9  ;;  %3057 = vmatprep.subr.mxu0 %v6978_v11  ;;  %v7482_v38 = vsub.f32 %v3012_v29, %v7433_v49  ;;  %v9759_v48 = vand.u32 4294901760, %v7294_v12 }
 0x264   :  { %3328 = vmatpush1.msra.mxu1 %v9755_v40  ;;  %v7478_v2 = vsub.f32 %v7383_v21, %v9756_v17  ;;  %9758 = vst [vmem:[#allocation84_spill] sm:$0xff] %v7484_v23  ;;  %3059 = vmatpush1.msra.mxu0 %v6990_v34  ;;  %v9760_v40 = vand.u32 4294901760, %v7393_v52  ;;  %v7497_v29 = vsub.f32 %v3011_v39, %v7447_v56  ;;  %v9762_v21 = vand.u32 4294901760, %v7306_v16 }
 0x265   :  { %9757 = vst [vmem:[#allocation74_spill] sm:$0xff] %v7482_v38  ;;  %3334 = vmatprep.subr.mxu1 %v9759_v48  ;;  %3061 = vmatprep.subr.mxu0 %v7062_v45  ;;  %v9763_v12 = vand.u32 4294901760, %v7407_v35  ;;  %v9766_v39 = vand.u32 4294901760, %v7319_v43  ;;  %v3393_v16 = vand.u32 4294901760, %v7466_v46 }
 0x266   :  { %v7493_v17 = vsub.f32 %v7393_v52, %v9760_v40  ;;  %9761 = vst [vmem:[#allocation89_spill] sm:$0xff] %v7497_v29  ;;  %3340 = vmatpush1.msra.mxu1 %v9762_v21  ;;  %v7509_v40 = vsub.f32 %v3010_v6, %v7457_v60  ;;  %v7511_v52 = vand.u32 4294901760, %v3008_v26  ;;  %3063 = vmatpush1.msra.mxu0 %v7088_v27  ;;  %v9767_v21 = vand.u32 4294901760, %v7421_v62  ;;  %v3004_v27 = vld [vmem:[#allocation10 + $0x160] sm:$0xff] }
 0x267   :  { %v7505_v48 = vsub.f32 %v7407_v35, %v9763_v12  ;;  %3346 = vmatprep.subr.mxu1 %v9766_v39  ;;  %v7523_v35 = vand.u32 4294901760, %v3007_v51  ;;  %v9769_v6 = vand.u32 4294901760, %v7333_v19  ;;  %3065 = vmatprep.subr.mxu0 %v7105_v61  ;;  %v3399_v43 = vand.u32 4294901760, %v7478_v2 }
 0x268   :  { %9764 = vst [vmem:[#allocation93_spill] sm:$0xff] %v7509_v40  ;;  %9765 = vst [vmem:[#allocation97_spill] sm:$0xff] %v7511_v52  ;;  %v7520_v12 = vsub.f32 %v7421_v62, %v9767_v21  ;;  %v9770_v39 = vand.u32 4294901760, %v7431_v28  ;;  %v7536_v21 = vsub.f32 %v3009_v13, %v7484_v23  ;;  %v9772_v62 = vand.u32 4294901760, %v7344_v53  ;;  %3067 = vmatpush1.msra.mxu0 %v7117_v58 }
 0x269   :  { %9768 = vst [vmem:[#allocation91_spill] sm:$0xff] %v7523_v35  ;;  %3352 = vmatpush1.msra.mxu1 %v9769_v6  ;;  %v3405_v19 = vand.u32 4294901760, %v7493_v17  ;;  %v9773_v2 = vand.u32 4294901760, %v7445_v42  ;;  %v9775_v13 = vand.u32 4294901760, %v7358_v0  ;;  %3069 = vmatprep.subr.mxu0 %v7141_v57  ;;  %v3411_v53 = vand.u32 4294901760, %v7505_v48 }
 0x26a   :  { %v7532_v46 = vsub.f32 %v7431_v28, %v9770_v39  ;;  %9771 = vst [vmem:[#allocation106_spill] sm:$0xff] %v7536_v21  ;;  %3358 = vmatprep.subr.mxu1 %v9772_v62  ;;  %v7548_v28 = vand.u32 4294901760, %v3006_v15  ;;  %v9776_v62 = vand.u32 4294901760, %v7455_v59  ;;  %v3003_v39 = vld [vmem:[#allocation10 + $0x158] sm:$0xff]  ;;  %v9778_v58 = vand.u32 4294901760, %v7380_v5  ;;  %3071 = vmatpush1.msra.mxu0 %v7151_v55 }
 0x26b   :  { %v7545_v6 = vsub.f32 %v7445_v42, %v9773_v2  ;;  %3364 = vmatpush1.msra.mxu1 %v9775_v13  ;;  %v7561_v42 = vsub.f32 %v3008_v26, %v7511_v52  ;;  %v3417_v0 = vand.u32 4294901760, %v7520_v12  ;;  %v9779_v48 = vand.u32 4294901760, %v7470_v9  ;;  %v3002_v26 = vld [vmem:[#allocation10 + $0x150] sm:$0xff]  ;;  %3073 = vmatprep.subr.mxu0 %v7159_v24 }
 0x26c   :  { %9774 = vst [vmem:[#allocation129_spill] sm:$0xff] %v7548_v28  ;;  %v7557_v17 = vsub.f32 %v7455_v59, %v9776_v62  ;;  %3370 = vmatprep.subr.mxu1 %v9778_v58  ;;  %v7573_v62 = vsub.f32 %v3007_v51, %v7523_v35  ;;  %v7575_v2 = vand.u32 4294901760, %v3005_v8  ;;  %v9782_v59 = vand.u32 4294901760, %v7404_v30  ;;  %v3001_v51 = vld [vmem:[#allocation10 + $0x148] sm:$0xff]  ;;  %3075 = vmatpush1.msra.mxu0 %v7167_v36  ;;  %v2998_v24 = vld [vmem:[#allocation10 + $0x130] sm:$0xff] }
 0x26d   :  { %9777 = vst [vmem:[#allocation130_spill] sm:$0xff] %v7561_v42  ;;  %v7570_v13 = vsub.f32 %v7470_v9, %v9779_v48  ;;  %v3423_v5 = vand.u32 4294901760, %v7532_v46  ;;  %v9783_v58 = vand.u32 4294901760, %v7482_v38  ;;  %v7587_v9 = vand.u32 4294901760, %v3004_v27  ;;  %v3000_v48 = vld [vmem:[#allocation10 + $0x140] sm:$0xff]  ;;  %3077 = vmatprep.subr.mxu0 %v7177_v4 }
 0x26e   :  { %9780 = vst [vmem:[#allocation131_spill] sm:$0xff] %v7573_v62  ;;  %9781 = vst [vmem:[#allocation132_spill] sm:$0xff] %v7575_v2  ;;  %3376 = vmatpush1.msra.mxu1 %v9782_v59  ;;  %v9785_v55 = vand.u32 4294901760, %v7417_v63  ;;  %v3429_v30 = vand.u32 4294901760, %v7545_v6  ;;  %v9786_v59 = vand.u32 4294901760, %v7497_v29  ;;  %v9789_v63 = vand.u32 4294901760, %v7509_v40  ;;  %3079 = vmatpush1.msra.mxu0 %v7187_v44 }
 0x26f   :  { %v7584_v12 = vsub.f32 %v7482_v38, %v9783_v58  ;;  %9784 = vst [vmem:[#allocation134_spill] sm:$0xff] %v7587_v9  ;;  %v7599_v58 = vsub.f32 %v3006_v15, %v7548_v28  ;;  %v7601_v38 = vand.u32 4294901760, %v3003_v39  ;;  %v3441_v15 = vand.u32 4294901760, %v7570_v13  ;;  %3081 = vmatprep.subr.mxu0 %v7198_v47 }
 0x270   :  { %3382 = vmatprep.subr.mxu1 %v9785_v55  ;;  %v7596_v46 = vsub.f32 %v7497_v29, %v9786_v59  ;;  %v3435_v55 = vand.u32 4294901760, %v7557_v17  ;;  %v7608_v6 = vsub.f32 %v7509_v40, %v9789_v63  ;;  %v7611_v59 = vand.u32 4294901760, %v3002_v26  ;;  %v2999_v29 = vld [vmem:[#allocation10 + $0x138] sm:$0xff]  ;;  %3083 = vmatpush1.msra.mxu0 %v7206_v10 }
 0x271   :  { %9787 = vst [vmem:[#allocation137_spill] sm:$0xff] %v7599_v58  ;;  %9788 = vst [vmem:[#allocation139_spill] sm:$0xff] %v7601_v38  ;;  %3388 = vmatpush2.msra.mxu1 %v3387_v32  ;;  %v7617_v4 = vsub.f32 %v3005_v8, %v7575_v2  ;;  %v7619_v17 = vand.u32 4294901760, %v3001_v51  ;;  %v3447_v63 = vand.u32 4294901760, %v7584_v12  ;;  %v9791_v36 = vand.u32 4294901760, %v7536_v21  ;;  %v2997_v8 = vld [vmem:[#allocation10 + $0x128] sm:$0xff]  ;;  %3085 = vmatprep.subr.mxu0 %v7233_v22 }
 0x272   :  { %3394 = vmatprep.subr.mxu1 %v3393_v16  ;;  %v7629_v13 = vsub.f32 %v3004_v27, %v7587_v9  ;;  %v7631_v32 = vand.u32 4294901760, %v3000_v48  ;;  %v7637_v12 = vsub.f32 %v3003_v39, %v7601_v38  ;;  %v7639_v47 = vand.u32 4294901760, %v2999_v29  ;;  %v2995_v40 = vld [vmem:[#allocation10 + $0x118] sm:$0xff]  ;;  %3087 = vmatpush1.msra.mxu0 %v7261_v14 }
 0x273   :  { %9790 = vst [vmem:[#allocation138_spill] sm:$0xff] %v7617_v4  ;;  %3400 = vmatpush2.msra.mxu1 %v3399_v43  ;;  %v7626_v16 = vsub.f32 %v7536_v21, %v9791_v36  ;;  %v3453_v43 = vand.u32 4294901760, %v7596_v46  ;;  %v2996_v36 = vld [vmem:[#allocation10 + $0x120] sm:$0xff]  ;;  %v3459_v27 = vand.u32 4294901760, %v7608_v6  ;;  %v9793_v21 = vand.u32 4294901760, %v7561_v42  ;;  %3089 = vmatprep.subr.mxu0 %v7273_v1 }
 0x274   :  { %9792 = vst [vmem:[#allocation140_spill] sm:$0xff] %v7629_v13  ;;  %3406 = vmatprep.subr.mxu1 %v3405_v19  ;;  %v7647_v10 = vsub.f32 %v3002_v26, %v7611_v59  ;;  %v7649_v46 = vand.u32 4294901760, %v2998_v24  ;;  %v9794_v39 = vand.u32 4294901760, %v7573_v62  ;;  %v7657_v6 = vsub.f32 %v3001_v51, %v7619_v17  ;;  %3091 = vmatpush2.msra.mxu0 %v7297_v3 }
 0x275   :  { %3412 = vmatpush2.msra.mxu1 %v3411_v53  ;;  %v3470_v19 = vsub.f32 %v7561_v42, %v9793_v21  ;;  %v7659_v44 = vand.u32 4294901760, %v2997_v8  ;;  %v2994_v21 = vld [vmem:[#allocation10 + $0x110] sm:$0xff]  ;;  %v3465_v26 = vand.u32 4294901760, %v7626_v16  ;;  %v7665_v42 = vsub.f32 %v3000_v48, %v7631_v32  ;;  %3093 = vmatprep.subr.mxu0 %v7324_v54 }
 0x276   :  { %3418 = vmatprep.subr.mxu1 %v3417_v0  ;;  %v3476_v53 = vsub.f32 %v7573_v62, %v9794_v39  ;;  %v7667_v14 = vand.u32 4294901760, %v2996_v36  ;;  %v2993_v39 = vld [vmem:[#allocation10 + $0x108] sm:$0xff]  ;;  %v9795_v51 = vand.u32 4294901760, %v7599_v58  ;;  %v7675_v62 = vsub.f32 %v2999_v29, %v7639_v47  ;;  %v2992_v0 = vld [vmem:[#allocation10 + $0x100] sm:$0xff]  ;;  %3095 = vmatpush2.msra.mxu0 %v7336_v25 }
 0x277   :  { %3424 = vmatpush2.msra.mxu1 %v3423_v5  ;;  %v7677_v16 = vand.u32 4294901760, %v2995_v40  ;;  %v3471_v48 = vand.u32 4294901760, %v3470_v19  ;;  %v7682_v3 = vsub.f32 %v2998_v24, %v7649_v46  ;;  %v7684_v1 = vand.u32 4294901760, %v2994_v21  ;;  %3097 = vmatprep.subr.mxu0 %v7349_v18 }
 0x278   :  { %3430 = vmatprep.subr.mxu1 %v3429_v30  ;;  %v3482_v22 = vsub.f32 %v7599_v58, %v9795_v51  ;;  %9796 = vst [vmem:[#allocation141_spill] sm:$0xff] %v7675_v62  ;;  %v9798_v29 = vand.u32 4294901760, %v7617_v4  ;;  %v7694_v19 = vand.u32 4294901760, %v2993_v39  ;;  %v9799_v24 = vand.u32 4294901760, %v7629_v13  ;;  %3099 = vmatpush2.msra.mxu0 %v7361_v37 }
 0x279   :  { %9797 = vst [vmem:[#allocation142_spill] sm:$0xff] %v7677_v16  ;;  %3436 = vmatpush2.msra.mxu1 %v3435_v55  ;;  %v7692_v55 = vsub.f32 %v2997_v8, %v7659_v44  ;;  %v7702_v58 = vsub.f32 %v2996_v36, %v7667_v14  ;;  %v3477_v8 = vand.u32 4294901760, %v3476_v53  ;;  %v9801_v5 = vand.u32 4294901760, %v7637_v12  ;;  %3101 = vmatprep.subr.mxu0 %v7371_v7 }
 0x27a   :  { %3442 = vmatprep.subr.mxu1 %v3441_v15  ;;  %v3488_v51 = vsub.f32 %v7617_v4, %v9798_v29  ;;  %v3494_v15 = vsub.f32 %v7629_v13, %v9799_v24  ;;  %v7704_v29 = vand.u32 4294901760, %v2992_v0  ;;  %v7712_v18 = vsub.f32 %v2995_v40, %v7677_v16  ;;  %3103 = vmatpush2.msra.mxu0 %v7385_v50 }
 0x27b   :  { %3448 = vmatpush2.msra.mxu1 %v3447_v63  ;;  %9800 = vst [vmem:[#allocation143_spill] sm:$0xff] %v7702_v58  ;;  %v3500_v63 = vsub.f32 %v7637_v12, %v9801_v5  ;;  %v3483_v36 = vand.u32 4294901760, %v3482_v22  ;;  %v9803_v24 = vand.u32 4294901760, %v7647_v10  ;;  %v7720_v53 = vsub.f32 %v2994_v21, %v7684_v1  ;;  %3105 = vmatprep.subr.mxu0 %v7395_v20 }
 0x27c   :  { %3454 = vmatprep.subr.mxu1 %v3453_v43  ;;  %9802 = vst [vmem:[#allocation144_spill] sm:$0xff] %v7712_v18  ;;  %v3489_v5 = vand.u32 4294901760, %v3488_v51  ;;  %v9805_v40 = vand.u32 4294901760, %v7657_v6  ;;  %v7728_v22 = vsub.f32 %v2993_v39, %v7694_v19  ;;  %v9807_v21 = vand.u32 4294901760, %v7665_v42  ;;  %3107 = vmatpush2.msra.mxu0 %v7409_v33 }
 0x27d   :  { %3460 = vmatpush2.msra.mxu1 %v3459_v27  ;;  %v3506_v43 = vsub.f32 %v7647_v10, %v9803_v24  ;;  %9804 = vst [vmem:[#allocation145_spill] sm:$0xff] %v7720_v53  ;;  %v3495_v24 = vand.u32 4294901760, %v3494_v15  ;;  %v7736_v51 = vsub.f32 %v2992_v0, %v7704_v29  ;;  %v9809_v39 = vand.u32 4294901760, %v7675_v62  ;;  %3109 = vmatprep.subr.mxu0 %v7423_v41 }
 0x27e   :  { %3466 = vmatprep.subr.mxu1 %v3465_v26  ;;  %v3512_v27 = vsub.f32 %v7657_v6, %v9805_v40  ;;  %9806 = vst [vmem:[#allocation146_spill] sm:$0xff] %v7728_v22  ;;  %v3518_v26 = vsub.f32 %v7665_v42, %v9807_v21  ;;  %v3501_v40 = vand.u32 4294901760, %v3500_v63  ;;  %v9810_v21 = vand.u32 4294901760, %v7682_v3  ;;  %3111 = vmatpush2.msra.mxu0 %v7433_v49 }
 0x27f   :  { %3472 = vmatpush2.msra.mxu1 %v3471_v48  ;;  %9808 = vst [vmem:[#allocation119_spill] sm:$0xff] %v7736_v51  ;;  %v3524_v48 = vsub.f32 %v7675_v62, %v9809_v39  ;;  %v3507_v15 = vand.u32 4294901760, %v3506_v43  ;;  %v9811_v63 = vand.u32 4294901760, %v7692_v55  ;;  %3113 = vmatprep.subr.mxu0 %v7447_v56  ;;  %v9812_v43 = vand.u32 4294901760, %v7702_v58 }
 0x280   :  { %3478 = vmatprep.subr.mxu1 %v3477_v8  ;;  %v3530_v30 = vsub.f32 %v7682_v3, %v9810_v21  ;;  %v3513_v8 = vand.u32 4294901760, %v3512_v27  ;;  %v8769_v0 = vand.u32 4294901760, %v7736_v51  ;;  %3115 = vmatpush2.msra.mxu0 %v7457_v60  ;;  %v9813_v27 = vand.u32 4294901760, %v7712_v18 }
 0x281   :  { %3484 = vmatpush2.msra.mxu1 %v3483_v36  ;;  %v3536_v39 = vsub.f32 %v7692_v55, %v9811_v63  ;;  %v3519_v36 = vand.u32 4294901760, %v3518_v26  ;;  %v3542_v21 = vsub.f32 %v7702_v58, %v9812_v43  ;;  %3117 = vmatprep.subr.mxu0 %v7484_v23  ;;  %v9814_v26 = vand.u32 4294901760, %v7720_v53 }
 0x282   :  { %3490 = vmatprep.subr.mxu1 %v3489_v5  ;;  %v3525_v5 = vand.u32 4294901760, %v3524_v48  ;;  %v3548_v63 = vsub.f32 %v7712_v18, %v9813_v27  ;;  %3119 = vmatpush2.msra.mxu0 %v7511_v52 }
 0x283   :  { %3496 = vmatpush2.msra.mxu1 %v3495_v24  ;;  %v3531_v24 = vand.u32 4294901760, %v3530_v30  ;;  %v3554_v4 = vsub.f32 %v7720_v53, %v9814_v26  ;;  %v3537_v43 = vand.u32 4294901760, %v3536_v39  ;;  %3121 = vmatprep.subr.mxu0 %v7523_v35  ;;  %v3543_v27 = vand.u32 4294901760, %v3542_v21  ;;  %v9817_v21 = vld [vmem:[#allocation27_spill] sm:$0xff]  ;;  %v9821_v26 = vld [vmem:[#allocation21_spill] sm:$0xff] }
 0x284   :  { %3502 = vmatprep.subr.mxu1 %v3501_v40  ;;  %v9815_v40 = vand.u32 4294901760, %v7728_v22  ;;  %v3566_v30 = vsub.f32 %v7736_v51, %v8769_v0  ;;  %3123 = vmatpush2.msra.mxu0 %v7548_v28  ;;  %v9831_v0 = vld [vmem:[#allocation123_spill] sm:$0xff]  ;;  %v9836_v51 = vld [vmem:[#allocation44_spill] sm:$0xff] }
 0x285   :  { %3508 = vmatpush2.msra.mxu1 %v3507_v15  ;;  %v3549_v15 = vand.u32 4294901760, %v3548_v63  ;;  %3125 = vmatprep.subr.mxu0 %v7575_v2  ;;  %v9819_v63 = vld [vmem:[#allocation72_spill] sm:$0xff] }
 0x286   :  { %3514 = vmatprep.subr.mxu1 %v3513_v8  ;;  %v3560_v48 = vsub.f32 %v7728_v22, %v9815_v40  ;;  %v3555_v8 = vand.u32 4294901760, %v3554_v4  ;;  %3127 = vmatpush2.msra.mxu0 %v7587_v9  ;;  %v9816_v4 = vld [vmem:[#allocation110_spill] sm:$0xff]  ;;  %v9823_v40 = vld [vmem:[#allocation99_spill] sm:$0xff] }
 0x287   :  { %3520 = vmatpush2.msra.mxu1 %v3519_v36  ;;  %3129 = vmatprep.subr.mxu0 %v7601_v38  ;;  %v3567_v36 = vand.u32 4294901760, %v3566_v30  ;;  %v9826_v30 = vld [vmem:[#allocation41_spill] sm:$0xff] }
 0x288   :  { %3526 = vmatprep.subr.mxu1 %v3525_v5  ;;  %v3561_v39 = vand.u32 4294901760, %v3560_v48  ;;  %3131 = vmatpush2.msra.mxu0 %v7611_v59  ;;  %v9818_v5 = vld [vmem:[#allocation113_spill] sm:$0xff] }
 0x289   :  { %3532 = vmatpush2.msra.mxu1 %v3531_v24  ;;  %3133 = vmatprep.subr.mxu0 %v7619_v17  ;;  %v9820_v24 = vld [vmem:[#allocation88_spill] sm:$0xff]  ;;  %v9824_v48 = vld [vmem:[#allocation105_spill] sm:$0xff] }
 0x28a   :  { %3538 = vmatprep.subr.mxu1 %v3537_v43  ;;  %3135 = vmatpush2.msra.mxu0 %v7631_v32  ;;  %v9822_v43 = vld [vmem:[#allocation114_spill] sm:$0xff] }
 0x28b   :  { %3544 = vmatpush2.msra.mxu1 %v3543_v27  ;;  %3137 = vmatprep.subr.mxu0 %v7639_v47  ;;  %v9825_v27 = vld [vmem:[#allocation115_spill] sm:$0xff] }
 0x28c   :  { %3550 = vmatprep.subr.mxu1 %v3549_v15  ;;  %3139 = vmatpush2.msra.mxu0 %v7649_v46  ;;  %v9827_v15 = vld [vmem:[#allocation46_spill] sm:$0xff] }
 0x28d   :  { %3556 = vmatpush2.msra.mxu1 %v3555_v8  ;;  %3141 = vmatprep.subr.mxu0 %v7659_v44  ;;  %v9828_v8 = vld [vmem:[#allocation120_spill] sm:$0xff] }
 0x28e   :  { %3562 = vmatprep.subr.mxu1 %v3561_v39  ;;  %3143 = vmatpush2.msra.mxu0 %v7667_v14  ;;  %v9829_v39 = vld [vmem:[#allocation76_spill] sm:$0xff] }
 0x28f   :  { %3568 = vmatpush2.msra.mxu1 %v3567_v36  ;;  %3145 = vmatprep.subr.mxu0 %v7677_v16  ;;  %v9830_v36 = vld [vmem:[#allocation53_spill] sm:$0xff] }
 0x290   :  { %3572 = vmatmul.mubr.f32.vlgmr.msra.gmra.mxu1 %v9816_v4  ;;  %3800 = vmatprep.subr.mxu1 %v9817_v21  ;;  %v9835_v4 = vld [vmem:[#allocation56_spill] sm:$0xff] }
 0x291   :  { %3578 = vmatprep.mubr.f32.mxu1 %v9818_v5  ;;  %3802 = vmatpush1.msra.mxu1 %v9819_v63  ;;  %v9833_v5 = vld [vmem:[#allocation65_spill] sm:$0xff] }
 0x292   :  { %3804 = vmatprep.subr.mxu1 %v9820_v24  ;;  %3147 = vmatpush2.msra.mxu0 %v7684_v1 }
 0x293   :  { %3806 = vmatpush1.msra.mxu1 %v9821_v26  ;;  %3149 = vmatprep.subr.mxu0 %v7694_v19 }
 0x294   :  { %3580 = vmatmul.mubr.f32.gmra.mxu1 %v9822_v43  ;;  %3808 = vmatprep.subr.mxu1 %v9823_v40  ;;  %v9832_v43 = vld [vmem:[#allocation86_spill] sm:$0xff] }
 0x295   :  { %3810 = vmatpush1.msra.mxu1 %v9824_v48  ;;  %3930 = vmatprep.mubr.f32.mxu1 %v9825_v27  ;;  %v9834_v27 = vld [vmem:[#allocation40_spill] sm:$0xff] }
 0x296   :  { %3812 = vmatprep.subr.mxu1 %v9826_v30  ;;  %3151 = vmatpush2.msra.mxu0 %v7704_v29  ;;  %v9837_v30 = vld [vmem:[#allocation60_spill] sm:$0xff] }
 0x297   :  { %3814 = vmatpush1.msra.mxu1 %v9827_v15  ;;  %3163 = vmatmul.mubr.f32.vlgmr.msra.gmra.mxu0 %v9828_v8  ;;  %v9838_v15 = vld [vmem:[#allocation124_spill] sm:$0xff]  ;;  %v9839_v8 = vld [vmem:[#allocation47_spill] sm:$0xff] }
 0x298   :  { %3588 = vmatprep.subr.mxu0 %v9829_v39  ;;  %3816 = vmatprep.subr.mxu1 %v9830_v36  ;;  %v9840_v39 = vld [vmem:[#allocation62_spill] sm:$0xff] }
 0x299   :  { %3173 = vmatprep.mubr.f32.mxu0 %v9831_v0  ;;  %3591 = vmatpush1.msra.mxu0 %v9832_v43  ;;  %v9841_v36 = vld [vmem:[#allocation54_spill] sm:$0xff]  ;;  %v9842_v0 = vld [vmem:[#allocation111_spill] sm:$0xff] }
 0x29a   :  { %3818 = vmatpush1.msra.mxu1 %v9833_v5  ;;  %3594 = vmatprep.subr.mxu0 %v9834_v27  ;;  %v9843_v43 = vld [vmem:[#allocation70_spill] sm:$0xff] }
 0x29b   :  { %3820 = vmatprep.subr.mxu1 %v9835_v4  ;;  %3597 = vmatpush1.msra.mxu0 %v9836_v51  ;;  %v9844_v5 = vld [vmem:[#allocation66_spill] sm:$0xff]  ;;  %v9846_v4 = vld [vmem:[#allocation63_spill] sm:$0xff] }
 0x29c   :  { %3822 = vmatpush1.msra.mxu1 %v9837_v30  ;;  %3179 = vmatmul.mubr.f32.gmra.mxu0 %v9838_v15  ;;  %v9845_v27 = vld [vmem:[#allocation82_spill] sm:$0xff]  ;;  %v9847_v30 = vld [vmem:[#allocation71_spill] sm:$0xff] }
 0x29d   :  { %3600 = vmatprep.subr.mxu0 %v9839_v8  ;;  %3824 = vmatprep.subr.mxu1 %v9840_v39  ;;  %v9848_v15 = vld [vmem:[#allocation83_spill] sm:$0xff] }
 0x29e   :  { %3603 = vmatpush1.msra.mxu0 %v9841_v36  ;;  %3780 = vmatprep.mubr.f32.mxu0 %v9842_v0  ;;  %v9849_v36 = vld [vmem:[#allocation85_spill] sm:$0xff]  ;;  %v9850_v0 = vld [vmem:[#allocation79_spill] sm:$0xff] }
 0x29f   :  { %3826 = vmatpush1.msra.mxu1 %v9843_v43  ;;  %3606 = vmatprep.subr.mxu0 %v9844_v5  ;;  %v9851_v5 = vld [vmem:[#allocation75_spill] sm:$0xff] }
 0x2a0   :  { %3828 = vmatprep.subr.mxu1 %v9845_v27  ;;  %3609 = vmatpush1.msra.mxu0 %v9846_v4  ;;  %v9852_v27 = vld [vmem:[#allocation96_spill] sm:$0xff] }
 0x2a1   :  { %3830 = vmatpush1.msra.mxu1 %v6964_v31  ;;  %3612 = vmatprep.subr.mxu0 %v9847_v30  ;;  %v9853_v31 = vld [vmem:[#allocation98_spill] sm:$0xff]  ;;  %v9854_v30 = vld [vmem:[#allocation101_spill] sm:$0xff] }
 0x2a2   :  { %3832 = vmatprep.subr.mxu1 %v6978_v11  ;;  %3615 = vmatpush1.msra.mxu0 %v9848_v15  ;;  %v9855_v11 = vld [vmem:[#allocation125_spill] sm:$0xff] }
 0x2a3   :  { %3834 = vmatpush1.msra.mxu1 %v6990_v34  ;;  %3618 = vmatprep.subr.mxu0 %v9849_v36  ;;  %v9856_v34 = vld [vmem:[#allocation128_spill] sm:$0xff] }
 0x2a4   :  { %3836 = vmatprep.subr.mxu1 %v7062_v45  ;;  %3621 = vmatpush1.msra.mxu0 %v9850_v0  ;;  %v9857_v36 = vld [vmem:[#allocation92_spill] sm:$0xff]  ;;  %v9858_v45 = vld [vmem:[#allocation133_spill] sm:$0xff]  ;;  %v9859_v0 = vld [vmem:[#allocation95_spill] sm:$0xff] }
 0x2a5   :  { %3838 = vmatpush1.msra.mxu1 %v9851_v5  ;;  %3624 = vmatprep.subr.mxu0 %v9852_v27  ;;  %v9860_v5 = vld [vmem:[#allocation135_spill] sm:$0xff]  ;;  %v9861_v27 = vld [vmem:[#allocation29_spill] sm:$0xff] }
 0x2a6   :  { %3840 = vmatprep.subr.mxu1 %v7105_v61  ;;  %3627 = vmatpush1.msra.mxu0 %v9853_v31  ;;  %v9862_v61 = vld [vmem:[#allocation94_spill] sm:$0xff]  ;;  %v9863_v31 = vld [vmem:[#allocation32_spill] sm:$0xff] }
 0x2a7   :  { %3842 = vmatpush1.msra.mxu1 %v9854_v30  ;;  %3630 = vmatprep.subr.mxu0 %v9855_v11  ;;  %v9864_v30 = vld [vmem:[#allocation87_spill] sm:$0xff]  ;;  %v9865_v11 = vld [vmem:[#allocation25_spill] sm:$0xff] }
 0x2a8   :  { %3844 = vmatprep.subr.mxu1 %v7141_v57  ;;  %3633 = vmatpush1.msra.mxu0 %v9856_v34  ;;  %v9866_v57 = vld [vmem:[#allocation90_spill] sm:$0xff]  ;;  %v9867_v34 = vld [vmem:[#allocation35_spill] sm:$0xff] }
 0x2a9   :  { %3846 = vmatpush1.msra.mxu1 %v9857_v36  ;;  %3636 = vmatprep.subr.mxu0 %v9858_v45  ;;  %v9868_v36 = vld [vmem:[#allocation108_spill] sm:$0xff]  ;;  %v9869_v45 = vld [vmem:[#allocation26_spill] sm:$0xff] }
 0x2aa   :  { %3848 = vmatprep.subr.mxu1 %v9859_v0  ;;  %3639 = vmatpush1.msra.mxu0 %v9860_v5  ;;  %v9870_v0 = vld [vmem:[#allocation102_spill] sm:$0xff]  ;;  %v9871_v5 = vld [vmem:[#allocation23_spill] sm:$0xff] }
 0x2ab   :  { %3850 = vmatpush1.msra.mxu1 %v9861_v27  ;;  %3642 = vmatprep.subr.mxu0 %v9862_v61  ;;  %v9872_v27 = vld [vmem:[#allocation104_spill] sm:$0xff]  ;;  %v9873_v61 = vld [vmem:[#allocation43_spill] sm:$0xff] }
 0x2ac   :  { %3852 = vmatprep.subr.mxu1 %v9863_v31  ;;  %3645 = vmatpush1.msra.mxu0 %v9864_v30  ;;  %v9874_v31 = vld [vmem:[#allocation107_spill] sm:$0xff]  ;;  %v9875_v30 = vld [vmem:[#allocation24_spill] sm:$0xff] }
 0x2ad   :  { %3854 = vmatpush1.msra.mxu1 %v9865_v11  ;;  %3648 = vmatprep.subr.mxu0 %v9866_v57  ;;  %v9876_v11 = vld [vmem:[#allocation20_spill] sm:$0xff]  ;;  %v9877_v57 = vld [vmem:[#allocation34_spill] sm:$0xff] }
 0x2ae   :  { %3856 = vmatprep.subr.mxu1 %v9867_v34  ;;  %3651 = vmatpush1.msra.mxu0 %v9868_v36  ;;  %v9878_v34 = vld [vmem:[#allocation22_spill] sm:$0xff] }
 0x2af   :  { %3858 = vmatpush1.msra.mxu1 %v9869_v45  ;;  %3654 = vmatprep.subr.mxu0 %v9870_v0  ;;  %v9879_v45 = vld [vmem:[#allocation36_spill] sm:$0xff] }
 0x2b0   :  { %3860 = vmatprep.subr.mxu1 %v9871_v5  ;;  %3657 = vmatpush1.msra.mxu0 %v9872_v27  ;;  %v9880_v5 = vld [vmem:[#allocation39_spill] sm:$0xff] }
 0x2b1   :  { %3862 = vmatpush1.msra.mxu1 %v9873_v61  ;;  %3660 = vmatprep.subr.mxu0 %v9874_v31  ;;  %v9881_v27 = vld [vmem:[#allocation31_spill] sm:$0xff]  ;;  %v9882_v61 = vld [vmem:[#allocation33_spill] sm:$0xff] }
 0x2b2   :  { %3864 = vmatprep.subr.mxu1 %v9875_v30  ;;  %3663 = vmatpush1.msra.mxu0 %v9876_v11  ;;  %v9883_v30 = vld [vmem:[#allocation45_spill] sm:$0xff] }
 0x2b3   :  { %3866 = vmatpush2.msra.mxu1 %v9877_v57  ;;  %3666 = vmatprep.subr.mxu0 %v9878_v34  ;;  %v9884_v57 = vld [vmem:[#allocation48_spill] sm:$0xff] }
 0x2b4   :  { %3868 = vmatprep.subr.mxu1 %v7324_v54  ;;  %3669 = vmatpush1.msra.mxu0 %v9879_v45  ;;  %v9885_v54 = vld [vmem:[#allocation28_spill] sm:$0xff] }
 0x2b5   :  { %3870 = vmatpush2.msra.mxu1 %v7336_v25  ;;  %3672 = vmatprep.subr.mxu0 %v9880_v5  ;;  %v9886_v25 = vld [vmem:[#allocation50_spill] sm:$0xff] }
 0x2b6   :  { %3872 = vmatprep.subr.mxu1 %v9881_v27  ;;  %3675 = vmatpush1.msra.mxu0 %v9882_v61  ;;  %v9887_v27 = vld [vmem:[#allocation37_spill] sm:$0xff] }
 0x2b7   :  { %3874 = vmatpush2.msra.mxu1 %v7361_v37  ;;  %3678 = vmatprep.subr.mxu0 %v9883_v30  ;;  %v9888_v37 = vld [vmem:[#allocation38_spill] sm:$0xff] }
 0x2b8   :  { %3876 = vmatprep.subr.mxu1 %v7371_v7  ;;  %3681 = vmatpush1.msra.mxu0 %v9884_v57  ;;  %v9889_v7 = vld [vmem:[#allocation59_spill] sm:$0xff] }
 0x2b9   :  { %3878 = vmatpush2.msra.mxu1 %v7385_v50  ;;  %3684 = vmatprep.subr.mxu0 %v9885_v54  ;;  %v9890_v50 = vld [vmem:[#allocation42_spill] sm:$0xff] }
 0x2ba   :  { %3880 = vmatprep.subr.mxu1 %v7395_v20  ;;  %3687 = vmatpush2.msra.mxu0 %v9886_v25  ;;  %v9891_v20 = vld [vmem:[#allocation57_spill] sm:$0xff] }
 0x2bb   :  { %3882 = vmatpush2.msra.mxu1 %v7409_v33  ;;  %3690 = vmatprep.subr.mxu0 %v9887_v27  ;;  %v9892_v33 = vld [vmem:[#allocation58_spill] sm:$0xff] }
 0x2bc   :  { %3884 = vmatprep.subr.mxu1 %v7423_v41  ;;  %3693 = vmatpush2.msra.mxu0 %v9888_v37  ;;  %v9893_v41 = vld [vmem:[#allocation69_spill] sm:$0xff] }
 0x2bd   :  { %3886 = vmatpush2.msra.mxu1 %v7433_v49  ;;  %3696 = vmatprep.subr.mxu0 %v9889_v7  ;;  %v9894_v49 = vld [vmem:[#allocation77_spill] sm:$0xff] }
 0x2be   :  { %3888 = vmatprep.subr.mxu1 %v7447_v56  ;;  %3699 = vmatpush2.msra.mxu0 %v9890_v50  ;;  %v9895_v56 = vld [vmem:[#allocation81_spill] sm:$0xff] }
 0x2bf   :  { %3890 = vmatpush2.msra.mxu1 %v7457_v60  ;;  %3702 = vmatprep.subr.mxu0 %v9891_v20  ;;  %v9896_v60 = vld [vmem:[#allocation74_spill] sm:$0xff] }
 0x2c0   :  { %3892 = vmatprep.subr.mxu1 %v7484_v23  ;;  %3705 = vmatpush2.msra.mxu0 %v9892_v33  ;;  %v9897_v23 = vld [vmem:[#allocation89_spill] sm:$0xff] }
 0x2c1   :  { %3894 = vmatpush2.msra.mxu1 %v7511_v52  ;;  %3708 = vmatprep.subr.mxu0 %v9893_v41  ;;  %v9898_v52 = vld [vmem:[#allocation93_spill] sm:$0xff] }
 0x2c2   :  { %3896 = vmatprep.subr.mxu1 %v7523_v35  ;;  %3711 = vmatpush2.msra.mxu0 %v9894_v49  ;;  %v9899_v35 = vld [vmem:[#allocation106_spill] sm:$0xff] }
 0x2c3   :  { %3898 = vmatpush2.msra.mxu1 %v7548_v28  ;;  %3714 = vmatprep.subr.mxu0 %v9895_v56  ;;  %v9900_v28 = vld [vmem:[#allocation130_spill] sm:$0xff] }
 0x2c4   :  { %3900 = vmatprep.subr.mxu1 %v7575_v2  ;;  %3717 = vmatpush2.msra.mxu0 %v9896_v60  ;;  %v9901_v2 = vld [vmem:[#allocation131_spill] sm:$0xff] }
 0x2c5   :  { %3902 = vmatpush2.msra.mxu1 %v7587_v9  ;;  %3720 = vmatprep.subr.mxu0 %v9897_v23  ;;  %v9902_v9 = vld [vmem:[#allocation137_spill] sm:$0xff] }
 0x2c6   :  { %3904 = vmatprep.subr.mxu1 %v7601_v38  ;;  %3723 = vmatpush2.msra.mxu0 %v9898_v52  ;;  %v9903_v38 = vld [vmem:[#allocation138_spill] sm:$0xff] }
 0x2c7   :  { %3906 = vmatpush2.msra.mxu1 %v7611_v59  ;;  %3726 = vmatprep.subr.mxu0 %v9899_v35 }
 0x2c8   :  { %3908 = vmatprep.subr.mxu1 %v7619_v17  ;;  %3729 = vmatpush2.msra.mxu0 %v9900_v28 }
 0x2c9   :  { %3910 = vmatpush2.msra.mxu1 %v7631_v32  ;;  %3732 = vmatprep.subr.mxu0 %v9901_v2 }
 0x2ca   :  { %3912 = vmatprep.subr.mxu1 %v7639_v47  ;;  %3735 = vmatpush2.msra.mxu0 %v9902_v9 }
 0x2cb   :  { %3914 = vmatpush2.msra.mxu1 %v7649_v46  ;;  %3738 = vmatprep.subr.mxu0 %v9903_v38 }
 0x2cc   :  { %3916 = vmatprep.subr.mxu1 %v7659_v44  ;;  %3741 = vmatpush2.msra.mxu0 %v7629_v13  ;;  %v9904_v13 = vld [vmem:[#allocation116_spill] sm:$0xff] }
 0x2cd   :  { %3918 = vmatpush2.msra.mxu1 %v7667_v14  ;;  %3744 = vmatprep.subr.mxu0 %v7637_v12 }
 0x2ce   :  { %3920 = vmatprep.subr.mxu1 %v7677_v16  ;;  %3747 = vmatpush2.msra.mxu0 %v7647_v10  ;;  %v9905_v16 = vld [vmem:[#allocation121_spill] sm:$0xff] }
 0x2cf   :  { %3922 = vmatpush2.msra.mxu1 %v7684_v1  ;;  %3750 = vmatprep.subr.mxu0 %v7657_v6 }
 0x2d0   :  { %3924 = vmatprep.subr.mxu1 %v7694_v19  ;;  %3753 = vmatpush2.msra.mxu0 %v7665_v42 }
 0x2d1   :  { %3926 = vmatpush2.msra.mxu1 %v7704_v29  ;;  %3756 = vmatprep.subr.mxu0 %v7675_v62  ;;  %v9906_v62 = vld [vmem:[#allocation122_spill] sm:$0xff] }
 0x2d2   :  { %3934 = vmatmul.mubr.f32.vlgmr.msra.gmra.mxu1 %v9904_v13  ;;  %4226 = vmatprep.subr.mxu1 %v9817_v21  ;;  %v9907_v13 = vld [vmem:[#allocation109_spill] sm:$0xff]  ;;  %v9909_v21 = vld [vmem:[#allocation119_spill] sm:$0xff] }
 0x2d3   :  { %3759 = vmatpush2.msra.mxu0 %v7682_v3  ;;  %3942 = vmatprep.mubr.f32.mxu1 %v9905_v16  ;;  %v9908_v16 = vld [vmem:[#allocation41_spill] sm:$0xff] }
 0x2d4   :  { %4228 = vmatpush1.msra.mxu1 %v9819_v63  ;;  %3762 = vmatprep.subr.mxu0 %v7692_v55  ;;  %v9910_v63 = vld [vmem:[#allocation46_spill] sm:$0xff] }
 0x2d5   :  { %4230 = vmatprep.subr.mxu1 %v9820_v24  ;;  %3765 = vmatpush2.msra.mxu0 %v7702_v58  ;;  %v9911_v24 = vld [vmem:[#allocation112_spill] sm:$0xff]  ;;  %v9918_v58 = vld [vmem:[#allocation65_spill] sm:$0xff] }
 0x2d6   :  { %4232 = vmatpush1.msra.mxu1 %v9821_v26  ;;  %3768 = vmatprep.subr.mxu0 %v7712_v18  ;;  %v9912_v26 = vld [vmem:[#allocation76_spill] sm:$0xff] }
 0x2d7   :  { %3946 = vmatmul.mubr.f32.gmra.mxu1 %v9906_v62  ;;  %4234 = vmatprep.subr.mxu1 %v9823_v40  ;;  %v9913_v62 = vand.u32 4294901760, %v9912_v26  ;;  %v9914_v40 = vld [vmem:[#allocation53_spill] sm:$0xff]  ;;  %v9924_v26 = vld [vmem:[#allocation118_spill] sm:$0xff] }
 0x2d8   :  { %3771 = vmatpush2.msra.mxu0 %v7720_v53  ;;  %4236 = vmatpush1.msra.mxu1 %v9824_v48  ;;  %v9915_v53 = vld [vmem:[#allocation117_spill] sm:$0xff]  ;;  %v9916_v48 = vld [vmem:[#allocation86_spill] sm:$0xff] }
 0x2d9   :  { %4354 = vmatprep.mubr.f32.mxu1 %v9907_v13  ;;  %3774 = vmatprep.subr.mxu0 %v7728_v22  ;;  %v9917_v18 = vand.u32 4294901760, %v9916_v48  ;;  %v9919_v22 = vld [vmem:[#allocation40_spill] sm:$0xff] }
 0x2da   :  { %4238 = vmatprep.subr.mxu1 %v9908_v16  ;;  %3777 = vmatpush2.msra.mxu0 %v9909_v21  ;;  %v9920_v16 = vand.u32 4294901760, %v9919_v22  ;;  %v9921_v21 = vld [vmem:[#allocation56_spill] sm:$0xff] }
 0x2db   :  { %4240 = vmatpush1.msra.mxu1 %v9910_v63  ;;  %3783 = vmatmul.mubr.f32.vlgmr.msra.gmra.mxu0 %v9911_v24  ;;  %v9922_v63 = vand.u32 4294901760, %v9836_v51  ;;  %v9923_v24 = vld [vmem:[#allocation60_spill] sm:$0xff]  ;;  %v9930_v51 = vld [vmem:[#allocation82_spill] sm:$0xff] }
 0x2dc   :  { %3955 = vmatprep.subr.mxu0 %v9913_v62  ;;  %4242 = vmatprep.subr.mxu1 %v9914_v40  ;;  %v9925_v62 = vand.u32 4294901760, %v9839_v8  ;;  %v9932_v40 = vld [vmem:[#allocation100_spill] sm:$0xff]  ;;  %v9933_v8 = vld [vmem:[#allocation71_spill] sm:$0xff] }
 0x2dd   :  { %3790 = vmatprep.mubr.f32.mxu0 %v9915_v53  ;;  %3959 = vmatpush1.msra.mxu0 %v9917_v18  ;;  %v9926_v18 = vld [vmem:[#allocation54_spill] sm:$0xff]  ;;  %v9934_v48 = vand.u32 4294901760, %v9933_v8  ;;  %v9952_v8 = vld [vmem:[#allocation103_spill] sm:$0xff] }
 0x2de   :  { %4244 = vmatpush1.msra.mxu1 %v9918_v58  ;;  %3963 = vmatprep.subr.mxu0 %v9920_v16  ;;  %v9927_v53 = vand.u32 4294901760, %v9926_v18  ;;  %v9928_v58 = vld [vmem:[#allocation66_spill] sm:$0xff]  ;;  %v9936_v16 = vand.u32 4294901760, %v9848_v15  ;;  %v9944_v18 = vld [vmem:[#allocation96_spill] sm:$0xff] }
 0x2df   :  { %4246 = vmatprep.subr.mxu1 %v9921_v21  ;;  %3967 = vmatpush1.msra.mxu0 %v9922_v63  ;;  %v9929_v22 = vand.u32 4294901760, %v9928_v58  ;;  %v9931_v21 = vand.u32 4294901760, %v9846_v4  ;;  %v9946_v58 = vld [vmem:[#allocation78_spill] sm:$0xff] }
 0x2e0   :  { %4248 = vmatpush1.msra.mxu1 %v9923_v24  ;;  %3793 = vmatmul.mubr.f32.gmra.mxu0 %v9924_v26  ;;  %v9940_v24 = vld [vmem:[#allocation136_spill] sm:$0xff]  ;;  %v9941_v26 = vld [vmem:[#allocation79_spill] sm:$0xff] }
 0x2e1   :  { %3971 = vmatprep.subr.mxu0 %v9925_v62  ;;  %4250 = vmatprep.subr.mxu1 %v9840_v39  ;;  %v9935_v39 = vld [vmem:[#allocation126_spill] sm:$0xff]  ;;  %v9942_v4 = vand.u32 4294901760, %v9941_v26  ;;  %v9943_v62 = vld [vmem:[#allocation75_spill] sm:$0xff] }
 0x2e2   :  { %3975 = vmatpush1.msra.mxu0 %v9927_v53  ;;  %4209 = vmatprep.mubr.f32.mxu0 %v9907_v13  ;;  %v9937_v13 = vld [vmem:[#allocation127_spill] sm:$0xff]  ;;  %v9945_v53 = vand.u32 4294901760, %v9944_v18 }
 0x2e3   :  { %4252 = vmatpush1.msra.mxu1 %v9843_v43  ;;  %3979 = vmatprep.subr.mxu0 %v9929_v22  ;;  %v9938_v43 = vld [vmem:[#allocation85_spill] sm:$0xff]  ;;  %v9947_v22 = vld [vmem:[#allocation98_spill] sm:$0xff] }
 0x2e4   :  { %4254 = vmatprep.subr.mxu1 %v9930_v51  ;;  %3983 = vmatpush1.msra.mxu0 %v9931_v21  ;;  %v9939_v63 = vand.u32 4294901760, %v9938_v43  ;;  %v9948_v15 = vand.u32 4294901760, %v9947_v22  ;;  %v9949_v51 = vld [vmem:[#allocation101_spill] sm:$0xff] }
 0x2e5   :  { %4256 = vmatpush1.msra.mxu1 %v9932_v40  ;;  %3987 = vmatprep.subr.mxu0 %v9934_v48  ;;  %v9950_v21 = vld [vmem:[#allocation125_spill] sm:$0xff]  ;;  %v9953_v48 = vld [vmem:[#allocation128_spill] sm:$0xff] }
 0x2e6   :  { %4258 = vmatprep.subr.mxu1 %v9935_v39  ;;  %3991 = vmatpush1.msra.mxu0 %v9936_v16  ;;  %v9951_v40 = vand.u32 4294901760, %v9950_v21  ;;  %v9954_v39 = vand.u32 4294901760, %v9953_v48  ;;  %v9955_v16 = vld [vmem:[#allocation92_spill] sm:$0xff]  ;;  %v9972_v48 = vld [vmem:[#allocation26_spill] sm:$0xff] }
 0x2e7   :  { %4260 = vmatpush1.msra.mxu1 %v9937_v13  ;;  %3995 = vmatprep.subr.mxu0 %v9939_v63  ;;  %v9956_v13 = vld [vmem:[#allocation133_spill] sm:$0xff]  ;;  %v9958_v63 = vld [vmem:[#allocation95_spill] sm:$0xff] }
 0x2e8   :  { %4262 = vmatprep.subr.mxu1 %v9940_v24  ;;  %3999 = vmatpush1.msra.mxu0 %v9942_v4  ;;  %v9957_v43 = vand.u32 4294901760, %v9956_v13  ;;  %v9959_v24 = vld [vmem:[#allocation135_spill] sm:$0xff]  ;;  %v9961_v4 = vld [vmem:[#allocation29_spill] sm:$0xff] }
 0x2e9   :  { %4264 = vmatpush1.msra.mxu1 %v9943_v62  ;;  %4003 = vmatprep.subr.mxu0 %v9945_v53  ;;  %v9960_v26 = vand.u32 4294901760, %v9959_v24  ;;  %v9962_v62 = vld [vmem:[#allocation94_spill] sm:$0xff]  ;;  %v9964_v53 = vld [vmem:[#allocation32_spill] sm:$0xff]  ;;  %v9974_v13 = vld [vmem:[#allocation23_spill] sm:$0xff] }
 0x2ea   :  { %4266 = vmatprep.subr.mxu1 %v9946_v58  ;;  %4007 = vmatpush1.msra.mxu0 %v9948_v15  ;;  %v9963_v18 = vand.u32 4294901760, %v9962_v62  ;;  %v9965_v58 = vld [vmem:[#allocation87_spill] sm:$0xff]  ;;  %v9967_v15 = vld [vmem:[#allocation25_spill] sm:$0xff]  ;;  %v1750_v62 = vpop.f32.mrf.mxu0 }
 0x2eb   :  { %4268 = vmatpush1.msra.mxu1 %v9949_v51  ;;  %4011 = vmatprep.subr.mxu0 %v9951_v40  ;;  %v9966_v22 = vand.u32 4294901760, %v9965_v58  ;;  %v9968_v51 = vld [vmem:[#allocation90_spill] sm:$0xff]  ;;  %v9970_v40 = vld [vmem:[#allocation35_spill] sm:$0xff]  ;;  %v9983_v58 = vld [vmem:[#allocation49_spill] sm:$0xff] }
 0x2ec   :  { %4270 = vmatprep.subr.mxu1 %v9952_v8  ;;  %4015 = vmatpush1.msra.mxu0 %v9954_v39  ;;  %v9969_v21 = vand.u32 4294901760, %v9968_v51  ;;  %v9971_v8 = vand.u32 4294901760, %v9868_v36  ;;  %v9973_v39 = vand.u32 4294901760, %v9870_v0  ;;  %v9977_v24 = vld [vmem:[#allocation43_spill] sm:$0xff]  ;;  %v9980_v36 = vand.u32 4294901760, %v9876_v11 }
 0x2ed   :  { %4272 = vmatpush1.msra.mxu1 %v9955_v16  ;;  %4019 = vmatprep.subr.mxu0 %v9957_v43  ;;  %v2159_v16 = vpop.f32.mrf.mxu1  ;;  %v9975_v43 = vld [vmem:[#allocation104_spill] sm:$0xff]  ;;  %v9982_v0 = vand.u32 4294901760, %v9878_v34  ;;  %v9987_v51 = vld [vmem:[#allocation31_spill] sm:$0xff]  ;;  %v9988_v11 = vand.u32 4294901760, %v9882_v61  ;;  %v9990_v34 = vand.u32 4294901760, %v9883_v30  ;;  %v9996_v61 = vand.u32 4294901760, %v9886_v25 }
 0x2ee   :  { %4274 = vmatprep.subr.mxu1 %v9958_v63  ;;  %4023 = vmatpush1.msra.mxu0 %v9960_v26  ;;  %v9976_v63 = vand.u32 4294901760, %v9975_v43  ;;  %v9978_v26 = vand.u32 4294901760, %v9874_v31  ;;  %v9986_v31 = vand.u32 4294901760, %v9880_v5  ;;  %v9994_v5 = vand.u32 4294901760, %v9885_v54  ;;  %v10003_v25 = vld [vmem:[#allocation73_spill] sm:$0xff] }
 0x2ef   :  { %4276 = vmatpush1.msra.mxu1 %v9961_v4  ;;  %4027 = vmatprep.subr.mxu0 %v9963_v18  ;;  %v9979_v4 = vld [vmem:[#allocation24_spill] sm:$0xff]  ;;  %v9981_v18 = vld [vmem:[#allocation34_spill] sm:$0xff]  ;;  %v9998_v30 = vand.u32 4294901760, %v9887_v27  ;;  %v10002_v54 = vand.u32 4294901760, %v9889_v7  ;;  %v10009_v7 = vld [vmem:[#allocation97_spill] sm:$0xff] }
 0x2f0   :  { %4278 = vmatprep.subr.mxu1 %v9964_v53  ;;  %4031 = vmatpush1.msra.mxu0 %v9966_v22  ;;  %v2161_v53 = vpop.f32.mrf.mxu1  ;;  %v9984_v22 = vand.u32 4294901760, %v9879_v45  ;;  %v9992_v45 = vand.u32 4294901760, %v9884_v57  ;;  %v10000_v57 = vand.u32 4294901760, %v9888_v37  ;;  %v10005_v27 = vld [vmem:[#allocation80_spill] sm:$0xff]  ;;  %v10008_v37 = vand.u32 4294901760, %v9892_v33 }
 0x2f1   :  { %4280 = vmatpush1.msra.mxu1 %v9967_v15  ;;  %4035 = vmatprep.subr.mxu0 %v9969_v21  ;;  %v9985_v15 = vld [vmem:[#allocation30_spill] sm:$0xff]  ;;  %v1752_v21 = vpop.f32.mrf.mxu0  ;;  %v10016_v33 = vand.u32 4294901760, %v9896_v60  ;;  %v10022_v60 = vand.u32 4294901760, %v9900_v28 }
 0x2f2   :  { %4282 = vmatprep.subr.mxu1 %v9970_v40  ;;  %4039 = vmatpush1.msra.mxu0 %v9971_v8  ;;  %v9989_v40 = vld [vmem:[#allocation51_spill] sm:$0xff]  ;;  %v2167_v8 = vpop.f32.mrf.mxu1 }
 0x2f3   :  { %4284 = vmatpush1.msra.mxu1 %v9972_v48  ;;  %4043 = vmatprep.subr.mxu0 %v9973_v39  ;;  %v9991_v48 = vld [vmem:[#allocation52_spill] sm:$0xff]  ;;  %v9993_v39 = vld [vmem:[#allocation55_spill] sm:$0xff]  ;;  %v1766_v43 = vpop.f32.mrf.mxu0 }
 0x2f4   :  { %4286 = vmatprep.subr.mxu1 %v9974_v13  ;;  %4047 = vmatpush1.msra.mxu0 %v9976_v63  ;;  %v9995_v13 = vld [vmem:[#allocation61_spill] sm:$0xff]  ;;  %v9997_v63 = vld [vmem:[#allocation64_spill] sm:$0xff] }
 0x2f5   :  { %4288 = vmatpush1.msra.mxu1 %v9977_v24  ;;  %4051 = vmatprep.subr.mxu0 %v9978_v26  ;;  %v2169_v24 = vpop.f32.mrf.mxu1  ;;  %v9999_v26 = vld [vmem:[#allocation67_spill] sm:$0xff] }
 0x2f6   :  { %4290 = vmatprep.subr.mxu1 %v9979_v4  ;;  %4055 = vmatpush1.msra.mxu0 %v9980_v36  ;;  %v10001_v4 = vld [vmem:[#allocation68_spill] sm:$0xff] }
 0x2f7   :  { %4292 = vmatpush2.msra.mxu1 %v9981_v18  ;;  %4059 = vmatprep.subr.mxu0 %v9982_v0  ;;  %v2521_v36 = vpop.f32.mrf.mxu1  ;;  %v10004_v18 = vand.u32 4294901760, %v9890_v50  ;;  %v1768_v0 = vpop.f32.mrf.mxu0  ;;  %v10011_v50 = vld [vmem:[#allocation91_spill] sm:$0xff] }
 0x2f8   :  { %4294 = vmatprep.subr.mxu1 %v9983_v58  ;;  %4063 = vmatpush1.msra.mxu0 %v9984_v22  ;;  %v10006_v58 = vand.u32 4294901760, %v9891_v20  ;;  %v10007_v22 = vld [vmem:[#allocation84_spill] sm:$0xff]  ;;  %v10014_v20 = vand.u32 4294901760, %v9895_v56  ;;  %v10021_v56 = vand.u32 4294901760, %v9899_v35  ;;  %v10024_v35 = vand.u32 4294901760, %v9902_v9  ;;  %v10029_v9 = vld [vmem:[#allocation142_spill] sm:$0xff] }
 0x2f9   :  { %4296 = vmatpush2.msra.mxu1 %v9985_v15  ;;  %4067 = vmatprep.subr.mxu0 %v9986_v31  ;;  %v2370_v15 = vpop.f32.mrf.mxu0  ;;  %v10010_v31 = vand.u32 4294901760, %v9893_v41  ;;  %v10018_v41 = vand.u32 4294901760, %v9897_v23  ;;  %v10023_v23 = vand.u32 4294901760, %v9901_v2 }
 0x2fa   :  { %4298 = vmatprep.subr.mxu1 %v9987_v51  ;;  %4071 = vmatpush1.msra.mxu0 %v9988_v11  ;;  %v2523_v51 = vpop.f32.mrf.mxu1  ;;  %v10012_v11 = vand.u32 4294901760, %v9894_v49  ;;  %v10020_v49 = vand.u32 4294901760, %v9898_v52 }
 0x2fb   :  { %4300 = vmatpush2.msra.mxu1 %v9989_v40  ;;  %4075 = vmatprep.subr.mxu0 %v9990_v34  ;;  %v10013_v40 = vld [vmem:[#allocation129_spill] sm:$0xff]  ;;  %v10015_v34 = vld [vmem:[#allocation132_spill] sm:$0xff] }
 0x2fc   :  { %4302 = vmatprep.subr.mxu1 %v9991_v48  ;;  %4079 = vmatpush1.msra.mxu0 %v9992_v45  ;;  %v2372_v48 = vpop.f32.mrf.mxu0  ;;  %v10017_v45 = vld [vmem:[#allocation134_spill] sm:$0xff] }
 0x2fd   :  { %4304 = vmatpush2.msra.mxu1 %v9993_v39  ;;  %4083 = vmatprep.subr.mxu0 %v9994_v5  ;;  %v2533_v39 = vpop.f32.mrf.mxu1  ;;  %v10019_v5 = vld [vmem:[#allocation139_spill] sm:$0xff] }
 0x2fe   :  { %4306 = vmatprep.subr.mxu1 %v9995_v13  ;;  %4087 = vmatpush2.msra.mxu0 %v9996_v61  ;;  %v2160_v13 = vadd.f32 %v2159_v16, %v1750_v62  ;;  %v2380_v61 = vpop.f32.mrf.mxu0  ;;  %v2168_v16 = vadd.f32 %v2167_v8, %v1766_v43 }
 0x2ff   :  { %4308 = vmatpush2.msra.mxu1 %v9997_v63  ;;  %4091 = vmatprep.subr.mxu0 %v9998_v30  ;;  %v2162_v63 = vadd.f32 %v2161_v53, %v1752_v21  ;;  %v2535_v52 = vpop.f32.mrf.mxu1  ;;  %v2170_v53 = vadd.f32 %v2169_v24, %v1768_v0 }
 0x300   :  { %4310 = vmatprep.subr.mxu1 %v9999_v26  ;;  %4095 = vmatpush2.msra.mxu0 %v10000_v57  ;;  %v2371_v30 = vadd.f32 %v2370_v15, %v2160_v13  ;;  %v2382_v62 = vpop.f32.mrf.mxu0  ;;  %v2381_v21 = vadd.f32 %v2380_v61, %v2168_v16 }
 0x301   :  { %4312 = vmatpush2.msra.mxu1 %v10001_v4  ;;  %4099 = vmatprep.subr.mxu0 %v10002_v54  ;;  %v2373_v28 = vadd.f32 %v2372_v48, %v2162_v63  ;;  %v2383_v57 = vadd.f32 %v2382_v62, %v2170_v53 }
 0x302   :  { %4314 = vmatprep.subr.mxu1 %v10003_v25  ;;  %4103 = vmatpush2.msra.mxu0 %v10004_v18  ;;  %v2534_v25 = vadd.f32 %v2533_v39, %v2381_v21  ;;  %v10039_v18 = vld [vmem:[#allocation143_spill] sm:$0xff] }
 0x303   :  { %4316 = vmatpush2.msra.mxu1 %v10005_v27  ;;  %4107 = vmatprep.subr.mxu0 %v10006_v58  ;;  %v2524_v26 = vadd.f32 %v2523_v51, %v2373_v28  ;;  %v10040_v0 = vand.u32 4294901760, %v10039_v18  ;;  %v2536_v15 = vadd.f32 %v2535_v52, %v2383_v57 }
 0x304   :  { %4318 = vmatprep.subr.mxu1 %v10007_v22  ;;  %4111 = vmatpush2.msra.mxu0 %v10008_v37  ;;  %v2943_v2 = vpop.f32.mrf.mxu1  ;;  %v10041_v22 = vld [vmem:[#allocation144_spill] sm:$0xff] }
 0x305   :  { %4320 = vmatpush2.msra.mxu1 %v10009_v7  ;;  %4115 = vmatprep.subr.mxu0 %v10010_v31  ;;  %v10042_v37 = vand.u32 4294901760, %v10041_v22  ;;  %v10043_v7 = vld [vmem:[#allocation114_spill] sm:$0xff]  ;;  %v10044_v31 = vld [vmem:[#allocation145_spill] sm:$0xff] }
 0x306   :  { %4322 = vmatprep.subr.mxu1 %v10011_v50  ;;  %4119 = vmatpush2.msra.mxu0 %v10012_v11  ;;  %v10045_v51 = vand.u32 4294901760, %v10044_v31  ;;  %v10046_v50 = vld [vmem:[#allocation146_spill] sm:$0xff] }
 0x307   :  { %4324 = vmatpush2.msra.mxu1 %v10013_v40  ;;  %4123 = vmatprep.subr.mxu0 %v10014_v20  ;;  %v10047_v11 = vand.u32 4294901760, %v10046_v50 }
 0x308   :  { %4326 = vmatprep.subr.mxu1 %v10015_v34  ;;  %4127 = vmatpush2.msra.mxu0 %v10016_v33  ;;  %v10048_v33 = vld [vmem:[#allocation119_spill] sm:$0xff] }
 0x309   :  { %4328 = vmatpush2.msra.mxu1 %v10017_v45  ;;  %4131 = vmatprep.subr.mxu0 %v10018_v41  ;;  %v10049_v48 = vand.u32 4294901760, %v10048_v33 }
 0x30a   :  { %4330 = vmatprep.subr.mxu1 %v10019_v5  ;;  %4135 = vmatpush2.msra.mxu0 %v10020_v49 }
 0x30b   :  { %4332 = vmatpush2.msra.mxu1 %v7611_v59  ;;  %4139 = vmatprep.subr.mxu0 %v10021_v56  ;;  %v10025_v59 = vand.u32 4294901760, %v9903_v38  ;;  %v2522_v38 = vadd.f32 %v2521_v36, %v2371_v30  ;;  %v10037_v36 = vld [vmem:[#allocation113_spill] sm:$0xff] }
 0x30c   :  { %4334 = vmatprep.subr.mxu1 %v7619_v17  ;;  %4143 = vmatpush2.msra.mxu0 %v10022_v60 }
 0x30d   :  { %4336 = vmatpush2.msra.mxu1 %v7631_v32  ;;  %4147 = vmatprep.subr.mxu0 %v10023_v23  ;;  %v10026_v32 = vld [vmem:[#allocation140_spill] sm:$0xff] }
 0x30e   :  { %4338 = vmatprep.subr.mxu1 %v7639_v47  ;;  %4151 = vmatpush2.msra.mxu0 %v10024_v35  ;;  %v10027_v17 = vand.u32 4294901760, %v10026_v32  ;;  %v10028_v47 = vand.u32 4294901760, %v7637_v12  ;;  %v2945_v12 = vpop.f32.mrf.mxu1 }
 0x30f   :  { %4340 = vmatpush2.msra.mxu1 %v7649_v46  ;;  %4155 = vmatprep.subr.mxu0 %v10025_v59  ;;  %v10030_v46 = vand.u32 4294901760, %v7647_v10  ;;  %v10033_v10 = vld [vmem:[#allocation141_spill] sm:$0xff] }
 0x310   :  { %4342 = vmatprep.subr.mxu1 %v7659_v44  ;;  %4159 = vmatpush2.msra.mxu0 %v10027_v17  ;;  %v10031_v44 = vand.u32 4294901760, %v7657_v6  ;;  %v2798_v8 = vpop.f32.mrf.mxu0  ;;  %v10034_v24 = vand.u32 4294901760, %v10033_v10  ;;  %v10036_v6 = vand.u32 4294901760, %v7682_v3 }
 0x311   :  { %4344 = vmatpush2.msra.mxu1 %v7667_v14  ;;  %4163 = vmatprep.subr.mxu0 %v10028_v47  ;;  %v10032_v14 = vand.u32 4294901760, %v7665_v42  ;;  %v2799_v43 = vadd.f32 %v2798_v8, %v2522_v38  ;;  %v10038_v42 = vand.u32 4294901760, %v7692_v55 }
 0x312   :  { %4346 = vmatprep.subr.mxu1 %v10029_v9  ;;  %4167 = vmatpush2.msra.mxu0 %v10030_v46  ;;  %v2800_v4 = vpop.f32.mrf.mxu0 }
 0x313   :  { %4348 = vmatpush2.msra.mxu1 %v7684_v1  ;;  %4171 = vmatprep.subr.mxu0 %v10031_v44  ;;  %v10035_v1 = vld [vmem:[#allocation110_spill] sm:$0xff]  ;;  %v2944_v54 = vadd.f32 %v2943_v2, %v2799_v43 }
 0x314   :  { %4350 = vmatprep.subr.mxu1 %v7694_v19  ;;  %4175 = vmatpush2.msra.mxu0 %v10032_v14  ;;  %v2801_v19 = vadd.f32 %v2800_v4, %v2524_v26 }
 0x315   :  { %4352 = vmatpush2.msra.mxu1 %v7704_v29  ;;  %4179 = vmatprep.subr.mxu0 %v10034_v24  ;;  %v2951_v29 = vpop.f32.mrf.mxu1  ;;  %2956 = vst [vmem:[#allocation12] sm:$0xff] %v2944_v54  ;;  %v2806_v58 = vpop.f32.mrf.mxu0 }
 0x316   :  { %4356 = vmatmul.mubr.f32.vlgmr.msra.gmra.mxu1 %v10035_v1  ;;  %4183 = vmatpush2.msra.mxu0 %v10036_v6  ;;  %v2946_v27 = vadd.f32 %v2945_v12, %v2801_v19  ;;  %v2807_v3 = vadd.f32 %v2806_v58, %v2534_v25 }
 0x317   :  { %4362 = vmatprep.mubr.f32.mxu1 %v10037_v36  ;;  %4187 = vmatprep.subr.mxu0 %v10038_v42  ;;  %v2808_v55 = vpop.f32.mrf.mxu0  ;;  %v2953_v34 = vpop.f32.mrf.mxu1 }
 0x318   :  { %4191 = vmatpush2.msra.mxu0 %v10040_v0  ;;  %2957 = vst [vmem:[#allocation12 + $0x8] sm:$0xff] %v2946_v27  ;;  %v2952_v40 = vadd.f32 %v2951_v29, %v2807_v3  ;;  %v2809_v20 = vadd.f32 %v2808_v55, %v2536_v15 }
 0x319   :  { %4195 = vmatprep.subr.mxu0 %v10042_v37 }
 0x31a   :  { %4364 = vmatmul.mubr.f32.gmra.mxu1 %v10043_v7  ;;  %4199 = vmatpush2.msra.mxu0 %v10045_v51  ;;  %2958 = vst [vmem:[#allocation12 + $0x10] sm:$0xff] %v2952_v40  ;;  %v2954_v45 = vadd.f32 %v2953_v34, %v2809_v20 }
 0x31b   :  { %4203 = vmatprep.subr.mxu0 %v10047_v11 }
 0x31c   :  { %4207 = vmatpush2.msra.mxu0 %v10049_v48  ;;  %2959 = vst [vmem:[#allocation12 + $0x18] sm:$0xff] %v2954_v45 }
 0x31d   :  { %4211 = vmatmul.mubr.f32.vlgmr.msra.gmra.mxu0 %v10035_v1 }
 0x31e   :  { %4217 = vmatprep.mubr.f32.mxu0 %v10037_v36 }
 0x321   :  { %4219 = vmatmul.mubr.f32.gmra.mxu0 %v10043_v7 }
 0x322   :  { %4553 = shalt.err (!%p4550_p1)
}
 0x323   :  { %4397 = dma.vmem_to_hbm [thread:$0]  %s4392_s4, 512, %s8155_s6, [#allocation13], %s4615_s11, %s4615_s11, %s4616_s12  }
 0x324   :  { %s4562_s30 = scalar_lea.vmem %s4380_s26, 512  ;;  %p4567_p3 = scmp.lt.s32.totalorder %s4380_s26, %s4380_s26 }
 0x325   :  { %p4563_p2 = scmp.ne.s32.totalorder %s4380_s26, %s4562_s30  ;;  %p4568_p4 = scmp.lt.s32.totalorder %s4562_s30, %s4562_s30 }
 0x327   :  { %p4569_p5 = por %p4568_p4, %p4567_p3 }
 0x329   :  { %p4570_p6 = pnand %p4569_p5, %p4563_p2 }
 0x32b   :  { %4573 = shalt.err (!%p4570_p6)
}
 0x32c   :  { %4385 = dma.vmem_to_hbm [thread:$0]  %s4380_s26, 512, %s8154_s5, [#allocation4], %s4615_s11, %s4615_s11, %s4616_s12  }
 0x32d   :  { %s4621_s5 = smov [#allocation14]  }
 0x32e   :  { %s4403_s6 = sshll.u32 %s4621_s5, 4  ;;  %s4404_s6 = int_to_ptr.vmem [resolvable:$true] %s4403_s6 }
 0x32f   :  { %s4582_s10 = scalar_lea.vmem %s4404_s6, 512  ;;  %p4587_p8 = scmp.lt.s32.totalorder %s4404_s6, %s4404_s6 }
 0x330   :  { %p4583_p7 = scmp.ne.s32.totalorder %s4404_s6, %s4582_s10  ;;  %p4588_p9 = scmp.lt.s32.totalorder %s4582_s10, %s4582_s10 }
 0x332   :  { %p4589_p10 = por %p4588_p9, %p4587_p8 }
 0x334   :  { %p4590_p11 = pnand %p4589_p10, %p4583_p7 }
 0x350   :  { %v3573_v41 = vpop.f32.mrf.mxu1 }
 0x352   :  { %v3575_v39 = vpop.f32.mrf.mxu1 }
 0x354   :  { %v3581_v49 = vpop.f32.mrf.mxu1 }
 0x356   :  { %v3583_v13 = vpop.f32.mrf.mxu1 }
 0x357   :  { %v3164_v5 = vpop.f32.mrf.mxu0 }
 0x358   :  { %v3574_v59 = vadd.f32 %v3573_v41, %v3164_v5 }
 0x359   :  { %v3166_v56 = vpop.f32.mrf.mxu0 }
 0x35a   :  { %v3576_v17 = vadd.f32 %v3575_v39, %v3166_v56 }
 0x35c   :  { %v3180_v60 = vpop.f32.mrf.mxu0 }
 0x35d   :  { %v3582_v62 = vadd.f32 %v3581_v49, %v3180_v60 }
 0x35e   :  { %v3182_v23 = vpop.f32.mrf.mxu0 }
 0x35f   :  { %v3584_v46 = vadd.f32 %v3583_v13, %v3182_v23 }
 0x392   :  { %v3935_v61 = vpop.f32.mrf.mxu1 }
 0x394   :  { %v3937_v63 = vpop.f32.mrf.mxu1 }
 0x397   :  { %v3947_v30 = vpop.f32.mrf.mxu1 }
 0x399   :  { %v3949_v28 = vpop.f32.mrf.mxu1 }
 0x39b   :  { %v3784_v52 = vpop.f32.mrf.mxu0 }
 0x39c   :  { %v3785_v2 = vadd.f32 %v3784_v52, %v3574_v59 }
 0x39d   :  { %v3786_v35 = vpop.f32.mrf.mxu0 }
 0x39e   :  { %v3787_v47 = vadd.f32 %v3786_v35, %v3576_v17  ;;  %v3936_v53 = vadd.f32 %v3935_v61, %v3785_v2 }
 0x3a0   :  { %v3794_v32 = vpop.f32.mrf.mxu0  ;;  %v3938_v12 = vadd.f32 %v3937_v63, %v3787_v47 }
 0x3a1   :  { %v3795_v38 = vadd.f32 %v3794_v32, %v3582_v62 }
 0x3a2   :  { %v3796_v9 = vpop.f32.mrf.mxu0 }
 0x3a3   :  { %v3797_v8 = vadd.f32 %v3796_v9, %v3584_v46  ;;  %v3948_v10 = vadd.f32 %v3947_v30, %v3795_v38 }
 0x3a5   :  { %v3950_v54 = vadd.f32 %v3949_v28, %v3797_v8 }
 0x3d6   :  { %v4357_v16 = vpop.f32.mrf.mxu1 }
 0x3d8   :  { %v4359_v21 = vpop.f32.mrf.mxu1 }
 0x3da   :  { %v4365_v24 = vpop.f32.mrf.mxu1 }
 0x3dc   :  { %v4367_v25 = vpop.f32.mrf.mxu1 }
 0x3dd   :  { %v4212_v44 = vpop.f32.mrf.mxu0 }
 0x3de   :  { %v4213_v14 = vadd.f32 %v4212_v44, %v3936_v53 }
 0x3df   :  { %v4214_v43 = vpop.f32.mrf.mxu0 }
 0x3e0   :  { %v4358_v26 = vadd.f32 %v4357_v16, %v4213_v14  ;;  %v4215_v57 = vadd.f32 %v4214_v43, %v3938_v12 }
 0x3e1   :  { %v4220_v4 = vpop.f32.mrf.mxu0 }
 0x3e2   :  { %4370 = vst [vmem:[#allocation14] sm:$0xff] %v4358_v26  ;;  %v4360_v1 = vadd.f32 %v4359_v21, %v4215_v57  ;;  %v4221_v6 = vadd.f32 %v4220_v4, %v3948_v10 }
 0x3e3   :  { %v4222_v19 = vpop.f32.mrf.mxu0 }
 0x3e4   :  { %4371 = vst [vmem:[#allocation14 + $0x8] sm:$0xff] %v4360_v1  ;;  %v4366_v36 = vadd.f32 %v4365_v24, %v4221_v6  ;;  %v4223_v42 = vadd.f32 %v4222_v19, %v3950_v54 }
 0x3e6   :  { %4372 = vst [vmem:[#allocation14 + $0x10] sm:$0xff] %v4366_v36  ;;  %v4368_v18 = vadd.f32 %v4367_v25, %v4223_v42 }
 0x3e8   :  { %4373 = vst [vmem:[#allocation14 + $0x18] sm:$0xff] %v4368_v18 }
 0x3e9   :  { %4593 = shalt.err (!%p4590_p11)
}
 0x3ea   :  { %4409 = dma.vmem_to_hbm [thread:$0]  %s4404_s6, 512, %s8156_s7, [#allocation13], %s4615_s11, %s4615_s11, %s4616_s12  }
 0x3eb   :  { %4608 = dma.done.wait [#allocation4], 512  }
 0x3ec   :  { %4609 = vsyncadd [#allocation4], 4294966784 }
 0x3ed   :  { %4610 = dma.done.wait [#allocation13], 1024  }
 0x3ee   :  { %4611 = vsyncadd [#allocation13], 4294966272 }
 0x3ef   :  { %4419 = vsyncpa [#allocation3], 1 }
 0x3f0   :  { %4420 = vsyncpa [#allocation6], 1 }
 0x3f1   :  { %4421 = vsyncpa [#allocation9], 1 }
 0x3f2   :  { %4422 = vsyncpa [#allocation4], 1 }
 0x3f3   :  { %4423 = vsyncpa [#allocation13], 1 }

</bundles_post_ra>
